<compile_context>
chip_gen: v7x
topology: tpu7x:2x2x1
jax: 0.10.0
libtpu: 0.0.40
codegen_flags: <defaults>
</compile_context>

<pallas_src>
import functools
import math

import jax
import jax.numpy as jnp
from jax import lax
from jax.experimental import pallas as pl
from jax.experimental.pallas import tpu as pltpu


# ---------------------------------------------------------------------------
# small helpers
# ---------------------------------------------------------------------------
def _layernorm(x, gamma, beta, eps=1e-5):
    mean = jnp.mean(x, axis=-1, keepdims=True)
    var = jnp.mean((x - mean) ** 2, axis=-1, keepdims=True)
    return (x - mean) * lax.rsqrt(var + eps) * gamma + beta


# ---------------------------------------------------------------------------
# the single fused kernel
# ---------------------------------------------------------------------------
def fused_vit_kernel(*refs, b, modal, patch_num, embed_dim, head_num,
                     att_size, n_blocks, needs_pad):
    D = embed_dim
    HA = head_num * att_size
    N = b * modal
    n_in = 4 + 10 * n_blocks + 6

    xp_ref, pos_ref, wp_ref, bp_ref = refs[0:4]
    blk_refs = [refs[4 + 10 * i: 4 + 10 * (i + 1)] for i in range(n_blocks)]
    (w1_hbm, b1_ref, g1_ref, be1_ref, w2_hbm, b2_ref) = refs[4 + 10 * n_blocks:n_in]
    o_ref = refs[n_in]
    w1_vmem = refs[n_in + 1]          # bf16 (feat, 1024)
    w2_vmem = refs[n_in + 2]          # bf16 (1024, category)
    dma_sem = refs[n_in + 3]          # DMA sems (2,)
    y_scr = refs[n_in + 4]            # f32 (N*patch_num, D)  merge/flatten staging
    pad_scr = refs[n_in + 5] if needs_pad else None

    # ---- start the dense-tower weight DMAs now; they are only consumed at the
    # very end, so their transfer hides behind the 3 attention blocks. ----
    w1_copy = pltpu.make_async_copy(w1_hbm, w1_vmem, dma_sem.at[0])
    w2_copy = pltpu.make_async_copy(w2_hbm, w2_vmem, dma_sem.at[1])
    w1_copy.start()
    w2_copy.start()

    # ---- patch embedding: per-patch matmul + bias + (pre-broadcast) pos ----
    h = jnp.dot(xp_ref[...], wp_ref[...].astype(jnp.float32),
                preferred_element_type=jnp.float32)
    h = h + bp_ref[...] + pos_ref[...]

    scale = 1.0 / math.sqrt(att_size)
    P = patch_num
    for (wqkv_r, bqkv_r, wo_r, bo_r, ga_r, ba_r,
         wds_r, bds_r, gds_r, bdsl_r) in blk_refs:
        R = N * P

        # Block-diagonal additive mask generated in VMEM (no HBM input):
        # rows/cols belong to the same (batch, modal) sample iff
        # floor(idx / P) matches.  Done with float mul+floor (safe on all VPUs;
        # the +0.5 keeps the float division rounding away from integer edges).
        rowf = lax.broadcasted_iota(jnp.int32, (R, 1), 0).astype(jnp.float32)
        colf = lax.broadcasted_iota(jnp.int32, (1, R), 1).astype(jnp.float32)
        sid_r = jnp.floor((rowf + 0.5) * (1.0 / P))
        sid_c = jnp.floor((colf + 0.5) * (1.0 / P))
        madd = jnp.where(sid_r == sid_c, 0.0, -1e30)

        # fused Q/K/V projection over every (sample, patch) row at once
        qkv = (jnp.dot(h, wqkv_r[...].astype(jnp.float32),
                       preferred_element_type=jnp.float32) + bqkv_r[...])

        # per-head attention over all samples at once; the additive mask keeps
        # the softmax per sample.  The head outputs are folded into the W_o
        # projection by accumulating z_h @ W_o[h-slab] (no lane concat).
        wo_f = wo_r[...].astype(jnp.float32)
        acc = None
        for hh in range(head_num):
            q_h = qkv[:, hh * att_size:(hh + 1) * att_size]
            k_h = qkv[:, HA + hh * att_size: HA + (hh + 1) * att_size]
            v_h = qkv[:, 2 * HA + hh * att_size: 2 * HA + (hh + 1) * att_size]
            s = lax.dot_general(q_h, k_h, (((1,), (1,)), ((), ())),
                                preferred_element_type=jnp.float32)
            s = s * scale + madd
            s = s - jnp.max(s, axis=-1, keepdims=True)
            e = jnp.exp(s)
            attn = e * pl.reciprocal(jnp.sum(e, axis=-1, keepdims=True),
                                     approx=True)
            z_h = jnp.dot(attn, v_h, preferred_element_type=jnp.float32)
            contrib = jnp.dot(z_h, wo_f[hh * att_size:(hh + 1) * att_size, :],
                              preferred_element_type=jnp.float32)
            acc = contrib if acc is None else acc + contrib
        a = acc + bo_r[...]
        a = _layernorm(a, ga_r[...], ba_r[...])
        y = jnp.maximum(h + a, 0.0)                        # residual + relu

        # ---- patch merge: pair (even, odd) patches -> Linear(2D->D)+LN+relu --
        y_scr[0:R, :] = y
        if P % 2:   # static branch; only traced when some block has odd P
            Pp = P + 1
            for n in range(N):
                pad_scr[pl.ds(n * Pp, P), :] = y_scr[pl.ds(n * P, P), :]
                pad_scr[pl.ds(n * Pp + P, 1), :] = jnp.zeros((1, D), jnp.float32)
            src = pad_scr
        else:
            Pp = P
            src = y_scr
        P2 = Pp // 2
        R2 = N * P2
        y_even = src[pl.ds(0, R2, stride=2), :]
        y_odd = src[pl.ds(1, R2, stride=2), :]
        wds_f = wds_r[...].astype(jnp.float32)
        # cat([even, odd], -1) @ W_ds  ==  even @ W_ds[:D] + odd @ W_ds[D:]
        m = (jnp.dot(y_even, wds_f[0:D, :], preferred_element_type=jnp.float32)
             + jnp.dot(y_odd, wds_f[D:2 * D, :], preferred_element_type=jnp.float32)
             + bds_r[...])
        m = _layernorm(m, gds_r[...], bdsl_r[...])
        h = jnp.maximum(m, 0.0)                            # (N*P2, D)
        P = P2

    # ---- flatten + dense tower (chunked gather, no sublane->lane reshape) ----
    G = modal * P                                          # D-wide chunks / batch
    y_scr[0:N * P, :] = h
    # hf[bi, r*D:(r+1)*D] = h[bi*G + r, :]   (matches nn.Flatten row-major order)
    hf = jnp.concatenate([y_scr[pl.ds(r, b, stride=G), :] for r in range(G)],
                         axis=-1)                          # (b, G*D)
    w1_copy.wait()
    w2_copy.wait()
    t = (jnp.dot(hf, w1_vmem[...].astype(jnp.float32),
                 preferred_element_type=jnp.float32) + b1_ref[...])
    t = jnp.maximum(_layernorm(t, g1_ref[...], be1_ref[...]), 0.0)
    o_ref[...] = (jnp.dot(t, w2_vmem[...].astype(jnp.float32),
                          preferred_element_type=jnp.float32) + b2_ref[...])


# ---------------------------------------------------------------------------
# wrapper: layout plumbing + one pallas_call
# ---------------------------------------------------------------------------
def vision_transformer_forward(x, params, *, patch_size, head_num, att_size):
    b, c, S, M = x.shape
    assert c == 1
    P0 = S // patch_size
    D = params["w_patch"].shape[1]
    N = b * M
    n_blocks = len(params["blocks"])
    category = params["w2"].shape[1]

    # Conv2d(1, D, (ps,1), stride=(ps,1)) == per-patch matmul: row (bi, mi, p)
    # holds x[bi, 0, p*ps:(p+1)*ps, mi].
    xp = x[:, 0, :P0 * patch_size, :]
    xp = xp.reshape(b, P0, patch_size, M).transpose(0, 3, 1, 2)
    xp = xp.reshape(N * P0, patch_size)
    # positional embedding pre-broadcast over batch (tiny; removes an in-kernel
    # sublane concat).
    pos2d = jnp.tile(params["pos"].reshape(M * P0, D), (b, 1))

    bf = lambda w: w.astype(jnp.bfloat16)   # weights travel HBM->VMEM as bf16

    blk_args = []
    needs_pad = False
    P = P0
    for blk in params["blocks"]:
        if P % 2:
            needs_pad = True
        wqkv = jnp.concatenate([blk["wq"], blk["wk"], blk["wv"]], axis=1)
        bqkv = jnp.concatenate([blk["bq"], blk["bk"], blk["bv"]], axis=1)
        blk_args += [bf(wqkv), bqkv, bf(blk["wo"]), blk["bo"], blk["g_att"],
                     blk["b_att_ln"], bf(blk["w_ds"]), blk["b_ds"], blk["g_ds"],
                     blk["b_ds_ln"]]
        P = (P + 1) // 2

    n_in = 4 + 10 * n_blocks + 6
    vm = pl.BlockSpec(memory_space=pltpu.MemorySpace.VMEM)
    in_specs = [vm] * n_in
    w1_pos = 4 + 10 * n_blocks
    in_specs[w1_pos] = pl.BlockSpec(memory_space=pl.ANY)       # w1 stays in HBM
    in_specs[w1_pos + 4] = pl.BlockSpec(memory_space=pl.ANY)   # w2 stays in HBM

    scratch = [pltpu.VMEM(params["w1"].shape, jnp.bfloat16),
               pltpu.VMEM(params["w2"].shape, jnp.bfloat16),
               pltpu.SemaphoreType.DMA((2,)),
               pltpu.VMEM((N * P0, D), jnp.float32)]
    if needs_pad:
        scratch.append(pltpu.VMEM((N * (P0 + 1), D), jnp.float32))

    kern = functools.partial(
        fused_vit_kernel, b=b, modal=M, patch_num=P0, embed_dim=D,
        head_num=head_num, att_size=att_size, n_blocks=n_blocks,
        needs_pad=needs_pad)

    return pl.pallas_call(
        kern,
        out_shape=jax.ShapeDtypeStruct((b, category), jnp.float32),
        in_specs=in_specs,
        out_specs=pl.BlockSpec(memory_space=pltpu.MemorySpace.VMEM),
        scratch_shapes=scratch,
    )(xp, pos2d, bf(params["w_patch"]), params["b_patch"], *blk_args,
      bf(params["w1"]), params["b1"], params["g1"], params["be1"],
      bf(params["w2"]), params["b2"])


# ---------------------------------------------------------------------------
# deterministic parameter init (shapes follow the PyTorch __init__)
# Weight matrices are stored bf16-rounded (f32-typed) so the bf16 DMA in the
# kernel path is lossless and the pure-JAX reference sees identical values.
# ---------------------------------------------------------------------------
def init_params(key, *, series, modal, embedding_dim, patch_size,
                head_num, att_size, category):
    D, HA = embedding_dim, head_num * att_size
    P0 = series // patch_size
    keys = iter(jax.random.split(key, 64))

    def lin(kin, kout):
        w = jax.random.normal(next(keys), (kin, kout), jnp.float32) / math.sqrt(kin)
        w = w.astype(jnp.bfloat16).astype(jnp.float32)   # bf16-representable
        bb = jax.random.normal(next(keys), (1, kout), jnp.float32) * 0.01
        return w, bb

    w_patch, b_patch = lin(patch_size, D)
    pos = jax.random.normal(next(keys), (1, modal, P0, D), jnp.float32) * 0.02

    blocks = []
    for _ in range(3):
        wq, bq = lin(D, HA)
        wk, bk = lin(D, HA)
        wv, bv = lin(D, HA)
        wo, bo = lin(HA, D)
        w_ds, b_ds = lin(2 * D, D)
        blocks.append(dict(
            wq=wq, bq=bq, wk=wk, bk=bk, wv=wv, bv=bv, wo=wo, bo=bo,
            g_att=jnp.ones((1, D), jnp.float32), b_att_ln=jnp.zeros((1, D), jnp.float32),
            w_ds=w_ds, b_ds=b_ds,
            g_ds=jnp.ones((1, D), jnp.float32), b_ds_ln=jnp.zeros((1, D), jnp.float32)))

    Pf = P0
    for _ in range(3):
        Pf = (Pf + 1) // 2                                 # == ceil(P0 / 8)
    feat = modal * Pf * D
    w1, b1 = lin(feat, 1024)
    w2, b2 = lin(1024, category)
    return dict(w_patch=w_patch, b_patch=b_patch, pos=pos, blocks=blocks,
                w1=w1, b1=b1, g1=jnp.ones((1, 1024), jnp.float32),
                be1=jnp.zeros((1, 1024), jnp.float32), w2=w2, b2=b2)


# ---------------------------------------------------------------------------
# plain-JAX reference (mirrors the PyTorch forward exactly)
# ---------------------------------------------------------------------------
def reference_forward(x, params, *, patch_size, head_num, att_size):
    b, c, S, M = x.shape
    D = params["w_patch"].shape[1]
    P = S // patch_size
    xp = x[:, 0, :P * patch_size, :].reshape(b, P, patch_size, M)
    h = jnp.einsum("bpkm,ke->bmpe", xp, params["w_patch"]) + params["b_patch"][0]
    h = h + params["pos"]
    HA = head_num * att_size
    for blk in params["blocks"]:
        q, k, v = (h @ blk["wq"] + blk["bq"][0],
                   h @ blk["wk"] + blk["bk"][0],
                   h @ blk["wv"] + blk["bv"][0])
        def heads(t):
            return t.reshape(*t.shape[:3], head_num, att_size).transpose(0, 1, 3, 2, 4)
        qh, kh, vh = heads(q), heads(k), heads(v)
        s = jnp.einsum("bmhpa,bmhqa->bmhpq", qh, kh) / math.sqrt(att_size)
        z = jnp.einsum("bmhpq,bmhqa->bmhpa", jax.nn.softmax(s, axis=-1), vh)
        z = z.transpose(0, 1, 3, 2, 4).reshape(*h.shape[:3], HA)
        a = _layernorm(z @ blk["wo"] + blk["bo"][0], blk["g_att"][0], blk["b_att_ln"][0])
        y = jax.nn.relu(h + a)
        if y.shape[2] % 2:
            y = jnp.pad(y, ((0, 0), (0, 0), (0, 1), (0, 0)))
        yc = jnp.concatenate([y[:, :, 0::2, :], y[:, :, 1::2, :]], axis=-1)
        m = _layernorm(yc @ blk["w_ds"] + blk["b_ds"][0], blk["g_ds"][0], blk["b_ds_ln"][0])
        h = jax.nn.relu(m)
    hf = h.reshape(b, -1)
    t = jax.nn.relu(_layernorm(hf @ params["w1"] + params["b1"][0],
                               params["g1"][0], params["be1"][0]))
    return t @ params["w2"] + params["b2"][0]


# ---------------------------------------------------------------------------
if __name__ == "__main__":
    batch, channels, series, modal = 2, 1, 32, 4
    patch_size, embedding_dim, head_num, att_size, category = 4, 32, 2, 16, 6

    key = jax.random.PRNGKey(0)
    kx, kp = jax.random.split(key)
    x = jax.random.normal(kx, (batch, channels, series, modal), jnp.float32)
    params = init_params(kp, series=series, modal=modal, embedding_dim=embedding_dim,
                         patch_size=patch_size, head_num=head_num,
                         att_size=att_size, category=category)

    fwd = jax.jit(functools.partial(vision_transformer_forward,
                                    patch_size=patch_size, head_num=head_num,
                                    att_size=att_size))
    out = jax.block_until_ready(fwd(x, params))
    assert out.shape == (batch, category)

    with jax.default_matmul_precision("highest"):
        ref = jax.block_until_ready(
            reference_forward(x, params, patch_size=patch_size,
                              head_num=head_num, att_size=att_size))
    assert bool(jnp.allclose(out, ref, atol=2e-2, rtol=2e-2)), \
        float(jnp.max(jnp.abs(out - ref)))

    print("KERNEL_OK")
</pallas_src>

<mosaic_0001>
module attributes {stable_mosaic.version = 11 : i64} {
  func.func @fused_vit_kernel(%arg0: memref<64x4xf32, #tpu.memory_space<vmem>>, %arg1: memref<64x32xf32, #tpu.memory_space<vmem>>, %arg2: memref<4x32xbf16, #tpu.memory_space<vmem>>, %arg3: memref<1x32xf32, #tpu.memory_space<vmem>>, %arg4: memref<32x96xbf16, #tpu.memory_space<vmem>>, %arg5: memref<1x96xf32, #tpu.memory_space<vmem>>, %arg6: memref<32x32xbf16, #tpu.memory_space<vmem>>, %arg7: memref<1x32xf32, #tpu.memory_space<vmem>>, %arg8: memref<1x32xf32, #tpu.memory_space<vmem>>, %arg9: memref<1x32xf32, #tpu.memory_space<vmem>>, %arg10: memref<64x32xbf16, #tpu.memory_space<vmem>>, %arg11: memref<1x32xf32, #tpu.memory_space<vmem>>, %arg12: memref<1x32xf32, #tpu.memory_space<vmem>>, %arg13: memref<1x32xf32, #tpu.memory_space<vmem>>, %arg14: memref<32x96xbf16, #tpu.memory_space<vmem>>, %arg15: memref<1x96xf32, #tpu.memory_space<vmem>>, %arg16: memref<32x32xbf16, #tpu.memory_space<vmem>>, %arg17: memref<1x32xf32, #tpu.memory_space<vmem>>, %arg18: memref<1x32xf32, #tpu.memory_space<vmem>>, %arg19: memref<1x32xf32, #tpu.memory_space<vmem>>, %arg20: memref<64x32xbf16, #tpu.memory_space<vmem>>, %arg21: memref<1x32xf32, #tpu.memory_space<vmem>>, %arg22: memref<1x32xf32, #tpu.memory_space<vmem>>, %arg23: memref<1x32xf32, #tpu.memory_space<vmem>>, %arg24: memref<32x96xbf16, #tpu.memory_space<vmem>>, %arg25: memref<1x96xf32, #tpu.memory_space<vmem>>, %arg26: memref<32x32xbf16, #tpu.memory_space<vmem>>, %arg27: memref<1x32xf32, #tpu.memory_space<vmem>>, %arg28: memref<1x32xf32, #tpu.memory_space<vmem>>, %arg29: memref<1x32xf32, #tpu.memory_space<vmem>>, %arg30: memref<64x32xbf16, #tpu.memory_space<vmem>>, %arg31: memref<1x32xf32, #tpu.memory_space<vmem>>, %arg32: memref<1x32xf32, #tpu.memory_space<vmem>>, %arg33: memref<1x32xf32, #tpu.memory_space<vmem>>, %arg34: memref<128x1024xbf16, #tpu.memory_space<any>>, %arg35: memref<1x1024xf32, #tpu.memory_space<vmem>>, %arg36: memref<1x1024xf32, #tpu.memory_space<vmem>>, %arg37: memref<1x1024xf32, #tpu.memory_space<vmem>>, %arg38: memref<1024x6xbf16, #tpu.memory_space<any>>, %arg39: memref<1x6xf32, #tpu.memory_space<vmem>>, %arg40: memref<2x6xf32, #tpu.memory_space<vmem>>, %arg41: memref<128x1024xbf16, #tpu.memory_space<vmem>>, %arg42: memref<1024x6xbf16, #tpu.memory_space<vmem>>, %arg43: memref<2x!tpu.dma_semaphore, #tpu.memory_space<semaphore_mem>>, %arg44: memref<64x32xf32, #tpu.memory_space<vmem>>) attributes {dimension_semantics = [], scalar_prefetch = 0 : i64, scratch_operands = 4 : i64, tpu.core_type = #tpu.core_type<tc>} {
    %c0_i32 = arith.constant 0 : i32
    %0 = tpu.memref_slice %arg43[%c0_i32] : memref<2x!tpu.dma_semaphore, #tpu.memory_space<semaphore_mem>> -> memref<1x!tpu.dma_semaphore, #tpu.memory_space<semaphore_mem>>
    %1 = tpu.memref_squeeze %0 : memref<1x!tpu.dma_semaphore, #tpu.memory_space<semaphore_mem>> -> memref<!tpu.dma_semaphore, #tpu.memory_space<semaphore_mem>>
    tpu.enqueue_dma source(%arg34 : memref<128x1024xbf16, #tpu.memory_space<any>>) target(%arg41 : memref<128x1024xbf16, #tpu.memory_space<vmem>>) target_semaphore(%1 : memref<!tpu.dma_semaphore, #tpu.memory_space<semaphore_mem>>)
    %c1_i32 = arith.constant 1 : i32
    %2 = tpu.memref_slice %arg43[%c1_i32] : memref<2x!tpu.dma_semaphore, #tpu.memory_space<semaphore_mem>> -> memref<1x!tpu.dma_semaphore, #tpu.memory_space<semaphore_mem>>
    %3 = tpu.memref_squeeze %2 : memref<1x!tpu.dma_semaphore, #tpu.memory_space<semaphore_mem>> -> memref<!tpu.dma_semaphore, #tpu.memory_space<semaphore_mem>>
    tpu.enqueue_dma source(%arg38 : memref<1024x6xbf16, #tpu.memory_space<any>>) target(%arg42 : memref<1024x6xbf16, #tpu.memory_space<vmem>>) target_semaphore(%3 : memref<!tpu.dma_semaphore, #tpu.memory_space<semaphore_mem>>)
    %c0 = arith.constant 0 : index
    %c0_0 = arith.constant 0 : index
    %4 = vector.load %arg0[%c0, %c0_0] : memref<64x4xf32, #tpu.memory_space<vmem>>, vector<64x4xf32>
    %c0_1 = arith.constant 0 : index
    %c0_2 = arith.constant 0 : index
    %5 = vector.load %arg2[%c0_1, %c0_2] : memref<4x32xbf16, #tpu.memory_space<vmem>>, vector<4x32xbf16>
    %6 = arith.extf %5 : vector<4x32xbf16> to vector<4x32xf32>
    %cst = arith.constant dense<0.000000e+00> : vector<64x32xf32>
    %7 = tpu.matmul %4, %6, %cst {dimension_numbers = #tpu.dot_dimension_numbers<[1], [0], [0], [1], [0, 0, 1, 1], [], []>} : vector<64x4xf32>, vector<4x32xf32>, vector<64x32xf32> -> vector<64x32xf32>
    %c0_3 = arith.constant 0 : index
    %c0_4 = arith.constant 0 : index
    %8 = vector.load %arg3[%c0_3, %c0_4] : memref<1x32xf32, #tpu.memory_space<vmem>>, vector<1x32xf32>
    %9 = vector.broadcast %8 : vector<1x32xf32> to vector<64x32xf32>
    %10 = arith.addf %7, %9 : vector<64x32xf32>
    %c0_5 = arith.constant 0 : index
    %c0_6 = arith.constant 0 : index
    %11 = vector.load %arg1[%c0_5, %c0_6] : memref<64x32xf32, #tpu.memory_space<vmem>>, vector<64x32xf32>
    %12 = arith.addf %10, %11 : vector<64x32xf32>
    %13 = tpu.iota {dimensions = array<i32: 0>} : vector<64x1xi32>
    %14 = arith.sitofp %13 : vector<64x1xi32> to vector<64x1xf32>
    %15 = tpu.iota {dimensions = array<i32: 1>} : vector<1x64xi32>
    %16 = arith.sitofp %15 : vector<1x64xi32> to vector<1x64xf32>
    %cst_7 = arith.constant 5.000000e-01 : f32
    %17 = vector.broadcast %cst_7 : f32 to vector<64x1xf32>
    %18 = arith.addf %14, %17 : vector<64x1xf32>
    %cst_8 = arith.constant 1.250000e-01 : f32
    %19 = vector.broadcast %cst_8 : f32 to vector<64x1xf32>
    %20 = arith.mulf %18, %19 : vector<64x1xf32>
    %21 = math.floor %20 : vector<64x1xf32>
    %cst_9 = arith.constant 5.000000e-01 : f32
    %22 = vector.broadcast %cst_9 : f32 to vector<1x64xf32>
    %23 = arith.addf %16, %22 : vector<1x64xf32>
    %cst_10 = arith.constant 1.250000e-01 : f32
    %24 = vector.broadcast %cst_10 : f32 to vector<1x64xf32>
    %25 = arith.mulf %23, %24 : vector<1x64xf32>
    %26 = math.floor %25 : vector<1x64xf32>
    %27 = vector.broadcast %21 : vector<64x1xf32> to vector<64x64xf32>
    %28 = vector.broadcast %26 : vector<1x64xf32> to vector<64x64xf32>
    %29 = arith.cmpf oeq, %27, %28 : vector<64x64xf32>
    %cst_11 = arith.constant 0.000000e+00 : f32
    %cst_12 = arith.constant -1.000000e+30 : f32
    %30 = vector.broadcast %cst_11 : f32 to vector<64x64xf32>
    %31 = vector.broadcast %cst_12 : f32 to vector<64x64xf32>
    %32 = arith.select %29, %30, %31 : vector<64x64xi1>, vector<64x64xf32>
    %c0_13 = arith.constant 0 : index
    %c0_14 = arith.constant 0 : index
    %33 = vector.load %arg4[%c0_13, %c0_14] : memref<32x96xbf16, #tpu.memory_space<vmem>>, vector<32x96xbf16>
    %34 = arith.extf %33 : vector<32x96xbf16> to vector<32x96xf32>
    %cst_15 = arith.constant dense<0.000000e+00> : vector<64x96xf32>
    %35 = tpu.matmul %12, %34, %cst_15 {dimension_numbers = #tpu.dot_dimension_numbers<[1], [0], [0], [1], [0, 0, 1, 1], [], []>} : vector<64x32xf32>, vector<32x96xf32>, vector<64x96xf32> -> vector<64x96xf32>
    %c0_16 = arith.constant 0 : index
    %c0_17 = arith.constant 0 : index
    %36 = vector.load %arg5[%c0_16, %c0_17] : memref<1x96xf32, #tpu.memory_space<vmem>>, vector<1x96xf32>
    %37 = vector.broadcast %36 : vector<1x96xf32> to vector<64x96xf32>
    %38 = arith.addf %35, %37 : vector<64x96xf32>
    %c0_18 = arith.constant 0 : index
    %c0_19 = arith.constant 0 : index
    %39 = vector.load %arg6[%c0_18, %c0_19] : memref<32x32xbf16, #tpu.memory_space<vmem>>, vector<32x32xbf16>
    %40 = arith.extf %39 : vector<32x32xbf16> to vector<32x32xf32>
    %41 = vector.extract_strided_slice %38 {offsets = [0, 0], sizes = [64, 16], strides = [1, 1]} : vector<64x96xf32> to vector<64x16xf32>
    %42 = vector.extract_strided_slice %38 {offsets = [0, 32], sizes = [64, 16], strides = [1, 1]} : vector<64x96xf32> to vector<64x16xf32>
    %43 = vector.extract_strided_slice %38 {offsets = [0, 64], sizes = [64, 16], strides = [1, 1]} : vector<64x96xf32> to vector<64x16xf32>
    %cst_20 = arith.constant dense<0.000000e+00> : vector<64x64xf32>
    %44 = tpu.matmul %41, %42, %cst_20 {dimension_numbers = #tpu.dot_dimension_numbers<[1], [1], [0], [0], [0, 0, 1, 0], [], []>} : vector<64x16xf32>, vector<64x16xf32>, vector<64x64xf32> -> vector<64x64xf32>
    %cst_21 = arith.constant 2.500000e-01 : f32
    %45 = vector.broadcast %cst_21 : f32 to vector<64x64xf32>
    %46 = arith.mulf %44, %45 : vector<64x64xf32>
    %47 = arith.addf %46, %32 : vector<64x64xf32>
    %cst_22 = arith.constant dense<0xFF800000> : vector<64xf32>
    %48 = vector.multi_reduction <maximumf>, %47, %cst_22 [1] : vector<64x64xf32> to vector<64xf32>
    %49 = vector.shape_cast %48 : vector<64xf32> to vector<64x1xf32>
    %50 = vector.broadcast %49 : vector<64x1xf32> to vector<64x64xf32>
    %51 = arith.subf %47, %50 : vector<64x64xf32>
    %52 = math.exp %51 : vector<64x64xf32>
    %cst_23 = arith.constant dense<0.000000e+00> : vector<64xf32>
    %53 = vector.multi_reduction <add>, %52, %cst_23 [1] : vector<64x64xf32> to vector<64xf32>
    %54 = vector.shape_cast %53 : vector<64xf32> to vector<64x1xf32>
    %55 = tpu.reciprocal %54 {approx = true} : vector<64x1xf32> -> vector<64x1xf32>
    %56 = vector.broadcast %55 : vector<64x1xf32> to vector<64x64xf32>
    %57 = arith.mulf %52, %56 : vector<64x64xf32>
    %cst_24 = arith.constant dense<0.000000e+00> : vector<64x16xf32>
    %58 = tpu.matmul %57, %43, %cst_24 {dimension_numbers = #tpu.dot_dimension_numbers<[1], [0], [0], [1], [0, 0, 1, 1], [], []>} : vector<64x64xf32>, vector<64x16xf32>, vector<64x16xf32> -> vector<64x16xf32>
    %59 = vector.extract_strided_slice %40 {offsets = [0, 0], sizes = [16, 32], strides = [1, 1]} : vector<32x32xf32> to vector<16x32xf32>
    %cst_25 = arith.constant dense<0.000000e+00> : vector<64x32xf32>
    %60 = tpu.matmul %58, %59, %cst_25 {dimension_numbers = #tpu.dot_dimension_numbers<[1], [0], [0], [1], [0, 0, 1, 1], [], []>} : vector<64x16xf32>, vector<16x32xf32>, vector<64x32xf32> -> vector<64x32xf32>
    %61 = vector.extract_strided_slice %38 {offsets = [0, 16], sizes = [64, 16], strides = [1, 1]} : vector<64x96xf32> to vector<64x16xf32>
    %62 = vector.extract_strided_slice %38 {offsets = [0, 48], sizes = [64, 16], strides = [1, 1]} : vector<64x96xf32> to vector<64x16xf32>
    %63 = vector.extract_strided_slice %38 {offsets = [0, 80], sizes = [64, 16], strides = [1, 1]} : vector<64x96xf32> to vector<64x16xf32>
    %cst_26 = arith.constant dense<0.000000e+00> : vector<64x64xf32>
    %64 = tpu.matmul %61, %62, %cst_26 {dimension_numbers = #tpu.dot_dimension_numbers<[1], [1], [0], [0], [0, 0, 1, 0], [], []>} : vector<64x16xf32>, vector<64x16xf32>, vector<64x64xf32> -> vector<64x64xf32>
    %cst_27 = arith.constant 2.500000e-01 : f32
    %65 = vector.broadcast %cst_27 : f32 to vector<64x64xf32>
    %66 = arith.mulf %64, %65 : vector<64x64xf32>
    %67 = arith.addf %66, %32 : vector<64x64xf32>
    %cst_28 = arith.constant dense<0xFF800000> : vector<64xf32>
    %68 = vector.multi_reduction <maximumf>, %67, %cst_28 [1] : vector<64x64xf32> to vector<64xf32>
    %69 = vector.shape_cast %68 : vector<64xf32> to vector<64x1xf32>
    %70 = vector.broadcast %69 : vector<64x1xf32> to vector<64x64xf32>
    %71 = arith.subf %67, %70 : vector<64x64xf32>
    %72 = math.exp %71 : vector<64x64xf32>
    %cst_29 = arith.constant dense<0.000000e+00> : vector<64xf32>
    %73 = vector.multi_reduction <add>, %72, %cst_29 [1] : vector<64x64xf32> to vector<64xf32>
    %74 = vector.shape_cast %73 : vector<64xf32> to vector<64x1xf32>
    %75 = tpu.reciprocal %74 {approx = true} : vector<64x1xf32> -> vector<64x1xf32>
    %76 = vector.broadcast %75 : vector<64x1xf32> to vector<64x64xf32>
    %77 = arith.mulf %72, %76 : vector<64x64xf32>
    %cst_30 = arith.constant dense<0.000000e+00> : vector<64x16xf32>
    %78 = tpu.matmul %77, %63, %cst_30 {dimension_numbers = #tpu.dot_dimension_numbers<[1], [0], [0], [1], [0, 0, 1, 1], [], []>} : vector<64x64xf32>, vector<64x16xf32>, vector<64x16xf32> -> vector<64x16xf32>
    %79 = vector.extract_strided_slice %40 {offsets = [16, 0], sizes = [16, 32], strides = [1, 1]} : vector<32x32xf32> to vector<16x32xf32>
    %cst_31 = arith.constant dense<0.000000e+00> : vector<64x32xf32>
    %80 = tpu.matmul %78, %79, %cst_31 {dimension_numbers = #tpu.dot_dimension_numbers<[1], [0], [0], [1], [0, 0, 1, 1], [], []>} : vector<64x16xf32>, vector<16x32xf32>, vector<64x32xf32> -> vector<64x32xf32>
    %81 = arith.addf %60, %80 : vector<64x32xf32>
    %c0_32 = arith.constant 0 : index
    %c0_33 = arith.constant 0 : index
    %82 = vector.load %arg7[%c0_32, %c0_33] : memref<1x32xf32, #tpu.memory_space<vmem>>, vector<1x32xf32>
    %83 = vector.broadcast %82 : vector<1x32xf32> to vector<64x32xf32>
    %84 = arith.addf %81, %83 : vector<64x32xf32>
    %c0_34 = arith.constant 0 : index
    %c0_35 = arith.constant 0 : index
    %85 = vector.load %arg8[%c0_34, %c0_35] : memref<1x32xf32, #tpu.memory_space<vmem>>, vector<1x32xf32>
    %c0_36 = arith.constant 0 : index
    %c0_37 = arith.constant 0 : index
    %86 = vector.load %arg9[%c0_36, %c0_37] : memref<1x32xf32, #tpu.memory_space<vmem>>, vector<1x32xf32>
    %cst_38 = arith.constant dense<0.000000e+00> : vector<64xf32>
    %87 = vector.multi_reduction <add>, %84, %cst_38 [1] : vector<64x32xf32> to vector<64xf32>
    %88 = vector.shape_cast %87 : vector<64xf32> to vector<64x1xf32>
    %cst_39 = arith.constant 3.200000e+01 : f32
    %89 = vector.broadcast %cst_39 : f32 to vector<64x1xf32>
    %90 = arith.divf %88, %89 : vector<64x1xf32>
    %91 = vector.broadcast %90 : vector<64x1xf32> to vector<64x32xf32>
    %92 = arith.subf %84, %91 : vector<64x32xf32>
    %93 = arith.mulf %92, %92 : vector<64x32xf32>
    %cst_40 = arith.constant dense<0.000000e+00> : vector<64xf32>
    %94 = vector.multi_reduction <add>, %93, %cst_40 [1] : vector<64x32xf32> to vector<64xf32>
    %95 = vector.shape_cast %94 : vector<64xf32> to vector<64x1xf32>
    %cst_41 = arith.constant 3.200000e+01 : f32
    %96 = vector.broadcast %cst_41 : f32 to vector<64x1xf32>
    %97 = arith.divf %95, %96 : vector<64x1xf32>
    %98 = vector.broadcast %90 : vector<64x1xf32> to vector<64x32xf32>
    %99 = arith.subf %84, %98 : vector<64x32xf32>
    %cst_42 = arith.constant 9.99999974E-6 : f32
    %100 = vector.broadcast %cst_42 : f32 to vector<64x1xf32>
    %101 = arith.addf %97, %100 : vector<64x1xf32>
    %102 = math.rsqrt %101 : vector<64x1xf32>
    %103 = vector.broadcast %102 : vector<64x1xf32> to vector<64x32xf32>
    %104 = arith.mulf %99, %103 : vector<64x32xf32>
    %105 = vector.broadcast %85 : vector<1x32xf32> to vector<64x32xf32>
    %106 = arith.mulf %104, %105 : vector<64x32xf32>
    %107 = vector.broadcast %86 : vector<1x32xf32> to vector<64x32xf32>
    %108 = arith.addf %106, %107 : vector<64x32xf32>
    %109 = arith.addf %12, %108 : vector<64x32xf32>
    %cst_43 = arith.constant 0.000000e+00 : f32
    %110 = vector.broadcast %cst_43 : f32 to vector<64x32xf32>
    %111 = arith.maximumf %109, %110 : vector<64x32xf32>
    %c0_44 = arith.constant 0 : index
    %c0_45 = arith.constant 0 : index
    %112 = vector.load %arg44[%c0_44, %c0_45] : memref<64x32xf32, #tpu.memory_space<vmem>>, vector<64x32xf32>
    tpu.vector_store %arg44[%c0_44, %c0_45], %111 {strides = array<i32>} : memref<64x32xf32, #tpu.memory_space<vmem>>, vector<64x32xf32>,
    %c0_46 = arith.constant 0 : index
    %c0_47 = arith.constant 0 : index
    %113 = tpu.strided_load %arg44[%c0_46, %c0_47] {strides = array<i32: 2, 1>} : memref<64x32xf32, #tpu.memory_space<vmem>>, vector<32x32xf32>
    %c1 = arith.constant 1 : index
    %c0_48 = arith.constant 0 : index
    %114 = tpu.strided_load %arg44[%c1, %c0_48] {strides = array<i32: 2, 1>} : memref<64x32xf32, #tpu.memory_space<vmem>>, vector<32x32xf32>
    %c0_49 = arith.constant 0 : index
    %c0_50 = arith.constant 0 : index
    %115 = vector.load %arg10[%c0_49, %c0_50] : memref<64x32xbf16, #tpu.memory_space<vmem>>, vector<64x32xbf16>
    %116 = arith.extf %115 : vector<64x32xbf16> to vector<64x32xf32>
    %117 = vector.extract_strided_slice %116 {offsets = [0, 0], sizes = [32, 32], strides = [1, 1]} : vector<64x32xf32> to vector<32x32xf32>
    %cst_51 = arith.constant dense<0.000000e+00> : vector<32x32xf32>
    %118 = tpu.matmul %113, %117, %cst_51 {dimension_numbers = #tpu.dot_dimension_numbers<[1], [0], [0], [1], [0, 0, 1, 1], [], []>} : vector<32x32xf32>, vector<32x32xf32>, vector<32x32xf32> -> vector<32x32xf32>
    %119 = vector.extract_strided_slice %116 {offsets = [32, 0], sizes = [32, 32], strides = [1, 1]} : vector<64x32xf32> to vector<32x32xf32>
    %cst_52 = arith.constant dense<0.000000e+00> : vector<32x32xf32>
    %120 = tpu.matmul %114, %119, %cst_52 {dimension_numbers = #tpu.dot_dimension_numbers<[1], [0], [0], [1], [0, 0, 1, 1], [], []>} : vector<32x32xf32>, vector<32x32xf32>, vector<32x32xf32> -> vector<32x32xf32>
    %121 = arith.addf %118, %120 : vector<32x32xf32>
    %c0_53 = arith.constant 0 : index
    %c0_54 = arith.constant 0 : index
    %122 = vector.load %arg11[%c0_53, %c0_54] : memref<1x32xf32, #tpu.memory_space<vmem>>, vector<1x32xf32>
    %123 = vector.broadcast %122 : vector<1x32xf32> to vector<32x32xf32>
    %124 = arith.addf %121, %123 : vector<32x32xf32>
    %c0_55 = arith.constant 0 : index
    %c0_56 = arith.constant 0 : index
    %125 = vector.load %arg12[%c0_55, %c0_56] : memref<1x32xf32, #tpu.memory_space<vmem>>, vector<1x32xf32>
    %c0_57 = arith.constant 0 : index
    %c0_58 = arith.constant 0 : index
    %126 = vector.load %arg13[%c0_57, %c0_58] : memref<1x32xf32, #tpu.memory_space<vmem>>, vector<1x32xf32>
    %cst_59 = arith.constant dense<0.000000e+00> : vector<32xf32>
    %127 = vector.multi_reduction <add>, %124, %cst_59 [1] : vector<32x32xf32> to vector<32xf32>
    %128 = vector.shape_cast %127 : vector<32xf32> to vector<32x1xf32>
    %cst_60 = arith.constant 3.200000e+01 : f32
    %129 = vector.broadcast %cst_60 : f32 to vector<32x1xf32>
    %130 = arith.divf %128, %129 : vector<32x1xf32>
    %131 = vector.broadcast %130 : vector<32x1xf32> to vector<32x32xf32>
    %132 = arith.subf %124, %131 : vector<32x32xf32>
    %133 = arith.mulf %132, %132 : vector<32x32xf32>
    %cst_61 = arith.constant dense<0.000000e+00> : vector<32xf32>
    %134 = vector.multi_reduction <add>, %133, %cst_61 [1] : vector<32x32xf32> to vector<32xf32>
    %135 = vector.shape_cast %134 : vector<32xf32> to vector<32x1xf32>
    %cst_62 = arith.constant 3.200000e+01 : f32
    %136 = vector.broadcast %cst_62 : f32 to vector<32x1xf32>
    %137 = arith.divf %135, %136 : vector<32x1xf32>
    %138 = vector.broadcast %130 : vector<32x1xf32> to vector<32x32xf32>
    %139 = arith.subf %124, %138 : vector<32x32xf32>
    %cst_63 = arith.constant 9.99999974E-6 : f32
    %140 = vector.broadcast %cst_63 : f32 to vector<32x1xf32>
    %141 = arith.addf %137, %140 : vector<32x1xf32>
    %142 = math.rsqrt %141 : vector<32x1xf32>
    %143 = vector.broadcast %142 : vector<32x1xf32> to vector<32x32xf32>
    %144 = arith.mulf %139, %143 : vector<32x32xf32>
    %145 = vector.broadcast %125 : vector<1x32xf32> to vector<32x32xf32>
    %146 = arith.mulf %144, %145 : vector<32x32xf32>
    %147 = vector.broadcast %126 : vector<1x32xf32> to vector<32x32xf32>
    %148 = arith.addf %146, %147 : vector<32x32xf32>
    %cst_64 = arith.constant 0.000000e+00 : f32
    %149 = vector.broadcast %cst_64 : f32 to vector<32x32xf32>
    %150 = arith.maximumf %148, %149 : vector<32x32xf32>
    %151 = tpu.iota {dimensions = array<i32: 0>} : vector<32x1xi32>
    %152 = arith.sitofp %151 : vector<32x1xi32> to vector<32x1xf32>
    %153 = tpu.iota {dimensions = array<i32: 1>} : vector<1x32xi32>
    %154 = arith.sitofp %153 : vector<1x32xi32> to vector<1x32xf32>
    %cst_65 = arith.constant 5.000000e-01 : f32
    %155 = vector.broadcast %cst_65 : f32 to vector<32x1xf32>
    %156 = arith.addf %152, %155 : vector<32x1xf32>
    %cst_66 = arith.constant 2.500000e-01 : f32
    %157 = vector.broadcast %cst_66 : f32 to vector<32x1xf32>
    %158 = arith.mulf %156, %157 : vector<32x1xf32>
    %159 = math.floor %158 : vector<32x1xf32>
    %cst_67 = arith.constant 5.000000e-01 : f32
    %160 = vector.broadcast %cst_67 : f32 to vector<1x32xf32>
    %161 = arith.addf %154, %160 : vector<1x32xf32>
    %cst_68 = arith.constant 2.500000e-01 : f32
    %162 = vector.broadcast %cst_68 : f32 to vector<1x32xf32>
    %163 = arith.mulf %161, %162 : vector<1x32xf32>
    %164 = math.floor %163 : vector<1x32xf32>
    %165 = vector.broadcast %159 : vector<32x1xf32> to vector<32x32xf32>
    %166 = vector.broadcast %164 : vector<1x32xf32> to vector<32x32xf32>
    %167 = arith.cmpf oeq, %165, %166 : vector<32x32xf32>
    %cst_69 = arith.constant 0.000000e+00 : f32
    %cst_70 = arith.constant -1.000000e+30 : f32
    %168 = vector.broadcast %cst_69 : f32 to vector<32x32xf32>
    %169 = vector.broadcast %cst_70 : f32 to vector<32x32xf32>
    %170 = arith.select %167, %168, %169 : vector<32x32xi1>, vector<32x32xf32>
    %c0_71 = arith.constant 0 : index
    %c0_72 = arith.constant 0 : index
    %171 = vector.load %arg14[%c0_71, %c0_72] : memref<32x96xbf16, #tpu.memory_space<vmem>>, vector<32x96xbf16>
    %172 = arith.extf %171 : vector<32x96xbf16> to vector<32x96xf32>
    %cst_73 = arith.constant dense<0.000000e+00> : vector<32x96xf32>
    %173 = tpu.matmul %150, %172, %cst_73 {dimension_numbers = #tpu.dot_dimension_numbers<[1], [0], [0], [1], [0, 0, 1, 1], [], []>} : vector<32x32xf32>, vector<32x96xf32>, vector<32x96xf32> -> vector<32x96xf32>
    %c0_74 = arith.constant 0 : index
    %c0_75 = arith.constant 0 : index
    %174 = vector.load %arg15[%c0_74, %c0_75] : memref<1x96xf32, #tpu.memory_space<vmem>>, vector<1x96xf32>
    %175 = vector.broadcast %174 : vector<1x96xf32> to vector<32x96xf32>
    %176 = arith.addf %173, %175 : vector<32x96xf32>
    %c0_76 = arith.constant 0 : index
    %c0_77 = arith.constant 0 : index
    %177 = vector.load %arg16[%c0_76, %c0_77] : memref<32x32xbf16, #tpu.memory_space<vmem>>, vector<32x32xbf16>
    %178 = arith.extf %177 : vector<32x32xbf16> to vector<32x32xf32>
    %179 = vector.extract_strided_slice %176 {offsets = [0, 0], sizes = [32, 16], strides = [1, 1]} : vector<32x96xf32> to vector<32x16xf32>
    %180 = vector.extract_strided_slice %176 {offsets = [0, 32], sizes = [32, 16], strides = [1, 1]} : vector<32x96xf32> to vector<32x16xf32>
    %181 = vector.extract_strided_slice %176 {offsets = [0, 64], sizes = [32, 16], strides = [1, 1]} : vector<32x96xf32> to vector<32x16xf32>
    %cst_78 = arith.constant dense<0.000000e+00> : vector<32x32xf32>
    %182 = tpu.matmul %179, %180, %cst_78 {dimension_numbers = #tpu.dot_dimension_numbers<[1], [1], [0], [0], [0, 0, 1, 0], [], []>} : vector<32x16xf32>, vector<32x16xf32>, vector<32x32xf32> -> vector<32x32xf32>
    %cst_79 = arith.constant 2.500000e-01 : f32
    %183 = vector.broadcast %cst_79 : f32 to vector<32x32xf32>
    %184 = arith.mulf %182, %183 : vector<32x32xf32>
    %185 = arith.addf %184, %170 : vector<32x32xf32>
    %cst_80 = arith.constant dense<0xFF800000> : vector<32xf32>
    %186 = vector.multi_reduction <maximumf>, %185, %cst_80 [1] : vector<32x32xf32> to vector<32xf32>
    %187 = vector.shape_cast %186 : vector<32xf32> to vector<32x1xf32>
    %188 = vector.broadcast %187 : vector<32x1xf32> to vector<32x32xf32>
    %189 = arith.subf %185, %188 : vector<32x32xf32>
    %190 = math.exp %189 : vector<32x32xf32>
    %cst_81 = arith.constant dense<0.000000e+00> : vector<32xf32>
    %191 = vector.multi_reduction <add>, %190, %cst_81 [1] : vector<32x32xf32> to vector<32xf32>
    %192 = vector.shape_cast %191 : vector<32xf32> to vector<32x1xf32>
    %193 = tpu.reciprocal %192 {approx = true} : vector<32x1xf32> -> vector<32x1xf32>
    %194 = vector.broadcast %193 : vector<32x1xf32> to vector<32x32xf32>
    %195 = arith.mulf %190, %194 : vector<32x32xf32>
    %cst_82 = arith.constant dense<0.000000e+00> : vector<32x16xf32>
    %196 = tpu.matmul %195, %181, %cst_82 {dimension_numbers = #tpu.dot_dimension_numbers<[1], [0], [0], [1], [0, 0, 1, 1], [], []>} : vector<32x32xf32>, vector<32x16xf32>, vector<32x16xf32> -> vector<32x16xf32>
    %197 = vector.extract_strided_slice %178 {offsets = [0, 0], sizes = [16, 32], strides = [1, 1]} : vector<32x32xf32> to vector<16x32xf32>
    %cst_83 = arith.constant dense<0.000000e+00> : vector<32x32xf32>
    %198 = tpu.matmul %196, %197, %cst_83 {dimension_numbers = #tpu.dot_dimension_numbers<[1], [0], [0], [1], [0, 0, 1, 1], [], []>} : vector<32x16xf32>, vector<16x32xf32>, vector<32x32xf32> -> vector<32x32xf32>
    %199 = vector.extract_strided_slice %176 {offsets = [0, 16], sizes = [32, 16], strides = [1, 1]} : vector<32x96xf32> to vector<32x16xf32>
    %200 = vector.extract_strided_slice %176 {offsets = [0, 48], sizes = [32, 16], strides = [1, 1]} : vector<32x96xf32> to vector<32x16xf32>
    %201 = vector.extract_strided_slice %176 {offsets = [0, 80], sizes = [32, 16], strides = [1, 1]} : vector<32x96xf32> to vector<32x16xf32>
    %cst_84 = arith.constant dense<0.000000e+00> : vector<32x32xf32>
    %202 = tpu.matmul %199, %200, %cst_84 {dimension_numbers = #tpu.dot_dimension_numbers<[1], [1], [0], [0], [0, 0, 1, 0], [], []>} : vector<32x16xf32>, vector<32x16xf32>, vector<32x32xf32> -> vector<32x32xf32>
    %cst_85 = arith.constant 2.500000e-01 : f32
    %203 = vector.broadcast %cst_85 : f32 to vector<32x32xf32>
    %204 = arith.mulf %202, %203 : vector<32x32xf32>
    %205 = arith.addf %204, %170 : vector<32x32xf32>
    %cst_86 = arith.constant dense<0xFF800000> : vector<32xf32>
    %206 = vector.multi_reduction <maximumf>, %205, %cst_86 [1] : vector<32x32xf32> to vector<32xf32>
    %207 = vector.shape_cast %206 : vector<32xf32> to vector<32x1xf32>
    %208 = vector.broadcast %207 : vector<32x1xf32> to vector<32x32xf32>
    %209 = arith.subf %205, %208 : vector<32x32xf32>
    %210 = math.exp %209 : vector<32x32xf32>
    %cst_87 = arith.constant dense<0.000000e+00> : vector<32xf32>
    %211 = vector.multi_reduction <add>, %210, %cst_87 [1] : vector<32x32xf32> to vector<32xf32>
    %212 = vector.shape_cast %211 : vector<32xf32> to vector<32x1xf32>
    %213 = tpu.reciprocal %212 {approx = true} : vector<32x1xf32> -> vector<32x1xf32>
    %214 = vector.broadcast %213 : vector<32x1xf32> to vector<32x32xf32>
    %215 = arith.mulf %210, %214 : vector<32x32xf32>
    %cst_88 = arith.constant dense<0.000000e+00> : vector<32x16xf32>
    %216 = tpu.matmul %215, %201, %cst_88 {dimension_numbers = #tpu.dot_dimension_numbers<[1], [0], [0], [1], [0, 0, 1, 1], [], []>} : vector<32x32xf32>, vector<32x16xf32>, vector<32x16xf32> -> vector<32x16xf32>
    %217 = vector.extract_strided_slice %178 {offsets = [16, 0], sizes = [16, 32], strides = [1, 1]} : vector<32x32xf32> to vector<16x32xf32>
    %cst_89 = arith.constant dense<0.000000e+00> : vector<32x32xf32>
    %218 = tpu.matmul %216, %217, %cst_89 {dimension_numbers = #tpu.dot_dimension_numbers<[1], [0], [0], [1], [0, 0, 1, 1], [], []>} : vector<32x16xf32>, vector<16x32xf32>, vector<32x32xf32> -> vector<32x32xf32>
    %219 = arith.addf %198, %218 : vector<32x32xf32>
    %c0_90 = arith.constant 0 : index
    %c0_91 = arith.constant 0 : index
    %220 = vector.load %arg17[%c0_90, %c0_91] : memref<1x32xf32, #tpu.memory_space<vmem>>, vector<1x32xf32>
    %221 = vector.broadcast %220 : vector<1x32xf32> to vector<32x32xf32>
    %222 = arith.addf %219, %221 : vector<32x32xf32>
    %c0_92 = arith.constant 0 : index
    %c0_93 = arith.constant 0 : index
    %223 = vector.load %arg18[%c0_92, %c0_93] : memref<1x32xf32, #tpu.memory_space<vmem>>, vector<1x32xf32>
    %c0_94 = arith.constant 0 : index
    %c0_95 = arith.constant 0 : index
    %224 = vector.load %arg19[%c0_94, %c0_95] : memref<1x32xf32, #tpu.memory_space<vmem>>, vector<1x32xf32>
    %cst_96 = arith.constant dense<0.000000e+00> : vector<32xf32>
    %225 = vector.multi_reduction <add>, %222, %cst_96 [1] : vector<32x32xf32> to vector<32xf32>
    %226 = vector.shape_cast %225 : vector<32xf32> to vector<32x1xf32>
    %cst_97 = arith.constant 3.200000e+01 : f32
    %227 = vector.broadcast %cst_97 : f32 to vector<32x1xf32>
    %228 = arith.divf %226, %227 : vector<32x1xf32>
    %229 = vector.broadcast %228 : vector<32x1xf32> to vector<32x32xf32>
    %230 = arith.subf %222, %229 : vector<32x32xf32>
    %231 = arith.mulf %230, %230 : vector<32x32xf32>
    %cst_98 = arith.constant dense<0.000000e+00> : vector<32xf32>
    %232 = vector.multi_reduction <add>, %231, %cst_98 [1] : vector<32x32xf32> to vector<32xf32>
    %233 = vector.shape_cast %232 : vector<32xf32> to vector<32x1xf32>
    %cst_99 = arith.constant 3.200000e+01 : f32
    %234 = vector.broadcast %cst_99 : f32 to vector<32x1xf32>
    %235 = arith.divf %233, %234 : vector<32x1xf32>
    %236 = vector.broadcast %228 : vector<32x1xf32> to vector<32x32xf32>
    %237 = arith.subf %222, %236 : vector<32x32xf32>
    %cst_100 = arith.constant 9.99999974E-6 : f32
    %238 = vector.broadcast %cst_100 : f32 to vector<32x1xf32>
    %239 = arith.addf %235, %238 : vector<32x1xf32>
    %240 = math.rsqrt %239 : vector<32x1xf32>
    %241 = vector.broadcast %240 : vector<32x1xf32> to vector<32x32xf32>
    %242 = arith.mulf %237, %241 : vector<32x32xf32>
    %243 = vector.broadcast %223 : vector<1x32xf32> to vector<32x32xf32>
    %244 = arith.mulf %242, %243 : vector<32x32xf32>
    %245 = vector.broadcast %224 : vector<1x32xf32> to vector<32x32xf32>
    %246 = arith.addf %244, %245 : vector<32x32xf32>
    %247 = arith.addf %150, %246 : vector<32x32xf32>
    %cst_101 = arith.constant 0.000000e+00 : f32
    %248 = vector.broadcast %cst_101 : f32 to vector<32x32xf32>
    %249 = arith.maximumf %247, %248 : vector<32x32xf32>
    %c0_102 = arith.constant 0 : index
    %c0_103 = arith.constant 0 : index
    %250 = vector.load %arg44[%c0_102, %c0_103] : memref<64x32xf32, #tpu.memory_space<vmem>>, vector<32x32xf32>
    tpu.vector_store %arg44[%c0_102, %c0_103], %249 {strides = array<i32>} : memref<64x32xf32, #tpu.memory_space<vmem>>, vector<32x32xf32>,
    %c0_104 = arith.constant 0 : index
    %c0_105 = arith.constant 0 : index
    %251 = tpu.strided_load %arg44[%c0_104, %c0_105] {strides = array<i32: 2, 1>} : memref<64x32xf32, #tpu.memory_space<vmem>>, vector<16x32xf32>
    %c1_106 = arith.constant 1 : index
    %c0_107 = arith.constant 0 : index
    %252 = tpu.strided_load %arg44[%c1_106, %c0_107] {strides = array<i32: 2, 1>} : memref<64x32xf32, #tpu.memory_space<vmem>>, vector<16x32xf32>
    %c0_108 = arith.constant 0 : index
    %c0_109 = arith.constant 0 : index
    %253 = vector.load %arg20[%c0_108, %c0_109] : memref<64x32xbf16, #tpu.memory_space<vmem>>, vector<64x32xbf16>
    %254 = arith.extf %253 : vector<64x32xbf16> to vector<64x32xf32>
    %255 = vector.extract_strided_slice %254 {offsets = [0, 0], sizes = [32, 32], strides = [1, 1]} : vector<64x32xf32> to vector<32x32xf32>
    %cst_110 = arith.constant dense<0.000000e+00> : vector<16x32xf32>
    %256 = tpu.matmul %251, %255, %cst_110 {dimension_numbers = #tpu.dot_dimension_numbers<[1], [0], [0], [1], [0, 0, 1, 1], [], []>} : vector<16x32xf32>, vector<32x32xf32>, vector<16x32xf32> -> vector<16x32xf32>
    %257 = vector.extract_strided_slice %254 {offsets = [32, 0], sizes = [32, 32], strides = [1, 1]} : vector<64x32xf32> to vector<32x32xf32>
    %cst_111 = arith.constant dense<0.000000e+00> : vector<16x32xf32>
    %258 = tpu.matmul %252, %257, %cst_111 {dimension_numbers = #tpu.dot_dimension_numbers<[1], [0], [0], [1], [0, 0, 1, 1], [], []>} : vector<16x32xf32>, vector<32x32xf32>, vector<16x32xf32> -> vector<16x32xf32>
    %259 = arith.addf %256, %258 : vector<16x32xf32>
    %c0_112 = arith.constant 0 : index
    %c0_113 = arith.constant 0 : index
    %260 = vector.load %arg21[%c0_112, %c0_113] : memref<1x32xf32, #tpu.memory_space<vmem>>, vector<1x32xf32>
    %261 = vector.broadcast %260 : vector<1x32xf32> to vector<16x32xf32>
    %262 = arith.addf %259, %261 : vector<16x32xf32>
    %c0_114 = arith.constant 0 : index
    %c0_115 = arith.constant 0 : index
    %263 = vector.load %arg22[%c0_114, %c0_115] : memref<1x32xf32, #tpu.memory_space<vmem>>, vector<1x32xf32>
    %c0_116 = arith.constant 0 : index
    %c0_117 = arith.constant 0 : index
    %264 = vector.load %arg23[%c0_116, %c0_117] : memref<1x32xf32, #tpu.memory_space<vmem>>, vector<1x32xf32>
    %cst_118 = arith.constant dense<0.000000e+00> : vector<16xf32>
    %265 = vector.multi_reduction <add>, %262, %cst_118 [1] : vector<16x32xf32> to vector<16xf32>
    %266 = vector.shape_cast %265 : vector<16xf32> to vector<16x1xf32>
    %cst_119 = arith.constant 3.200000e+01 : f32
    %267 = vector.broadcast %cst_119 : f32 to vector<16x1xf32>
    %268 = arith.divf %266, %267 : vector<16x1xf32>
    %269 = vector.broadcast %268 : vector<16x1xf32> to vector<16x32xf32>
    %270 = arith.subf %262, %269 : vector<16x32xf32>
    %271 = arith.mulf %270, %270 : vector<16x32xf32>
    %cst_120 = arith.constant dense<0.000000e+00> : vector<16xf32>
    %272 = vector.multi_reduction <add>, %271, %cst_120 [1] : vector<16x32xf32> to vector<16xf32>
    %273 = vector.shape_cast %272 : vector<16xf32> to vector<16x1xf32>
    %cst_121 = arith.constant 3.200000e+01 : f32
    %274 = vector.broadcast %cst_121 : f32 to vector<16x1xf32>
    %275 = arith.divf %273, %274 : vector<16x1xf32>
    %276 = vector.broadcast %268 : vector<16x1xf32> to vector<16x32xf32>
    %277 = arith.subf %262, %276 : vector<16x32xf32>
    %cst_122 = arith.constant 9.99999974E-6 : f32
    %278 = vector.broadcast %cst_122 : f32 to vector<16x1xf32>
    %279 = arith.addf %275, %278 : vector<16x1xf32>
    %280 = math.rsqrt %279 : vector<16x1xf32>
    %281 = vector.broadcast %280 : vector<16x1xf32> to vector<16x32xf32>
    %282 = arith.mulf %277, %281 : vector<16x32xf32>
    %283 = vector.broadcast %263 : vector<1x32xf32> to vector<16x32xf32>
    %284 = arith.mulf %282, %283 : vector<16x32xf32>
    %285 = vector.broadcast %264 : vector<1x32xf32> to vector<16x32xf32>
    %286 = arith.addf %284, %285 : vector<16x32xf32>
    %cst_123 = arith.constant 0.000000e+00 : f32
    %287 = vector.broadcast %cst_123 : f32 to vector<16x32xf32>
    %288 = arith.maximumf %286, %287 : vector<16x32xf32>
    %289 = tpu.iota {dimensions = array<i32: 0>} : vector<16x1xi32>
    %290 = arith.sitofp %289 : vector<16x1xi32> to vector<16x1xf32>
    %291 = tpu.iota {dimensions = array<i32: 1>} : vector<1x16xi32>
    %292 = arith.sitofp %291 : vector<1x16xi32> to vector<1x16xf32>
    %cst_124 = arith.constant 5.000000e-01 : f32
    %293 = vector.broadcast %cst_124 : f32 to vector<16x1xf32>
    %294 = arith.addf %290, %293 : vector<16x1xf32>
    %cst_125 = arith.constant 5.000000e-01 : f32
    %295 = vector.broadcast %cst_125 : f32 to vector<16x1xf32>
    %296 = arith.mulf %294, %295 : vector<16x1xf32>
    %297 = math.floor %296 : vector<16x1xf32>
    %cst_126 = arith.constant 5.000000e-01 : f32
    %298 = vector.broadcast %cst_126 : f32 to vector<1x16xf32>
    %299 = arith.addf %292, %298 : vector<1x16xf32>
    %cst_127 = arith.constant 5.000000e-01 : f32
    %300 = vector.broadcast %cst_127 : f32 to vector<1x16xf32>
    %301 = arith.mulf %299, %300 : vector<1x16xf32>
    %302 = math.floor %301 : vector<1x16xf32>
    %303 = vector.broadcast %297 : vector<16x1xf32> to vector<16x16xf32>
    %304 = vector.broadcast %302 : vector<1x16xf32> to vector<16x16xf32>
    %305 = arith.cmpf oeq, %303, %304 : vector<16x16xf32>
    %cst_128 = arith.constant 0.000000e+00 : f32
    %cst_129 = arith.constant -1.000000e+30 : f32
    %306 = vector.broadcast %cst_128 : f32 to vector<16x16xf32>
    %307 = vector.broadcast %cst_129 : f32 to vector<16x16xf32>
    %308 = arith.select %305, %306, %307 : vector<16x16xi1>, vector<16x16xf32>
    %c0_130 = arith.constant 0 : index
    %c0_131 = arith.constant 0 : index
    %309 = vector.load %arg24[%c0_130, %c0_131] : memref<32x96xbf16, #tpu.memory_space<vmem>>, vector<32x96xbf16>
    %310 = arith.extf %309 : vector<32x96xbf16> to vector<32x96xf32>
    %cst_132 = arith.constant dense<0.000000e+00> : vector<16x96xf32>
    %311 = tpu.matmul %288, %310, %cst_132 {dimension_numbers = #tpu.dot_dimension_numbers<[1], [0], [0], [1], [0, 0, 1, 1], [], []>} : vector<16x32xf32>, vector<32x96xf32>, vector<16x96xf32> -> vector<16x96xf32>
    %c0_133 = arith.constant 0 : index
    %c0_134 = arith.constant 0 : index
    %312 = vector.load %arg25[%c0_133, %c0_134] : memref<1x96xf32, #tpu.memory_space<vmem>>, vector<1x96xf32>
    %313 = vector.broadcast %312 : vector<1x96xf32> to vector<16x96xf32>
    %314 = arith.addf %311, %313 : vector<16x96xf32>
    %c0_135 = arith.constant 0 : index
    %c0_136 = arith.constant 0 : index
    %315 = vector.load %arg26[%c0_135, %c0_136] : memref<32x32xbf16, #tpu.memory_space<vmem>>, vector<32x32xbf16>
    %316 = arith.extf %315 : vector<32x32xbf16> to vector<32x32xf32>
    %317 = vector.extract_strided_slice %314 {offsets = [0, 0], sizes = [16, 16], strides = [1, 1]} : vector<16x96xf32> to vector<16x16xf32>
    %318 = vector.extract_strided_slice %314 {offsets = [0, 32], sizes = [16, 16], strides = [1, 1]} : vector<16x96xf32> to vector<16x16xf32>
    %319 = vector.extract_strided_slice %314 {offsets = [0, 64], sizes = [16, 16], strides = [1, 1]} : vector<16x96xf32> to vector<16x16xf32>
    %cst_137 = arith.constant dense<0.000000e+00> : vector<16x16xf32>
    %320 = tpu.matmul %317, %318, %cst_137 {dimension_numbers = #tpu.dot_dimension_numbers<[1], [1], [0], [0], [0, 0, 1, 0], [], []>} : vector<16x16xf32>, vector<16x16xf32>, vector<16x16xf32> -> vector<16x16xf32>
    %cst_138 = arith.constant 2.500000e-01 : f32
    %321 = vector.broadcast %cst_138 : f32 to vector<16x16xf32>
    %322 = arith.mulf %320, %321 : vector<16x16xf32>
    %323 = arith.addf %322, %308 : vector<16x16xf32>
    %cst_139 = arith.constant dense<0xFF800000> : vector<16xf32>
    %324 = vector.multi_reduction <maximumf>, %323, %cst_139 [1] : vector<16x16xf32> to vector<16xf32>
    %325 = vector.shape_cast %324 : vector<16xf32> to vector<16x1xf32>
    %326 = vector.broadcast %325 : vector<16x1xf32> to vector<16x16xf32>
    %327 = arith.subf %323, %326 : vector<16x16xf32>
    %328 = math.exp %327 : vector<16x16xf32>
    %cst_140 = arith.constant dense<0.000000e+00> : vector<16xf32>
    %329 = vector.multi_reduction <add>, %328, %cst_140 [1] : vector<16x16xf32> to vector<16xf32>
    %330 = vector.shape_cast %329 : vector<16xf32> to vector<16x1xf32>
    %331 = tpu.reciprocal %330 {approx = true} : vector<16x1xf32> -> vector<16x1xf32>
    %332 = vector.broadcast %331 : vector<16x1xf32> to vector<16x16xf32>
    %333 = arith.mulf %328, %332 : vector<16x16xf32>
    %cst_141 = arith.constant dense<0.000000e+00> : vector<16x16xf32>
    %334 = tpu.matmul %333, %319, %cst_141 {dimension_numbers = #tpu.dot_dimension_numbers<[1], [0], [0], [1], [0, 0, 1, 1], [], []>} : vector<16x16xf32>, vector<16x16xf32>, vector<16x16xf32> -> vector<16x16xf32>
    %335 = vector.extract_strided_slice %316 {offsets = [0, 0], sizes = [16, 32], strides = [1, 1]} : vector<32x32xf32> to vector<16x32xf32>
    %cst_142 = arith.constant dense<0.000000e+00> : vector<16x32xf32>
    %336 = tpu.matmul %334, %335, %cst_142 {dimension_numbers = #tpu.dot_dimension_numbers<[1], [0], [0], [1], [0, 0, 1, 1], [], []>} : vector<16x16xf32>, vector<16x32xf32>, vector<16x32xf32> -> vector<16x32xf32>
    %337 = vector.extract_strided_slice %314 {offsets = [0, 16], sizes = [16, 16], strides = [1, 1]} : vector<16x96xf32> to vector<16x16xf32>
    %338 = vector.extract_strided_slice %314 {offsets = [0, 48], sizes = [16, 16], strides = [1, 1]} : vector<16x96xf32> to vector<16x16xf32>
    %339 = vector.extract_strided_slice %314 {offsets = [0, 80], sizes = [16, 16], strides = [1, 1]} : vector<16x96xf32> to vector<16x16xf32>
    %cst_143 = arith.constant dense<0.000000e+00> : vector<16x16xf32>
    %340 = tpu.matmul %337, %338, %cst_143 {dimension_numbers = #tpu.dot_dimension_numbers<[1], [1], [0], [0], [0, 0, 1, 0], [], []>} : vector<16x16xf32>, vector<16x16xf32>, vector<16x16xf32> -> vector<16x16xf32>
    %cst_144 = arith.constant 2.500000e-01 : f32
    %341 = vector.broadcast %cst_144 : f32 to vector<16x16xf32>
    %342 = arith.mulf %340, %341 : vector<16x16xf32>
    %343 = arith.addf %342, %308 : vector<16x16xf32>
    %cst_145 = arith.constant dense<0xFF800000> : vector<16xf32>
    %344 = vector.multi_reduction <maximumf>, %343, %cst_145 [1] : vector<16x16xf32> to vector<16xf32>
    %345 = vector.shape_cast %344 : vector<16xf32> to vector<16x1xf32>
    %346 = vector.broadcast %345 : vector<16x1xf32> to vector<16x16xf32>
    %347 = arith.subf %343, %346 : vector<16x16xf32>
    %348 = math.exp %347 : vector<16x16xf32>
    %cst_146 = arith.constant dense<0.000000e+00> : vector<16xf32>
    %349 = vector.multi_reduction <add>, %348, %cst_146 [1] : vector<16x16xf32> to vector<16xf32>
    %350 = vector.shape_cast %349 : vector<16xf32> to vector<16x1xf32>
    %351 = tpu.reciprocal %350 {approx = true} : vector<16x1xf32> -> vector<16x1xf32>
    %352 = vector.broadcast %351 : vector<16x1xf32> to vector<16x16xf32>
    %353 = arith.mulf %348, %352 : vector<16x16xf32>
    %cst_147 = arith.constant dense<0.000000e+00> : vector<16x16xf32>
    %354 = tpu.matmul %353, %339, %cst_147 {dimension_numbers = #tpu.dot_dimension_numbers<[1], [0], [0], [1], [0, 0, 1, 1], [], []>} : vector<16x16xf32>, vector<16x16xf32>, vector<16x16xf32> -> vector<16x16xf32>
    %355 = vector.extract_strided_slice %316 {offsets = [16, 0], sizes = [16, 32], strides = [1, 1]} : vector<32x32xf32> to vector<16x32xf32>
    %cst_148 = arith.constant dense<0.000000e+00> : vector<16x32xf32>
    %356 = tpu.matmul %354, %355, %cst_148 {dimension_numbers = #tpu.dot_dimension_numbers<[1], [0], [0], [1], [0, 0, 1, 1], [], []>} : vector<16x16xf32>, vector<16x32xf32>, vector<16x32xf32> -> vector<16x32xf32>
    %357 = arith.addf %336, %356 : vector<16x32xf32>
    %c0_149 = arith.constant 0 : index
    %c0_150 = arith.constant 0 : index
    %358 = vector.load %arg27[%c0_149, %c0_150] : memref<1x32xf32, #tpu.memory_space<vmem>>, vector<1x32xf32>
    %359 = vector.broadcast %358 : vector<1x32xf32> to vector<16x32xf32>
    %360 = arith.addf %357, %359 : vector<16x32xf32>
    %c0_151 = arith.constant 0 : index
    %c0_152 = arith.constant 0 : index
    %361 = vector.load %arg28[%c0_151, %c0_152] : memref<1x32xf32, #tpu.memory_space<vmem>>, vector<1x32xf32>
    %c0_153 = arith.constant 0 : index
    %c0_154 = arith.constant 0 : index
    %362 = vector.load %arg29[%c0_153, %c0_154] : memref<1x32xf32, #tpu.memory_space<vmem>>, vector<1x32xf32>
    %cst_155 = arith.constant dense<0.000000e+00> : vector<16xf32>
    %363 = vector.multi_reduction <add>, %360, %cst_155 [1] : vector<16x32xf32> to vector<16xf32>
    %364 = vector.shape_cast %363 : vector<16xf32> to vector<16x1xf32>
    %cst_156 = arith.constant 3.200000e+01 : f32
    %365 = vector.broadcast %cst_156 : f32 to vector<16x1xf32>
    %366 = arith.divf %364, %365 : vector<16x1xf32>
    %367 = vector.broadcast %366 : vector<16x1xf32> to vector<16x32xf32>
    %368 = arith.subf %360, %367 : vector<16x32xf32>
    %369 = arith.mulf %368, %368 : vector<16x32xf32>
    %cst_157 = arith.constant dense<0.000000e+00> : vector<16xf32>
    %370 = vector.multi_reduction <add>, %369, %cst_157 [1] : vector<16x32xf32> to vector<16xf32>
    %371 = vector.shape_cast %370 : vector<16xf32> to vector<16x1xf32>
    %cst_158 = arith.constant 3.200000e+01 : f32
    %372 = vector.broadcast %cst_158 : f32 to vector<16x1xf32>
    %373 = arith.divf %371, %372 : vector<16x1xf32>
    %374 = vector.broadcast %366 : vector<16x1xf32> to vector<16x32xf32>
    %375 = arith.subf %360, %374 : vector<16x32xf32>
    %cst_159 = arith.constant 9.99999974E-6 : f32
    %376 = vector.broadcast %cst_159 : f32 to vector<16x1xf32>
    %377 = arith.addf %373, %376 : vector<16x1xf32>
    %378 = math.rsqrt %377 : vector<16x1xf32>
    %379 = vector.broadcast %378 : vector<16x1xf32> to vector<16x32xf32>
    %380 = arith.mulf %375, %379 : vector<16x32xf32>
    %381 = vector.broadcast %361 : vector<1x32xf32> to vector<16x32xf32>
    %382 = arith.mulf %380, %381 : vector<16x32xf32>
    %383 = vector.broadcast %362 : vector<1x32xf32> to vector<16x32xf32>
    %384 = arith.addf %382, %383 : vector<16x32xf32>
    %385 = arith.addf %288, %384 : vector<16x32xf32>
    %cst_160 = arith.constant 0.000000e+00 : f32
    %386 = vector.broadcast %cst_160 : f32 to vector<16x32xf32>
    %387 = arith.maximumf %385, %386 : vector<16x32xf32>
    %c0_161 = arith.constant 0 : index
    %c0_162 = arith.constant 0 : index
    %388 = vector.load %arg44[%c0_161, %c0_162] : memref<64x32xf32, #tpu.memory_space<vmem>>, vector<16x32xf32>
    tpu.vector_store %arg44[%c0_161, %c0_162], %387 {strides = array<i32>} : memref<64x32xf32, #tpu.memory_space<vmem>>, vector<16x32xf32>,
    %c0_163 = arith.constant 0 : index
    %c0_164 = arith.constant 0 : index
    %389 = tpu.strided_load %arg44[%c0_163, %c0_164] {strides = array<i32: 2, 1>} : memref<64x32xf32, #tpu.memory_space<vmem>>, vector<8x32xf32>
    %c1_165 = arith.constant 1 : index
    %c0_166 = arith.constant 0 : index
    %390 = tpu.strided_load %arg44[%c1_165, %c0_166] {strides = array<i32: 2, 1>} : memref<64x32xf32, #tpu.memory_space<vmem>>, vector<8x32xf32>
    %c0_167 = arith.constant 0 : index
    %c0_168 = arith.constant 0 : index
    %391 = vector.load %arg30[%c0_167, %c0_168] : memref<64x32xbf16, #tpu.memory_space<vmem>>, vector<64x32xbf16>
    %392 = arith.extf %391 : vector<64x32xbf16> to vector<64x32xf32>
    %393 = vector.extract_strided_slice %392 {offsets = [0, 0], sizes = [32, 32], strides = [1, 1]} : vector<64x32xf32> to vector<32x32xf32>
    %cst_169 = arith.constant dense<0.000000e+00> : vector<8x32xf32>
    %394 = tpu.matmul %389, %393, %cst_169 {dimension_numbers = #tpu.dot_dimension_numbers<[1], [0], [0], [1], [0, 0, 1, 1], [], []>} : vector<8x32xf32>, vector<32x32xf32>, vector<8x32xf32> -> vector<8x32xf32>
    %395 = vector.extract_strided_slice %392 {offsets = [32, 0], sizes = [32, 32], strides = [1, 1]} : vector<64x32xf32> to vector<32x32xf32>
    %cst_170 = arith.constant dense<0.000000e+00> : vector<8x32xf32>
    %396 = tpu.matmul %390, %395, %cst_170 {dimension_numbers = #tpu.dot_dimension_numbers<[1], [0], [0], [1], [0, 0, 1, 1], [], []>} : vector<8x32xf32>, vector<32x32xf32>, vector<8x32xf32> -> vector<8x32xf32>
    %397 = arith.addf %394, %396 : vector<8x32xf32>
    %c0_171 = arith.constant 0 : index
    %c0_172 = arith.constant 0 : index
    %398 = vector.load %arg31[%c0_171, %c0_172] : memref<1x32xf32, #tpu.memory_space<vmem>>, vector<1x32xf32>
    %399 = vector.broadcast %398 : vector<1x32xf32> to vector<8x32xf32>
    %400 = arith.addf %397, %399 : vector<8x32xf32>
    %c0_173 = arith.constant 0 : index
    %c0_174 = arith.constant 0 : index
    %401 = vector.load %arg32[%c0_173, %c0_174] : memref<1x32xf32, #tpu.memory_space<vmem>>, vector<1x32xf32>
    %c0_175 = arith.constant 0 : index
    %c0_176 = arith.constant 0 : index
    %402 = vector.load %arg33[%c0_175, %c0_176] : memref<1x32xf32, #tpu.memory_space<vmem>>, vector<1x32xf32>
    %cst_177 = arith.constant dense<0.000000e+00> : vector<8xf32>
    %403 = vector.multi_reduction <add>, %400, %cst_177 [1] : vector<8x32xf32> to vector<8xf32>
    %404 = vector.shape_cast %403 : vector<8xf32> to vector<8x1xf32>
    %cst_178 = arith.constant 3.200000e+01 : f32
    %405 = vector.broadcast %cst_178 : f32 to vector<8x1xf32>
    %406 = arith.divf %404, %405 : vector<8x1xf32>
    %407 = vector.broadcast %406 : vector<8x1xf32> to vector<8x32xf32>
    %408 = arith.subf %400, %407 : vector<8x32xf32>
    %409 = arith.mulf %408, %408 : vector<8x32xf32>
    %cst_179 = arith.constant dense<0.000000e+00> : vector<8xf32>
    %410 = vector.multi_reduction <add>, %409, %cst_179 [1] : vector<8x32xf32> to vector<8xf32>
    %411 = vector.shape_cast %410 : vector<8xf32> to vector<8x1xf32>
    %cst_180 = arith.constant 3.200000e+01 : f32
    %412 = vector.broadcast %cst_180 : f32 to vector<8x1xf32>
    %413 = arith.divf %411, %412 : vector<8x1xf32>
    %414 = vector.broadcast %406 : vector<8x1xf32> to vector<8x32xf32>
    %415 = arith.subf %400, %414 : vector<8x32xf32>
    %cst_181 = arith.constant 9.99999974E-6 : f32
    %416 = vector.broadcast %cst_181 : f32 to vector<8x1xf32>
    %417 = arith.addf %413, %416 : vector<8x1xf32>
    %418 = math.rsqrt %417 : vector<8x1xf32>
    %419 = vector.broadcast %418 : vector<8x1xf32> to vector<8x32xf32>
    %420 = arith.mulf %415, %419 : vector<8x32xf32>
    %421 = vector.broadcast %401 : vector<1x32xf32> to vector<8x32xf32>
    %422 = arith.mulf %420, %421 : vector<8x32xf32>
    %423 = vector.broadcast %402 : vector<1x32xf32> to vector<8x32xf32>
    %424 = arith.addf %422, %423 : vector<8x32xf32>
    %cst_182 = arith.constant 0.000000e+00 : f32
    %425 = vector.broadcast %cst_182 : f32 to vector<8x32xf32>
    %426 = arith.maximumf %424, %425 : vector<8x32xf32>
    %c0_183 = arith.constant 0 : index
    %c0_184 = arith.constant 0 : index
    %427 = vector.load %arg44[%c0_183, %c0_184] : memref<64x32xf32, #tpu.memory_space<vmem>>, vector<8x32xf32>
    tpu.vector_store %arg44[%c0_183, %c0_184], %426 {strides = array<i32>} : memref<64x32xf32, #tpu.memory_space<vmem>>, vector<8x32xf32>,
    %c0_185 = arith.constant 0 : index
    %c0_186 = arith.constant 0 : index
    %428 = tpu.strided_load %arg44[%c0_185, %c0_186] {strides = array<i32: 4, 1>} : memref<64x32xf32, #tpu.memory_space<vmem>>, vector<2x32xf32>
    %c1_187 = arith.constant 1 : index
    %c0_188 = arith.constant 0 : index
    %429 = tpu.strided_load %arg44[%c1_187, %c0_188] {strides = array<i32: 4, 1>} : memref<64x32xf32, #tpu.memory_space<vmem>>, vector<2x32xf32>
    %c2 = arith.constant 2 : index
    %c0_189 = arith.constant 0 : index
    %430 = tpu.strided_load %arg44[%c2, %c0_189] {strides = array<i32: 4, 1>} : memref<64x32xf32, #tpu.memory_space<vmem>>, vector<2x32xf32>
    %c3 = arith.constant 3 : index
    %c0_190 = arith.constant 0 : index
    %431 = tpu.strided_load %arg44[%c3, %c0_190] {strides = array<i32: 4, 1>} : memref<64x32xf32, #tpu.memory_space<vmem>>, vector<2x32xf32>
    %432 = tpu.concatenate %428, %429, %430, %431 in 1 : vector<2x32xf32>, vector<2x32xf32>, vector<2x32xf32>, vector<2x32xf32> -> vector<2x128xf32>
    %c0_i32_191 = arith.constant 0 : i32
    %433 = tpu.memref_slice %arg43[%c0_i32_191] : memref<2x!tpu.dma_semaphore, #tpu.memory_space<semaphore_mem>> -> memref<1x!tpu.dma_semaphore, #tpu.memory_space<semaphore_mem>>
    %434 = tpu.memref_squeeze %433 : memref<1x!tpu.dma_semaphore, #tpu.memory_space<semaphore_mem>> -> memref<!tpu.dma_semaphore, #tpu.memory_space<semaphore_mem>>
    tpu.wait_dma2 semaphore(%434 : memref<!tpu.dma_semaphore, #tpu.memory_space<semaphore_mem>>) src(%arg34 : memref<128x1024xbf16, #tpu.memory_space<any>>) dst(%arg41 : memref<128x1024xbf16, #tpu.memory_space<vmem>>)
    %c1_i32_192 = arith.constant 1 : i32
    %435 = tpu.memref_slice %arg43[%c1_i32_192] : memref<2x!tpu.dma_semaphore, #tpu.memory_space<semaphore_mem>> -> memref<1x!tpu.dma_semaphore, #tpu.memory_space<semaphore_mem>>
    %436 = tpu.memref_squeeze %435 : memref<1x!tpu.dma_semaphore, #tpu.memory_space<semaphore_mem>> -> memref<!tpu.dma_semaphore, #tpu.memory_space<semaphore_mem>>
    tpu.wait_dma2 semaphore(%436 : memref<!tpu.dma_semaphore, #tpu.memory_space<semaphore_mem>>) src(%arg38 : memref<1024x6xbf16, #tpu.memory_space<any>>) dst(%arg42 : memref<1024x6xbf16, #tpu.memory_space<vmem>>)
    %c0_193 = arith.constant 0 : index
    %c0_194 = arith.constant 0 : index
    %437 = vector.load %arg41[%c0_193, %c0_194] : memref<128x1024xbf16, #tpu.memory_space<vmem>>, vector<128x1024xbf16>
    %438 = arith.extf %437 : vector<128x1024xbf16> to vector<128x1024xf32>
    %cst_195 = arith.constant dense<0.000000e+00> : vector<2x1024xf32>
    %439 = tpu.matmul %432, %438, %cst_195 {dimension_numbers = #tpu.dot_dimension_numbers<[1], [0], [0], [1], [0, 0, 1, 1], [], []>} : vector<2x128xf32>, vector<128x1024xf32>, vector<2x1024xf32> -> vector<2x1024xf32>
    %c0_196 = arith.constant 0 : index
    %c0_197 = arith.constant 0 : index
    %440 = vector.load %arg35[%c0_196, %c0_197] : memref<1x1024xf32, #tpu.memory_space<vmem>>, vector<1x1024xf32>
    %441 = vector.broadcast %440 : vector<1x1024xf32> to vector<2x1024xf32>
    %442 = arith.addf %439, %441 : vector<2x1024xf32>
    %c0_198 = arith.constant 0 : index
    %c0_199 = arith.constant 0 : index
    %443 = vector.load %arg36[%c0_198, %c0_199] : memref<1x1024xf32, #tpu.memory_space<vmem>>, vector<1x1024xf32>
    %c0_200 = arith.constant 0 : index
    %c0_201 = arith.constant 0 : index
    %444 = vector.load %arg37[%c0_200, %c0_201] : memref<1x1024xf32, #tpu.memory_space<vmem>>, vector<1x1024xf32>
    %cst_202 = arith.constant dense<0.000000e+00> : vector<2xf32>
    %445 = vector.multi_reduction <add>, %442, %cst_202 [1] : vector<2x1024xf32> to vector<2xf32>
    %446 = vector.shape_cast %445 : vector<2xf32> to vector<2x1xf32>
    %cst_203 = arith.constant 1.024000e+03 : f32
    %447 = vector.broadcast %cst_203 : f32 to vector<2x1xf32>
    %448 = arith.divf %446, %447 : vector<2x1xf32>
    %449 = vector.broadcast %448 : vector<2x1xf32> to vector<2x1024xf32>
    %450 = arith.subf %442, %449 : vector<2x1024xf32>
    %451 = arith.mulf %450, %450 : vector<2x1024xf32>
    %cst_204 = arith.constant dense<0.000000e+00> : vector<2xf32>
    %452 = vector.multi_reduction <add>, %451, %cst_204 [1] : vector<2x1024xf32> to vector<2xf32>
    %453 = vector.shape_cast %452 : vector<2xf32> to vector<2x1xf32>
    %cst_205 = arith.constant 1.024000e+03 : f32
    %454 = vector.broadcast %cst_205 : f32 to vector<2x1xf32>
    %455 = arith.divf %453, %454 : vector<2x1xf32>
    %456 = vector.broadcast %448 : vector<2x1xf32> to vector<2x1024xf32>
    %457 = arith.subf %442, %456 : vector<2x1024xf32>
    %cst_206 = arith.constant 9.99999974E-6 : f32
    %458 = vector.broadcast %cst_206 : f32 to vector<2x1xf32>
    %459 = arith.addf %455, %458 : vector<2x1xf32>
    %460 = math.rsqrt %459 : vector<2x1xf32>
    %461 = vector.broadcast %460 : vector<2x1xf32> to vector<2x1024xf32>
    %462 = arith.mulf %457, %461 : vector<2x1024xf32>
    %463 = vector.broadcast %443 : vector<1x1024xf32> to vector<2x1024xf32>
    %464 = arith.mulf %462, %463 : vector<2x1024xf32>
    %465 = vector.broadcast %444 : vector<1x1024xf32> to vector<2x1024xf32>
    %466 = arith.addf %464, %465 : vector<2x1024xf32>
    %cst_207 = arith.constant 0.000000e+00 : f32
    %467 = vector.broadcast %cst_207 : f32 to vector<2x1024xf32>
    %468 = arith.maximumf %466, %467 : vector<2x1024xf32>
    %c0_208 = arith.constant 0 : index
    %c0_209 = arith.constant 0 : index
    %469 = vector.load %arg42[%c0_208, %c0_209] : memref<1024x6xbf16, #tpu.memory_space<vmem>>, vector<1024x6xbf16>
    %470 = arith.extf %469 : vector<1024x6xbf16> to vector<1024x6xf32>
    %cst_210 = arith.constant dense<0.000000e+00> : vector<2x6xf32>
    %471 = tpu.matmul %468, %470, %cst_210 {dimension_numbers = #tpu.dot_dimension_numbers<[1], [0], [0], [1], [0, 0, 1, 1], [], []>} : vector<2x1024xf32>, vector<1024x6xf32>, vector<2x6xf32> -> vector<2x6xf32>
    %c0_211 = arith.constant 0 : index
    %c0_212 = arith.constant 0 : index
    %472 = vector.load %arg39[%c0_211, %c0_212] : memref<1x6xf32, #tpu.memory_space<vmem>>, vector<1x6xf32>
    %473 = vector.broadcast %472 : vector<1x6xf32> to vector<2x6xf32>
    %474 = arith.addf %471, %473 : vector<2x6xf32>
    %c0_213 = arith.constant 0 : index
    %c0_214 = arith.constant 0 : index
    %475 = vector.load %arg40[%c0_213, %c0_214] : memref<2x6xf32, #tpu.memory_space<vmem>>, vector<2x6xf32>
    tpu.vector_store %arg40[%c0_213, %c0_214], %474 {strides = array<i32>} : memref<2x6xf32, #tpu.memory_space<vmem>>, vector<2x6xf32>,
    return
  }
}

</mosaic_0001>

<bundles_post_ra>
// kernel: squeeze.1
= control target key start
LH: loop header
LB: loop body
LE: loop exit
PB: predicated region body
PF: predicated region fallthrough
CT: control target
= control target key end

     0   :  { %vm11_vm0 = vcmask 31744   ;;  %s98_s12 = smov 116   ;;  %s99_s15 = smov 120   ;;  %s184_s0 = inlined_call_operand.vmem [shape: f32[2,1,32,4], index: 0, kind: input, shape index: {}]   ;;  %s185_s1 = inlined_call_operand.vmem [shape: f32[2,8,4,4], index: 1, kind: output, shape index: {}]  }
   0x1   :  { %v74_v0 = vld [vmem:[%s184_s0 + $0x4] sm:$0xf]  ;;  %v8_v1 = vld [vmem:[%s184_s0] sm:$0xf]  ;;  %s97_s0 = smov 124   ;;  %s100_s16 = smov 112  }
   0x2   :  { %7 = vst [vmem:[#allocation0 + $0x8] sm:$0xf] %v74_v0  ;;  %9 = vst [vmem:[#allocation0] sm:$0xf] %v8_v1  ;;  %s101_s17 = smov 108   ;;  %s102_s18 = smov 104  }
   0x3   :  { %s103_s19 = smov 100  }
   0x9   :  { %v18_v2 = vld.sshfl [vmem:[#allocation0] sm:$0xff pattern:$0xba983210]  }
   0xa   :  { %v10_v3 = vld [vmem:[#allocation0] sm:$0xf]   ;;  %19 = vrot.lane.b32.xlu0 %v18_v2, %s97_s0  ;;  %35 = vrot.lane.b32.xlu1 %v18_v2, %s98_s12  ;;  %v14_v4 = vld [vmem:[#allocation0 + $0x8] sm:$0xf]  }
   0xb   :  { %12 = vst.msk [vmem:[%s185_s1] ss:$8 sm:$0xf] %vm11_vm0, %v10_v3   ;;  %75 = vst.msk [vmem:[%s185_s1 + $0x20] ss:$8 sm:$0xf] %vm11_vm0, %v14_v4  }
   0xe   :  { %27 = vrot.lane.b32.xlu0 %v18_v2, %s99_s15  ;;  %43 = vrot.lane.b32.xlu1 %v18_v2, %s100_s16 }
  0x12   :  { %51 = vrot.lane.b32.xlu0 %v18_v2, %s101_s17  ;;  %59 = vrot.lane.b32.xlu1 %v18_v2, %s102_s18 }
  0x16   :  { %67 = vrot.lane.b32.xlu0 %v18_v2, %s103_s19 }
  0x7c   :  { %v20_v5 = vpop.permute.xlu0 %19   ;;  %v36_v6 = vpop.permute.xlu1 %35  }
  0x7d   :  { %76 = vst.msk [vmem:[%s185_s1 + $0x1] ss:$8 sm:$0xf] %vm11_vm0, %v20_v5   ;;  %77 = vst.msk [vmem:[%s185_s1 + $0x1] ss:$8 sm:$0xf0] %vm11_vm0, %v20_v5  }
  0x7e   :  { %80 = vst.msk [vmem:[%s185_s1 + $0x3] ss:$8 sm:$0xf] %vm11_vm0, %v36_v6   ;;  %81 = vst.msk [vmem:[%s185_s1 + $0x3] ss:$8 sm:$0xf0] %vm11_vm0, %v36_v6  }
  0x80   :  { %v28_v7 = vpop.permute.xlu0 %27   ;;  %v44_v8 = vpop.permute.xlu1 %43  }
  0x81   :  { %78 = vst.msk [vmem:[%s185_s1 + $0x2] ss:$8 sm:$0xf] %vm11_vm0, %v28_v7   ;;  %79 = vst.msk [vmem:[%s185_s1 + $0x2] ss:$8 sm:$0xf0] %vm11_vm0, %v28_v7  }
  0x82   :  { %82 = vst.msk [vmem:[%s185_s1 + $0x4] ss:$8 sm:$0xf] %vm11_vm0, %v44_v8   ;;  %83 = vst.msk [vmem:[%s185_s1 + $0x4] ss:$8 sm:$0xf0] %vm11_vm0, %v44_v8  }
  0x84   :  { %v52_v9 = vpop.permute.xlu0 %51   ;;  %v60_v10 = vpop.permute.xlu1 %59  }
  0x85   :  { %84 = vst.msk [vmem:[%s185_s1 + $0x5] ss:$8 sm:$0xf] %vm11_vm0, %v52_v9   ;;  %85 = vst.msk [vmem:[%s185_s1 + $0x5] ss:$8 sm:$0xf0] %vm11_vm0, %v52_v9  }
  0x86   :  { %86 = vst.msk [vmem:[%s185_s1 + $0x6] ss:$8 sm:$0xf] %vm11_vm0, %v60_v10   ;;  %87 = vst.msk [vmem:[%s185_s1 + $0x6] ss:$8 sm:$0xf0] %vm11_vm0, %v60_v10  }
  0x88   :  { %v68_v11 = vpop.permute.xlu0 %67  }
  0x89   :  { %88 = vst.msk [vmem:[%s185_s1 + $0x7] ss:$8 sm:$0xf] %vm11_vm0, %v68_v11   ;;  %89 = vst.msk [vmem:[%s185_s1 + $0x7] ss:$8 sm:$0xf0] %vm11_vm0, %v68_v11  }

// kernel: vision_transformer_forward.1
= control target key start
LH: loop header
LB: loop body
LE: loop exit
PB: predicated region body
PF: predicated region fallthrough
CT: control target
= control target key end

     0   :  { %s8245_s6 = smov 1   ;;  %s8246_s10 = smov 2   ;;  %s9847_s0 = inlined_call_operand.smem [shape: u32[41], index: -1, kind: input, shape index: {}] }
   0x1   :  { %s8304_s5 = sld [smem:[%s9847_s0]]   ;;  %s8247_s14 = smov 3  }
   0x2   :  { %s8309_s9 = sld [smem:[%s9847_s0 + %s8245_s6]]   ;;  %s8248_s18 = smov 4  }
   0x3   :  { %s8314_s13 = sld [smem:[%s9847_s0 + %s8246_s10]]   ;;  %s8249_s22 = smov 5  }
   0x4   :  { %s8319_s17 = sld [smem:[%s9847_s0 + %s8247_s14]]   ;;  %s8250_s26 = smov 6  }
   0x5   :  { %s8324_s21 = sld [smem:[%s9847_s0 + %s8248_s18]]   ;;  %s8251_s30 = smov 7  }
   0x6   :  { %s8329_s25 = sld [smem:[%s9847_s0 + %s8249_s22]]   ;;  %s8252_s4 = smov 8  }
   0x7   :  { %s8334_s29 = sld [smem:[%s9847_s0 + %s8250_s26]]   ;;  %s8253_s10 = smov 9  }
   0x8   :  { %s8339_s3 = sld [smem:[%s9847_s0 + %s8251_s30]]   ;;  %s8254_s15 = smov 10  }
   0x9   :  { %s8344_s8 = sld [smem:[%s9847_s0 + %s8252_s4]]   ;;  %s8255_s20 = smov 11  }
   0xa   :  { %s8349_s14 = sld [smem:[%s9847_s0 + %s8253_s10]]   ;;  %s8256_s26 = smov 12  }
   0xb   :  { %s8354_s19 = sld [smem:[%s9847_s0 + %s8254_s15]]   ;;  %s8257_s1 = smov 13  }
   0xc   :  { %s8359_s24 = sld [smem:[%s9847_s0 + %s8255_s20]]   ;;  %s8258_s7 = smov 14  }
   0xd   :  { %s8364_s30 = sld [smem:[%s9847_s0 + %s8256_s26]]   ;;  %s8259_s15 = smov 15  }
   0xe   :  { %s8369_s6 = sld [smem:[%s9847_s0 + %s8257_s1]]   ;;  %s8260_s22 = smov 16  }
   0xf   :  { %s8374_s12 = sld [smem:[%s9847_s0 + %s8258_s7]]   ;;  %s8261_s28 = smov 17  }
  0x10   :  { %s8379_s20 = sld [smem:[%s9847_s0 + %s8259_s15]]   ;;  %s8262_s7 = smov 18  }
  0x11   :  { %s8384_s27 = sld [smem:[%s9847_s0 + %s8260_s22]]   ;;  %s8263_s15 = smov 19  }
  0x12   :  { %s8389_s4 = sld [smem:[%s9847_s0 + %s8261_s28]]   ;;  %s8264_s22 = smov 20  }
  0x13   :  { %9857 = sst [smem:[#allocation13_spill]] %s8364_s30  ;;  %s8265_s28 = smov 21  }
  0x14   :  { %9858 = sst [smem:[#allocation14_spill]] %s8369_s6 }
  0x15   :  { %s8394_s6 = sld [smem:[%s9847_s0 + %s8262_s7]]   ;;  %s8266_s7 = smov 22  }
  0x16   :  { %9859 = sst [smem:[#allocation15_spill]] %s8379_s20 }
  0x17   :  { %9860 = sst [smem:[#allocation16_spill]] %s8384_s27 }
  0x18   :  { %9861 = sst [smem:[#allocation17_spill]] %s8389_s4 }
  0x19   :  { %s8399_s20 = sld [smem:[%s9847_s0 + %s8263_s15]]   ;;  %s8267_s15 = smov 23  }
  0x1a   :  { %s8404_s27 = sld [smem:[%s9847_s0 + %s8264_s22]]   ;;  %s8268_s22 = smov 24  }
  0x1b   :  { %9862 = sst [smem:[#allocation18_spill]] %s8394_s6 }
  0x1c   :  { %s8409_s4 = sld [smem:[%s9847_s0 + %s8265_s28]]   ;;  %s8269_s28 = smov 25  }
  0x1d   :  { %s8414_s6 = sld [smem:[%s9847_s0 + %s8266_s7]]   ;;  %s8270_s7 = smov 26  }
  0x1f   :  { %9863 = sst [smem:[#allocation19_spill]] %s8399_s20 }
  0x20   :  { %9864 = sst [smem:[#allocation20_spill]] %s8404_s27 }
  0x21   :  { %s8419_s20 = sld [smem:[%s9847_s0 + %s8267_s15]]   ;;  %s8271_s15 = smov 27  }
  0x22   :  { %9865 = sst [smem:[#allocation21_spill]] %s8409_s4 }
  0x23   :  { %9866 = sst [smem:[#allocation22_spill]] %s8414_s6 }
  0x24   :  { %s8424_s27 = sld [smem:[%s9847_s0 + %s8268_s22]]   ;;  %s8272_s22 = smov 28  }
  0x25   :  { %s8429_s4 = sld [smem:[%s9847_s0 + %s8269_s28]]   ;;  %s8273_s28 = smov 29  }
  0x26   :  { %s8434_s6 = sld [smem:[%s9847_s0 + %s8270_s7]]   ;;  %s8274_s7 = smov 30  }
  0x27   :  { %9867 = sst [smem:[#allocation23_spill]] %s8419_s20 }
  0x28   :  { %s8439_s20 = sld [smem:[%s9847_s0 + %s8271_s15]]   ;;  %s8275_s15 = smov 31  }
  0x2a   :  { %9868 = sst [smem:[#allocation24_spill]] %s8424_s27 }
  0x2b   :  { %9869 = sst [smem:[#allocation25_spill]] %s8429_s4 }
  0x2c   :  { %9870 = sst [smem:[#allocation26_spill]] %s8434_s6 }
  0x2d   :  { %s8444_s27 = sld [smem:[%s9847_s0 + %s8272_s22]]   ;;  %s8276_s22 = smov 32  }
  0x2e   :  { %9871 = sst [smem:[#allocation27_spill]] %s8439_s20 }
  0x2f   :  { %s8449_s4 = sld [smem:[%s9847_s0 + %s8273_s28]]   ;;  %s8277_s28 = smov 33  }
  0x30   :  { %s8454_s6 = sld [smem:[%s9847_s0 + %s8274_s7]]   ;;  %s8278_s7 = smov 34  }
  0x31   :  { %s8459_s20 = sld [smem:[%s9847_s0 + %s8275_s15]]   ;;  %s8279_s15 = smov 35  }
  0x33   :  { %9872 = sst [smem:[#allocation28_spill]] %s8444_s27 }
  0x34   :  { %s8464_s27 = sld [smem:[%s9847_s0 + %s8276_s22]]   ;;  %s8280_s22 = smov 36  }
  0x35   :  { %9873 = sst [smem:[#allocation29_spill]] %s8449_s4 }
  0x36   :  { %9874 = sst [smem:[#allocation30_spill]] %s8454_s6 }
  0x37   :  { %9875 = sst [smem:[#allocation31_spill]] %s8459_s20 }
  0x38   :  { %s8469_s4 = sld [smem:[%s9847_s0 + %s8277_s28]]   ;;  %s8281_s28 = smov 37  }
  0x39   :  { %s8474_s6 = sld [smem:[%s9847_s0 + %s8278_s7]]   ;;  %s8282_s7 = smov 38  }
  0x3a   :  { %9876 = sst [smem:[#allocation32_spill]] %s8464_s27 }
  0x3b   :  { %s8479_s20 = sld [smem:[%s9847_s0 + %s8279_s15]]   ;;  %s8283_s15 = smov 39  }
  0x3c   :  { %s8484_s27 = sld [smem:[%s9847_s0 + %s8280_s22]]   ;;  %s8284_s22 = smov 40  }
  0x3d   :  { %s8494_s30 = sld [smem:[%s9847_s0 + %s8282_s7]]  }
  0x3e   :  { %9877 = sst [smem:[#allocation33_spill]] %s8469_s4 }
  0x3f   :  { %s8489_s4 = sld [smem:[%s9847_s0 + %s8281_s28]]  }
  0x41   :  { %9878 = sst [smem:[#allocation34_spill]] %s8479_s20 }
  0x42   :  { %9879 = sst [smem:[#allocation35_spill]] %s8484_s27 }
  0x43   :  { %s8499_s20 = sld [smem:[%s9847_s0 + %s8283_s15]]  }
  0x44   :  { %s8504_s27 = sld [smem:[%s9847_s0 + %s8284_s22]]  }
  0x45   :  { %86 = vsyncpa [#allocation7], 0  ;;  %v180_v0 = vld [vmem:[%s8474_s6] sm:$0xf]  ;;  %v184_v2 = vld [vmem:[%s8474_s6 + $0x4] sm:$0xf] }
  0x46   :  { %v182_v1 = vld [vmem:[%s8474_s6 + $0x20] sm:$0xf]  ;;  %181 = vst [vmem:[#allocation2] sm:$0xf] %v180_v0  ;;  %v186_v3 = vld [vmem:[%s8474_s6 + $0x24] sm:$0xf] }
  0x47   :  { %183 = vst [vmem:[#allocation2 + $0x4] sm:$0xf] %v182_v1  ;;  %v188_v4 = vld [vmem:[%s8474_s6 + $0x8] sm:$0xf]  ;;  %185 = vst [vmem:[#allocation2 + $0x8] sm:$0xf] %v184_v2 }
  0x48   :  { %187 = vst [vmem:[#allocation2 + $0xc] sm:$0xf] %v186_v3  ;;  %189 = vst [vmem:[#allocation2 + $0x10] sm:$0xf] %v188_v4  ;;  %v190_v5 = vld [vmem:[%s8474_s6 + $0x28] sm:$0xf] }
  0x49   :  { %v192_v6 = vld [vmem:[%s8474_s6 + $0xc] sm:$0xf]  ;;  %191 = vst [vmem:[#allocation2 + $0x14] sm:$0xf] %v190_v5  ;;  %v196_v8 = vld [vmem:[%s8474_s6 + $0x10] sm:$0xf] }
  0x4a   :  { %v194_v7 = vld [vmem:[%s8474_s6 + $0x2c] sm:$0xf]  ;;  %193 = vst [vmem:[#allocation2 + $0x18] sm:$0xf] %v192_v6  ;;  %v198_v9 = vld [vmem:[%s8474_s6 + $0x30] sm:$0xf] }
  0x4b   :  { %195 = vst [vmem:[#allocation2 + $0x1c] sm:$0xf] %v194_v7  ;;  %v200_v10 = vld [vmem:[%s8474_s6 + $0x14] sm:$0xf]  ;;  %197 = vst [vmem:[#allocation2 + $0x20] sm:$0xf] %v196_v8 }
  0x4c   :  { %199 = vst [vmem:[#allocation2 + $0x24] sm:$0xf] %v198_v9  ;;  %201 = vst [vmem:[#allocation2 + $0x28] sm:$0xf] %v200_v10  ;;  %v202_v11 = vld [vmem:[%s8474_s6 + $0x34] sm:$0xf] }
  0x4d   :  { %v204_v12 = vld [vmem:[%s8474_s6 + $0x18] sm:$0xf]  ;;  %203 = vst [vmem:[#allocation2 + $0x2c] sm:$0xf] %v202_v11  ;;  %v208_v14 = vld [vmem:[%s8474_s6 + $0x1c] sm:$0xf] }
  0x4e   :  { %v206_v13 = vld [vmem:[%s8474_s6 + $0x38] sm:$0xf]  ;;  %205 = vst [vmem:[#allocation2 + $0x30] sm:$0xf] %v204_v12  ;;  %v210_v15 = vld [vmem:[%s8474_s6 + $0x3c] sm:$0xf] }
  0x4f   :  { %207 = vst [vmem:[#allocation2 + $0x34] sm:$0xf] %v206_v13  ;;  %v212_v16 = vld [vmem:[%s8474_s6 + $0x40] sm:$0xf]  ;;  %209 = vst [vmem:[#allocation2 + $0x38] sm:$0xf] %v208_v14 }
  0x50   :  { %211 = vst [vmem:[#allocation2 + $0x3c] sm:$0xf] %v210_v15  ;;  %213 = vst [vmem:[#allocation2 + $0x40] sm:$0xf] %v212_v16  ;;  %v214_v17 = vld [vmem:[%s8474_s6 + $0x60] sm:$0xf] }
  0x51   :  { %v216_v18 = vld [vmem:[%s8474_s6 + $0x44] sm:$0xf]  ;;  %215 = vst [vmem:[#allocation2 + $0x44] sm:$0xf] %v214_v17  ;;  %v220_v20 = vld [vmem:[%s8474_s6 + $0x48] sm:$0xf] }
  0x52   :  { %v218_v19 = vld [vmem:[%s8474_s6 + $0x64] sm:$0xf]  ;;  %217 = vst [vmem:[#allocation2 + $0x48] sm:$0xf] %v216_v18  ;;  %v222_v21 = vld [vmem:[%s8474_s6 + $0x68] sm:$0xf] }
  0x53   :  { %219 = vst [vmem:[#allocation2 + $0x4c] sm:$0xf] %v218_v19  ;;  %v224_v22 = vld [vmem:[%s8474_s6 + $0x4c] sm:$0xf]  ;;  %221 = vst [vmem:[#allocation2 + $0x50] sm:$0xf] %v220_v20 }
  0x54   :  { %223 = vst [vmem:[#allocation2 + $0x54] sm:$0xf] %v222_v21  ;;  %225 = vst [vmem:[#allocation2 + $0x58] sm:$0xf] %v224_v22  ;;  %v226_v23 = vld [vmem:[%s8474_s6 + $0x6c] sm:$0xf] }
  0x55   :  { %v228_v24 = vld [vmem:[%s8474_s6 + $0x50] sm:$0xf]  ;;  %227 = vst [vmem:[#allocation2 + $0x5c] sm:$0xf] %v226_v23  ;;  %v232_v26 = vld [vmem:[%s8474_s6 + $0x54] sm:$0xf] }
  0x56   :  { %v230_v25 = vld [vmem:[%s8474_s6 + $0x70] sm:$0xf]  ;;  %229 = vst [vmem:[#allocation2 + $0x60] sm:$0xf] %v228_v24  ;;  %v234_v27 = vld [vmem:[%s8474_s6 + $0x74] sm:$0xf] }
  0x57   :  { %231 = vst [vmem:[#allocation2 + $0x64] sm:$0xf] %v230_v25  ;;  %v236_v28 = vld [vmem:[%s8474_s6 + $0x58] sm:$0xf]  ;;  %233 = vst [vmem:[#allocation2 + $0x68] sm:$0xf] %v232_v26 }
  0x58   :  { %235 = vst [vmem:[#allocation2 + $0x6c] sm:$0xf] %v234_v27  ;;  %237 = vst [vmem:[#allocation2 + $0x70] sm:$0xf] %v236_v28  ;;  %v238_v29 = vld [vmem:[%s8474_s6 + $0x78] sm:$0xf] }
  0x59   :  { %v240_v30 = vld [vmem:[%s8474_s6 + $0x5c] sm:$0xf]  ;;  %239 = vst [vmem:[#allocation2 + $0x74] sm:$0xf] %v238_v29  ;;  %v244_v32 = vld [vmem:[%s8474_s6 + $0x80] sm:$0xf] }
  0x5a   :  { %v242_v31 = vld [vmem:[%s8474_s6 + $0x7c] sm:$0xf]  ;;  %241 = vst [vmem:[#allocation2 + $0x78] sm:$0xf] %v240_v30  ;;  %v246_v33 = vld [vmem:[%s8474_s6 + $0xa0] sm:$0xf] }
  0x5b   :  { %243 = vst [vmem:[#allocation2 + $0x7c] sm:$0xf] %v242_v31  ;;  %v248_v34 = vld [vmem:[%s8474_s6 + $0x84] sm:$0xf]  ;;  %245 = vst [vmem:[#allocation2 + $0x80] sm:$0xf] %v244_v32 }
  0x5c   :  { %247 = vst [vmem:[#allocation2 + $0x84] sm:$0xf] %v246_v33  ;;  %249 = vst [vmem:[#allocation2 + $0x88] sm:$0xf] %v248_v34  ;;  %v250_v35 = vld [vmem:[%s8474_s6 + $0xa4] sm:$0xf] }
  0x5d   :  { %v252_v36 = vld [vmem:[%s8474_s6 + $0x88] sm:$0xf]  ;;  %251 = vst [vmem:[#allocation2 + $0x8c] sm:$0xf] %v250_v35  ;;  %v256_v38 = vld [vmem:[%s8474_s6 + $0x8c] sm:$0xf] }
  0x5e   :  { %v254_v37 = vld [vmem:[%s8474_s6 + $0xa8] sm:$0xf]  ;;  %253 = vst [vmem:[#allocation2 + $0x90] sm:$0xf] %v252_v36  ;;  %v258_v39 = vld [vmem:[%s8474_s6 + $0xac] sm:$0xf] }
  0x5f   :  { %255 = vst [vmem:[#allocation2 + $0x94] sm:$0xf] %v254_v37  ;;  %v260_v40 = vld [vmem:[%s8474_s6 + $0x90] sm:$0xf]  ;;  %257 = vst [vmem:[#allocation2 + $0x98] sm:$0xf] %v256_v38 }
  0x60   :  { %259 = vst [vmem:[#allocation2 + $0x9c] sm:$0xf] %v258_v39  ;;  %261 = vst [vmem:[#allocation2 + $0xa0] sm:$0xf] %v260_v40  ;;  %v262_v41 = vld [vmem:[%s8474_s6 + $0xb0] sm:$0xf] }
  0x61   :  { %v264_v42 = vld [vmem:[%s8474_s6 + $0x94] sm:$0xf]  ;;  %263 = vst [vmem:[#allocation2 + $0xa4] sm:$0xf] %v262_v41  ;;  %v268_v44 = vld [vmem:[%s8474_s6 + $0x98] sm:$0xf] }
  0x62   :  { %v266_v43 = vld [vmem:[%s8474_s6 + $0xb4] sm:$0xf]  ;;  %265 = vst [vmem:[#allocation2 + $0xa8] sm:$0xf] %v264_v42  ;;  %v270_v45 = vld [vmem:[%s8474_s6 + $0xb8] sm:$0xf] }
  0x63   :  { %267 = vst [vmem:[#allocation2 + $0xac] sm:$0xf] %v266_v43  ;;  %v272_v46 = vld [vmem:[%s8474_s6 + $0x9c] sm:$0xf]  ;;  %269 = vst [vmem:[#allocation2 + $0xb0] sm:$0xf] %v268_v44 }
  0x64   :  { %271 = vst [vmem:[#allocation2 + $0xb4] sm:$0xf] %v270_v45  ;;  %273 = vst [vmem:[#allocation2 + $0xb8] sm:$0xf] %v272_v46  ;;  %v274_v47 = vld [vmem:[%s8474_s6 + $0xbc] sm:$0xf] }
  0x65   :  { %v276_v48 = vld [vmem:[%s8474_s6 + $0xc0] sm:$0xf]  ;;  %275 = vst [vmem:[#allocation2 + $0xbc] sm:$0xf] %v274_v47  ;;  %v280_v50 = vld [vmem:[%s8474_s6 + $0xc4] sm:$0xf] }
  0x66   :  { %v278_v49 = vld [vmem:[%s8474_s6 + $0xe0] sm:$0xf]  ;;  %277 = vst [vmem:[#allocation2 + $0xc0] sm:$0xf] %v276_v48  ;;  %v282_v51 = vld [vmem:[%s8474_s6 + $0xe4] sm:$0xf] }
  0x67   :  { %279 = vst [vmem:[#allocation2 + $0xc4] sm:$0xf] %v278_v49  ;;  %v284_v52 = vld [vmem:[%s8474_s6 + $0xc8] sm:$0xf]  ;;  %281 = vst [vmem:[#allocation2 + $0xc8] sm:$0xf] %v280_v50 }
  0x68   :  { %283 = vst [vmem:[#allocation2 + $0xcc] sm:$0xf] %v282_v51  ;;  %285 = vst [vmem:[#allocation2 + $0xd0] sm:$0xf] %v284_v52  ;;  %v286_v53 = vld [vmem:[%s8474_s6 + $0xe8] sm:$0xf] }
  0x69   :  { %v288_v54 = vld [vmem:[%s8474_s6 + $0xcc] sm:$0xf]  ;;  %287 = vst [vmem:[#allocation2 + $0xd4] sm:$0xf] %v286_v53  ;;  %v292_v56 = vld [vmem:[%s8474_s6 + $0xd0] sm:$0xf] }
  0x6a   :  { %v290_v55 = vld [vmem:[%s8474_s6 + $0xec] sm:$0xf]  ;;  %289 = vst [vmem:[#allocation2 + $0xd8] sm:$0xf] %v288_v54  ;;  %v294_v57 = vld [vmem:[%s8474_s6 + $0xf0] sm:$0xf] }
  0x6b   :  { %291 = vst [vmem:[#allocation2 + $0xdc] sm:$0xf] %v290_v55  ;;  %v296_v58 = vld [vmem:[%s8474_s6 + $0xd4] sm:$0xf]  ;;  %293 = vst [vmem:[#allocation2 + $0xe0] sm:$0xf] %v292_v56 }
  0x6c   :  { %295 = vst [vmem:[#allocation2 + $0xe4] sm:$0xf] %v294_v57  ;;  %297 = vst [vmem:[#allocation2 + $0xe8] sm:$0xf] %v296_v58  ;;  %v298_v59 = vld [vmem:[%s8474_s6 + $0xf4] sm:$0xf] }
  0x6d   :  { %v300_v60 = vld [vmem:[%s8474_s6 + $0xd8] sm:$0xf]  ;;  %299 = vst [vmem:[#allocation2 + $0xec] sm:$0xf] %v298_v59  ;;  %v304_v62 = vld [vmem:[%s8474_s6 + $0xdc] sm:$0xf] }
  0x6e   :  { %v302_v61 = vld [vmem:[%s8474_s6 + $0xf8] sm:$0xf]  ;;  %301 = vst [vmem:[#allocation2 + $0xf0] sm:$0xf] %v300_v60  ;;  %v306_v63 = vld [vmem:[%s8474_s6 + $0xfc] sm:$0xf] }
  0x6f   :  { %303 = vst [vmem:[#allocation2 + $0xf4] sm:$0xf] %v302_v61  ;;  %v308_v0 = vld [vmem:[%s8474_s6 + $0x100] sm:$0xf]  ;;  %305 = vst [vmem:[#allocation2 + $0xf8] sm:$0xf] %v304_v62 }
  0x70   :  { %307 = vst [vmem:[#allocation2 + $0xfc] sm:$0xf] %v306_v63  ;;  %309 = vst [vmem:[#allocation2 + $0x100] sm:$0xf] %v308_v0  ;;  %v310_v1 = vld [vmem:[%s8474_s6 + $0x120] sm:$0xf] }
  0x71   :  { %v312_v2 = vld [vmem:[%s8474_s6 + $0x104] sm:$0xf]  ;;  %311 = vst [vmem:[#allocation2 + $0x104] sm:$0xf] %v310_v1  ;;  %v316_v4 = vld [vmem:[%s8474_s6 + $0x108] sm:$0xf] }
  0x72   :  { %v314_v3 = vld [vmem:[%s8474_s6 + $0x124] sm:$0xf]  ;;  %313 = vst [vmem:[#allocation2 + $0x108] sm:$0xf] %v312_v2  ;;  %v318_v5 = vld [vmem:[%s8474_s6 + $0x128] sm:$0xf] }
  0x73   :  { %315 = vst [vmem:[#allocation2 + $0x10c] sm:$0xf] %v314_v3  ;;  %v320_v6 = vld [vmem:[%s8474_s6 + $0x10c] sm:$0xf]  ;;  %317 = vst [vmem:[#allocation2 + $0x110] sm:$0xf] %v316_v4 }
  0x74   :  { %319 = vst [vmem:[#allocation2 + $0x114] sm:$0xf] %v318_v5  ;;  %321 = vst [vmem:[#allocation2 + $0x118] sm:$0xf] %v320_v6  ;;  %v322_v7 = vld [vmem:[%s8474_s6 + $0x12c] sm:$0xf] }
  0x75   :  { %v324_v8 = vld [vmem:[%s8474_s6 + $0x110] sm:$0xf]  ;;  %323 = vst [vmem:[#allocation2 + $0x11c] sm:$0xf] %v322_v7  ;;  %v328_v10 = vld [vmem:[%s8474_s6 + $0x114] sm:$0xf] }
  0x76   :  { %v326_v9 = vld [vmem:[%s8474_s6 + $0x130] sm:$0xf]  ;;  %325 = vst [vmem:[#allocation2 + $0x120] sm:$0xf] %v324_v8  ;;  %v330_v11 = vld [vmem:[%s8474_s6 + $0x134] sm:$0xf] }
  0x77   :  { %327 = vst [vmem:[#allocation2 + $0x124] sm:$0xf] %v326_v9  ;;  %v332_v12 = vld [vmem:[%s8474_s6 + $0x118] sm:$0xf]  ;;  %329 = vst [vmem:[#allocation2 + $0x128] sm:$0xf] %v328_v10 }
  0x78   :  { %331 = vst [vmem:[#allocation2 + $0x12c] sm:$0xf] %v330_v11  ;;  %333 = vst [vmem:[#allocation2 + $0x130] sm:$0xf] %v332_v12  ;;  %v334_v13 = vld [vmem:[%s8474_s6 + $0x138] sm:$0xf] }
  0x79   :  { %v336_v14 = vld [vmem:[%s8474_s6 + $0x11c] sm:$0xf]  ;;  %335 = vst [vmem:[#allocation2 + $0x134] sm:$0xf] %v334_v13  ;;  %v340_v16 = vld [vmem:[%s8474_s6 + $0x140] sm:$0xf] }
  0x7a   :  { %v338_v15 = vld [vmem:[%s8474_s6 + $0x13c] sm:$0xf]  ;;  %337 = vst [vmem:[#allocation2 + $0x138] sm:$0xf] %v336_v14  ;;  %v342_v17 = vld [vmem:[%s8474_s6 + $0x160] sm:$0xf] }
  0x7b   :  { %339 = vst [vmem:[#allocation2 + $0x13c] sm:$0xf] %v338_v15  ;;  %v344_v18 = vld [vmem:[%s8474_s6 + $0x144] sm:$0xf]  ;;  %341 = vst [vmem:[#allocation2 + $0x140] sm:$0xf] %v340_v16 }
  0x7c   :  { %343 = vst [vmem:[#allocation2 + $0x144] sm:$0xf] %v342_v17  ;;  %345 = vst [vmem:[#allocation2 + $0x148] sm:$0xf] %v344_v18  ;;  %v346_v19 = vld [vmem:[%s8474_s6 + $0x164] sm:$0xf] }
  0x7d   :  { %v348_v20 = vld [vmem:[%s8474_s6 + $0x148] sm:$0xf]  ;;  %347 = vst [vmem:[#allocation2 + $0x14c] sm:$0xf] %v346_v19  ;;  %v352_v22 = vld [vmem:[%s8474_s6 + $0x14c] sm:$0xf] }
  0x7e   :  { %v350_v21 = vld [vmem:[%s8474_s6 + $0x168] sm:$0xf]  ;;  %349 = vst [vmem:[#allocation2 + $0x150] sm:$0xf] %v348_v20  ;;  %v354_v23 = vld [vmem:[%s8474_s6 + $0x16c] sm:$0xf] }
  0x7f   :  { %351 = vst [vmem:[#allocation2 + $0x154] sm:$0xf] %v350_v21  ;;  %v356_v24 = vld [vmem:[%s8474_s6 + $0x150] sm:$0xf]  ;;  %353 = vst [vmem:[#allocation2 + $0x158] sm:$0xf] %v352_v22 }
  0x80   :  { %355 = vst [vmem:[#allocation2 + $0x15c] sm:$0xf] %v354_v23  ;;  %357 = vst [vmem:[#allocation2 + $0x160] sm:$0xf] %v356_v24  ;;  %v358_v25 = vld [vmem:[%s8474_s6 + $0x170] sm:$0xf] }
  0x81   :  { %v360_v26 = vld [vmem:[%s8474_s6 + $0x154] sm:$0xf]  ;;  %359 = vst [vmem:[#allocation2 + $0x164] sm:$0xf] %v358_v25  ;;  %v364_v28 = vld [vmem:[%s8474_s6 + $0x158] sm:$0xf] }
  0x82   :  { %v362_v27 = vld [vmem:[%s8474_s6 + $0x174] sm:$0xf]  ;;  %361 = vst [vmem:[#allocation2 + $0x168] sm:$0xf] %v360_v26  ;;  %v366_v29 = vld [vmem:[%s8474_s6 + $0x178] sm:$0xf] }
  0x83   :  { %363 = vst [vmem:[#allocation2 + $0x16c] sm:$0xf] %v362_v27  ;;  %v368_v30 = vld [vmem:[%s8474_s6 + $0x15c] sm:$0xf]  ;;  %365 = vst [vmem:[#allocation2 + $0x170] sm:$0xf] %v364_v28 }
  0x84   :  { %367 = vst [vmem:[#allocation2 + $0x174] sm:$0xf] %v366_v29  ;;  %369 = vst [vmem:[#allocation2 + $0x178] sm:$0xf] %v368_v30  ;;  %v370_v31 = vld [vmem:[%s8474_s6 + $0x17c] sm:$0xf] }
  0x85   :  { %v372_v32 = vld [vmem:[%s8474_s6 + $0x180] sm:$0xf]  ;;  %371 = vst [vmem:[#allocation2 + $0x17c] sm:$0xf] %v370_v31  ;;  %v376_v34 = vld [vmem:[%s8474_s6 + $0x184] sm:$0xf] }
  0x86   :  { %v374_v33 = vld [vmem:[%s8474_s6 + $0x1a0] sm:$0xf]  ;;  %373 = vst [vmem:[#allocation2 + $0x180] sm:$0xf] %v372_v32  ;;  %v378_v35 = vld [vmem:[%s8474_s6 + $0x1a4] sm:$0xf] }
  0x87   :  { %375 = vst [vmem:[#allocation2 + $0x184] sm:$0xf] %v374_v33  ;;  %v380_v36 = vld [vmem:[%s8474_s6 + $0x188] sm:$0xf]  ;;  %377 = vst [vmem:[#allocation2 + $0x188] sm:$0xf] %v376_v34 }
  0x88   :  { %379 = vst [vmem:[#allocation2 + $0x18c] sm:$0xf] %v378_v35  ;;  %381 = vst [vmem:[#allocation2 + $0x190] sm:$0xf] %v380_v36  ;;  %v382_v37 = vld [vmem:[%s8474_s6 + $0x1a8] sm:$0xf] }
  0x89   :  { %v384_v38 = vld [vmem:[%s8474_s6 + $0x18c] sm:$0xf]  ;;  %383 = vst [vmem:[#allocation2 + $0x194] sm:$0xf] %v382_v37  ;;  %v388_v40 = vld [vmem:[%s8474_s6 + $0x190] sm:$0xf] }
  0x8a   :  { %v386_v39 = vld [vmem:[%s8474_s6 + $0x1ac] sm:$0xf]  ;;  %385 = vst [vmem:[#allocation2 + $0x198] sm:$0xf] %v384_v38  ;;  %v390_v41 = vld [vmem:[%s8474_s6 + $0x1b0] sm:$0xf] }
  0x8b   :  { %387 = vst [vmem:[#allocation2 + $0x19c] sm:$0xf] %v386_v39  ;;  %v392_v42 = vld [vmem:[%s8474_s6 + $0x194] sm:$0xf]  ;;  %389 = vst [vmem:[#allocation2 + $0x1a0] sm:$0xf] %v388_v40 }
  0x8c   :  { %391 = vst [vmem:[#allocation2 + $0x1a4] sm:$0xf] %v390_v41  ;;  %393 = vst [vmem:[#allocation2 + $0x1a8] sm:$0xf] %v392_v42  ;;  %v394_v43 = vld [vmem:[%s8474_s6 + $0x1b4] sm:$0xf] }
  0x8d   :  { %v396_v44 = vld [vmem:[%s8474_s6 + $0x198] sm:$0xf]  ;;  %395 = vst [vmem:[#allocation2 + $0x1ac] sm:$0xf] %v394_v43  ;;  %v400_v46 = vld [vmem:[%s8474_s6 + $0x19c] sm:$0xf] }
  0x8e   :  { %v398_v45 = vld [vmem:[%s8474_s6 + $0x1b8] sm:$0xf]  ;;  %397 = vst [vmem:[#allocation2 + $0x1b0] sm:$0xf] %v396_v44  ;;  %v402_v47 = vld [vmem:[%s8474_s6 + $0x1bc] sm:$0xf] }
  0x8f   :  { %399 = vst [vmem:[#allocation2 + $0x1b4] sm:$0xf] %v398_v45  ;;  %v404_v48 = vld [vmem:[%s8474_s6 + $0x1c0] sm:$0xf]  ;;  %401 = vst [vmem:[#allocation2 + $0x1b8] sm:$0xf] %v400_v46 }
  0x90   :  { %403 = vst [vmem:[#allocation2 + $0x1bc] sm:$0xf] %v402_v47  ;;  %405 = vst [vmem:[#allocation2 + $0x1c0] sm:$0xf] %v404_v48  ;;  %v406_v49 = vld [vmem:[%s8474_s6 + $0x1e0] sm:$0xf] }
  0x91   :  { %v408_v50 = vld [vmem:[%s8474_s6 + $0x1c4] sm:$0xf]  ;;  %407 = vst [vmem:[#allocation2 + $0x1c4] sm:$0xf] %v406_v49  ;;  %v412_v52 = vld [vmem:[%s8474_s6 + $0x1c8] sm:$0xf] }
  0x92   :  { %v410_v51 = vld [vmem:[%s8474_s6 + $0x1e4] sm:$0xf]  ;;  %409 = vst [vmem:[#allocation2 + $0x1c8] sm:$0xf] %v408_v50  ;;  %v414_v53 = vld [vmem:[%s8474_s6 + $0x1e8] sm:$0xf] }
  0x93   :  { %411 = vst [vmem:[#allocation2 + $0x1cc] sm:$0xf] %v410_v51  ;;  %v416_v54 = vld [vmem:[%s8474_s6 + $0x1cc] sm:$0xf]  ;;  %413 = vst [vmem:[#allocation2 + $0x1d0] sm:$0xf] %v412_v52 }
  0x94   :  { %415 = vst [vmem:[#allocation2 + $0x1d4] sm:$0xf] %v414_v53  ;;  %417 = vst [vmem:[#allocation2 + $0x1d8] sm:$0xf] %v416_v54  ;;  %v418_v55 = vld [vmem:[%s8474_s6 + $0x1ec] sm:$0xf] }
  0x95   :  { %v420_v56 = vld [vmem:[%s8474_s6 + $0x1d0] sm:$0xf]  ;;  %419 = vst [vmem:[#allocation2 + $0x1dc] sm:$0xf] %v418_v55  ;;  %v424_v58 = vld [vmem:[%s8474_s6 + $0x1d4] sm:$0xf] }
  0x96   :  { %v422_v57 = vld [vmem:[%s8474_s6 + $0x1f0] sm:$0xf]  ;;  %421 = vst [vmem:[#allocation2 + $0x1e0] sm:$0xf] %v420_v56  ;;  %v426_v59 = vld [vmem:[%s8474_s6 + $0x1f4] sm:$0xf] }
  0x97   :  { %423 = vst [vmem:[#allocation2 + $0x1e4] sm:$0xf] %v422_v57  ;;  %v428_v60 = vld [vmem:[%s8474_s6 + $0x1d8] sm:$0xf]  ;;  %425 = vst [vmem:[#allocation2 + $0x1e8] sm:$0xf] %v424_v58 }
  0x98   :  { %427 = vst [vmem:[#allocation2 + $0x1ec] sm:$0xf] %v426_v59  ;;  %429 = vst [vmem:[#allocation2 + $0x1f0] sm:$0xf] %v428_v60  ;;  %v430_v61 = vld [vmem:[%s8474_s6 + $0x1f8] sm:$0xf] }
  0x99   :  { %v432_v62 = vld [vmem:[%s8474_s6 + $0x1dc] sm:$0xf]  ;;  %431 = vst [vmem:[#allocation2 + $0x1f4] sm:$0xf] %v430_v61 }
  0x9a   :  { %v434_v63 = vld [vmem:[%s8474_s6 + $0x1fc] sm:$0xf]  ;;  %433 = vst [vmem:[#allocation2 + $0x1f8] sm:$0xf] %v432_v62 }
  0x9b   :  { %435 = vst [vmem:[#allocation2 + $0x1fc] sm:$0xf] %v434_v63 }
  0x9c   :  { %722 = vsyncadd [#allocation4], 8192  ;;  %v8635_v0 = vld [vmem:[%s8494_s30] sm:$0xff]  ;;  %v8638_v1 = vld [vmem:[%s8494_s30 + $0x8] sm:$0xff] }
  0x9d   :  { %9880 = vst [vmem:[#allocation36_spill] sm:$0xff] %v8638_v1  ;;  %v8641_v2 = vld [vmem:[%s8494_s30 + $0x10] sm:$0xff]  ;;  %v8644_v3 = vld [vmem:[%s8494_s30 + $0x18] sm:$0xff]  ;;  %v8647_v4 = vld [vmem:[%s8494_s30 + $0x20] sm:$0xff] }
  0x9e   :  { %9881 = vst [vmem:[#allocation37_spill] sm:$0xff] %v8641_v2  ;;  %9882 = vst [vmem:[#allocation38_spill] sm:$0xff] %v8644_v3  ;;  %v8650_v5 = vld [vmem:[%s8494_s30 + $0x28] sm:$0xff]  ;;  %v8653_v6 = vld [vmem:[%s8494_s30 + $0x30] sm:$0xff] }
  0x9f   :  { %9883 = vst [vmem:[#allocation39_spill] sm:$0xff] %v8647_v4  ;;  %9884 = vst [vmem:[#allocation40_spill] sm:$0xff] %v8650_v5  ;;  %v8656_v7 = vld [vmem:[%s8494_s30 + $0x38] sm:$0xff]  ;;  %v8659_v8 = vld [vmem:[%s8494_s30 + $0x40] sm:$0xff] }
  0xa0   :  { %9885 = vst [vmem:[#allocation41_spill] sm:$0xff] %v8653_v6  ;;  %9886 = vst [vmem:[#allocation42_spill] sm:$0xff] %v8656_v7  ;;  %v8662_v9 = vld [vmem:[%s8494_s30 + $0x48] sm:$0xff]  ;;  %v8665_v10 = vld [vmem:[%s8494_s30 + $0x50] sm:$0xff] }
  0xa1   :  { %9887 = vst [vmem:[#allocation43_spill] sm:$0xff] %v8665_v10  ;;  %v8668_v11 = vld [vmem:[%s8494_s30 + $0x58] sm:$0xff]  ;;  %v8671_v12 = vld [vmem:[%s8494_s30 + $0x60] sm:$0xff]  ;;  %v8674_v13 = vld [vmem:[%s8494_s30 + $0x68] sm:$0xff] }
  0xa2   :  { %9888 = vst [vmem:[#allocation44_spill] sm:$0xff] %v8668_v11  ;;  %9889 = vst [vmem:[#allocation45_spill] sm:$0xff] %v8671_v12  ;;  %v8677_v14 = vld [vmem:[%s8494_s30 + $0x70] sm:$0xff]  ;;  %v8680_v15 = vld [vmem:[%s8494_s30 + $0x78] sm:$0xff] }
  0xa3   :  { %9890 = vst [vmem:[#allocation46_spill] sm:$0xff] %v8674_v13  ;;  %9891 = vst [vmem:[#allocation47_spill] sm:$0xff] %v8677_v14  ;;  %v8683_v16 = vld [vmem:[%s8494_s30 + $0x80] sm:$0xff]  ;;  %v8686_v17 = vld [vmem:[%s8494_s30 + $0x88] sm:$0xff] }
  0xa4   :  { %9892 = vst [vmem:[#allocation48_spill] sm:$0xff] %v8680_v15  ;;  %9893 = vst [vmem:[#allocation49_spill] sm:$0xff] %v8686_v17  ;;  %v8689_v18 = vld [vmem:[%s8494_s30 + $0x90] sm:$0xff]  ;;  %v8692_v19 = vld [vmem:[%s8494_s30 + $0x98] sm:$0xff] }
  0xa5   :  { %9894 = vst [vmem:[#allocation50_spill] sm:$0xff] %v8689_v18  ;;  %9895 = vst [vmem:[#allocation51_spill] sm:$0xff] %v8692_v19  ;;  %v8695_v20 = vld [vmem:[%s8494_s30 + $0xa0] sm:$0xff]  ;;  %v8698_v21 = vld [vmem:[%s8494_s30 + $0xa8] sm:$0xff] }
  0xa6   :  { %9896 = vst [vmem:[#allocation52_spill] sm:$0xff] %v8695_v20  ;;  %9897 = vst [vmem:[#allocation53_spill] sm:$0xff] %v8698_v21  ;;  %v8701_v22 = vld [vmem:[%s8494_s30 + $0xb0] sm:$0xff]  ;;  %v8704_v23 = vld [vmem:[%s8494_s30 + $0xb8] sm:$0xff] }
  0xa7   :  { %9898 = vst [vmem:[#allocation54_spill] sm:$0xff] %v8701_v22  ;;  %9899 = vst [vmem:[#allocation55_spill] sm:$0xff] %v8704_v23  ;;  %v8707_v24 = vld [vmem:[%s8494_s30 + $0xc0] sm:$0xff]  ;;  %v8710_v25 = vld [vmem:[%s8494_s30 + $0xc8] sm:$0xff] }
  0xa8   :  { %9900 = vst [vmem:[#allocation56_spill] sm:$0xff] %v8710_v25  ;;  %v8713_v26 = vld [vmem:[%s8494_s30 + $0xd0] sm:$0xff]  ;;  %v8716_v27 = vld [vmem:[%s8494_s30 + $0xd8] sm:$0xff]  ;;  %v8719_v28 = vld [vmem:[%s8494_s30 + $0xe0] sm:$0xff] }
  0xa9   :  { %9901 = vst [vmem:[#allocation57_spill] sm:$0xff] %v8713_v26  ;;  %9902 = vst [vmem:[#allocation58_spill] sm:$0xff] %v8716_v27  ;;  %v8722_v29 = vld [vmem:[%s8494_s30 + $0xe8] sm:$0xff]  ;;  %v8725_v30 = vld [vmem:[%s8494_s30 + $0xf0] sm:$0xff] }
  0xaa   :  { %9903 = vst [vmem:[#allocation59_spill] sm:$0xff] %v8719_v28  ;;  %9904 = vst [vmem:[#allocation60_spill] sm:$0xff] %v8722_v29  ;;  %v8728_v31 = vld [vmem:[%s8494_s30 + $0xf8] sm:$0xff]  ;;  %v8731_v32 = vld [vmem:[%s8494_s30 + $0x100] sm:$0xff] }
  0xab   :  { %9905 = vst [vmem:[#allocation61_spill] sm:$0xff] %v8725_v30  ;;  %9906 = vst [vmem:[#allocation62_spill] sm:$0xff] %v8728_v31  ;;  %v8734_v33 = vld [vmem:[%s8494_s30 + $0x108] sm:$0xff]  ;;  %v8737_v34 = vld [vmem:[%s8494_s30 + $0x110] sm:$0xff] }
  0xac   :  { %9907 = vst [vmem:[#allocation63_spill] sm:$0xff] %v8731_v32  ;;  %9908 = vst [vmem:[#allocation64_spill] sm:$0xff] %v8734_v33  ;;  %v8740_v35 = vld [vmem:[%s8494_s30 + $0x118] sm:$0xff]  ;;  %v8743_v36 = vld [vmem:[%s8494_s30 + $0x120] sm:$0xff] }
  0xad   :  { %9909 = vst [vmem:[#allocation65_spill] sm:$0xff] %v8737_v34  ;;  %9910 = vst [vmem:[#allocation66_spill] sm:$0xff] %v8740_v35  ;;  %v8746_v37 = vld [vmem:[%s8494_s30 + $0x128] sm:$0xff]  ;;  %v8749_v38 = vld [vmem:[%s8494_s30 + $0x130] sm:$0xff] }
  0xae   :  { %9911 = vst [vmem:[#allocation67_spill] sm:$0xff] %v8743_v36  ;;  %9912 = vst [vmem:[#allocation68_spill] sm:$0xff] %v8746_v37  ;;  %v8752_v39 = vld [vmem:[%s8494_s30 + $0x138] sm:$0xff]  ;;  %v8755_v40 = vld [vmem:[%s8494_s30 + $0x140] sm:$0xff] }
  0xaf   :  { %9913 = vst [vmem:[#allocation69_spill] sm:$0xff] %v8749_v38  ;;  %9914 = vst [vmem:[#allocation70_spill] sm:$0xff] %v8752_v39  ;;  %v8758_v41 = vld [vmem:[%s8494_s30 + $0x148] sm:$0xff]  ;;  %v8761_v42 = vld [vmem:[%s8494_s30 + $0x150] sm:$0xff] }
  0xb0   :  { %9915 = vst [vmem:[#allocation71_spill] sm:$0xff] %v8755_v40  ;;  %9916 = vst [vmem:[#allocation72_spill] sm:$0xff] %v8758_v41  ;;  %v8764_v43 = vld [vmem:[%s8494_s30 + $0x158] sm:$0xff]  ;;  %v8767_v44 = vld [vmem:[%s8494_s30 + $0x160] sm:$0xff] }
  0xb1   :  { %9917 = vst [vmem:[#allocation73_spill] sm:$0xff] %v8761_v42  ;;  %9918 = vst [vmem:[#allocation74_spill] sm:$0xff] %v8764_v43  ;;  %v8770_v45 = vld [vmem:[%s8494_s30 + $0x168] sm:$0xff]  ;;  %v8773_v46 = vld [vmem:[%s8494_s30 + $0x170] sm:$0xff] }
  0xb2   :  { %9919 = vst [vmem:[#allocation75_spill] sm:$0xff] %v8767_v44  ;;  %9920 = vst [vmem:[#allocation76_spill] sm:$0xff] %v8770_v45  ;;  %v8776_v47 = vld [vmem:[%s8494_s30 + $0x178] sm:$0xff]  ;;  %v8779_v48 = vld [vmem:[%s8494_s30 + $0x180] sm:$0xff] }
  0xb3   :  { %9921 = vst [vmem:[#allocation77_spill] sm:$0xff] %v8773_v46  ;;  %9922 = vst [vmem:[#allocation78_spill] sm:$0xff] %v8776_v47  ;;  %v8782_v49 = vld [vmem:[%s8494_s30 + $0x188] sm:$0xff]  ;;  %v8785_v50 = vld [vmem:[%s8494_s30 + $0x190] sm:$0xff] }
  0xb4   :  { %9923 = vst [vmem:[#allocation79_spill] sm:$0xff] %v8779_v48  ;;  %9924 = vst [vmem:[#allocation80_spill] sm:$0xff] %v8782_v49  ;;  %v8788_v51 = vld [vmem:[%s8494_s30 + $0x198] sm:$0xff]  ;;  %v8791_v52 = vld [vmem:[%s8494_s30 + $0x1a0] sm:$0xff] }
  0xb5   :  { %9925 = vst [vmem:[#allocation81_spill] sm:$0xff] %v8785_v50  ;;  %9926 = vst [vmem:[#allocation82_spill] sm:$0xff] %v8788_v51  ;;  %v8794_v53 = vld [vmem:[%s8494_s30 + $0x1a8] sm:$0xff]  ;;  %v8797_v54 = vld [vmem:[%s8494_s30 + $0x1b0] sm:$0xff] }
  0xb6   :  { %9927 = vst [vmem:[#allocation83_spill] sm:$0xff] %v8791_v52  ;;  %9928 = vst [vmem:[#allocation84_spill] sm:$0xff] %v8794_v53  ;;  %v8800_v55 = vld [vmem:[%s8494_s30 + $0x1b8] sm:$0xff]  ;;  %v8803_v56 = vld [vmem:[%s8494_s30 + $0x1c0] sm:$0xff] }
  0xb7   :  { %9929 = vst [vmem:[#allocation85_spill] sm:$0xff] %v8797_v54  ;;  %9930 = vst [vmem:[#allocation86_spill] sm:$0xff] %v8800_v55  ;;  %v8806_v57 = vld [vmem:[%s8494_s30 + $0x1c8] sm:$0xff]  ;;  %v8809_v58 = vld [vmem:[%s8494_s30 + $0x1d0] sm:$0xff] }
  0xb8   :  { %9931 = vst [vmem:[#allocation87_spill] sm:$0xff] %v8803_v56  ;;  %9932 = vst [vmem:[#allocation88_spill] sm:$0xff] %v8806_v57  ;;  %v8812_v59 = vld [vmem:[%s8494_s30 + $0x1d8] sm:$0xff]  ;;  %v8815_v60 = vld [vmem:[%s8494_s30 + $0x1e0] sm:$0xff] }
  0xb9   :  { %9933 = vst [vmem:[#allocation89_spill] sm:$0xff] %v8809_v58  ;;  %9934 = vst [vmem:[#allocation90_spill] sm:$0xff] %v8812_v59  ;;  %v8818_v61 = vld [vmem:[%s8494_s30 + $0x1e8] sm:$0xff]  ;;  %v8821_v62 = vld [vmem:[%s8494_s30 + $0x1f0] sm:$0xff] }
  0xba   :  { %9935 = vst [vmem:[#allocation91_spill] sm:$0xff] %v8815_v60  ;;  %9936 = vst [vmem:[#allocation92_spill] sm:$0xff] %v8818_v61  ;;  %v8824_v63 = vld [vmem:[%s8494_s30 + $0x1f8] sm:$0xff] }
  0xbb   :  { %9937 = vst [vmem:[#allocation93_spill] sm:$0xff] %v8821_v62  ;;  %9938 = vst [vmem:[#allocation94_spill] sm:$0xff] %v8824_v63 }
  0xbc   :  { %891 = vsyncadd [#allocation4 + $0x1], 8192  ;;  %v900_v55 = vld [vmem:[%s8314_s13] sm:$0x3]  ;;  %vm934_vm0 = vcmask 1043456   ;;  %vm909_vm1 = vcmask 31744  }
  0xbd   :  { %v892_v39 = vld [vmem:[%s8304_s5] sm:$0xff]  ;;  %v901_v47 = vunpack.c.l.bf16 %v900_v55  ;;  %v893_v54 = vld [vmem:[%s8304_s5 + $0x8] sm:$0xff]  ;;  %v894_v63 = vld [vmem:[%s8304_s5 + $0x10] sm:$0xff]  ;;  %vm1137_vm2 = vcmask 261120   ;;  %vm1299_vm3 = vcmask 130048   ;;  %s8285_s0 = smov 96  }
  0xbe   :  { %6971 = vmatprep.mubr.msk.f32.mxu0 %vm909_vm1, %v892_v39  ;;  %v6494_v38 = vld [vmem:[%s8324_s21] sm:$0xff]   ;;  %v895_v55 = vld [vmem:[%s8304_s5 + $0x18] sm:$0xff]  ;;  %v897_v39 = vld [vmem:[%s8304_s5 + $0x28] sm:$0xff]  ;;  %v9853_v29 = vmov -1e+30   ;;  %vm1453_vm9 = vcmask 523264  }
  0xbf   :  { %6969 = vmatprep.subr.msk.mxu0 %vm934_vm0, %v901_v47  ;;  %7363 = vmatprep.subr.bf16.mxu1 %v6494_v38  ;;  %v896_v62 = vld [vmem:[%s8304_s5 + $0x20] sm:$0xff]  ;;  %v898_v46 = vld [vmem:[%s8304_s5 + $0x30] sm:$0xff]  ;;  %v1046_v45 = vld [vmem:[%s8309_s9 + $0x18] sm:$0xff]  ;;  %v9944_v12 = vmov -1e+30   ;;  %s8289_s13 = smov 112  }
  0xc0   :  { %6970 = vmatpush3.msk.msra.mxu0 %vm934_vm0, %v901_v47  ;;  %7365 = vmatpush3.bf16.msra.mxu1 %v6494_v38  ;;  %v899_v47 = vld [vmem:[%s8304_s5 + $0x38] sm:$0xff]  ;;  %v6589_v38 = vld [vmem:[%s8324_s21 + $0x8] sm:$0xff]   ;;  %v1043_v37 = vld [vmem:[%s8309_s9] sm:$0xff]  ;;  %s8287_s5 = smov 64   ;;  %s9945_s21 = sld [smem:[#allocation13_spill]] }
  0xc1   :  { %6972 = vmatmul.mubr.msk.f32.vlgmr.msra.gmra.mrb[0].mxu0 %vm909_vm1, %v893_v54  ;;  %7367 = vmatprep.subr.bf16.mxu1 %v6589_v38  ;;  %v6319_v54 = vld [vmem:[%s8319_s17] ss:$0 sm:$0xff]  ;;  %v1045_v60 = vld [vmem:[%s8309_s9 + $0x10] sm:$0xff]  ;;  %vm8931_vm4 = vmpackc.low %vm1299_vm3, %vm1299_vm3  ;;  %s8290_s17 = smov 48   ;;  %s9953_s30 = sld [smem:[#allocation21_spill]] }
  0xc2   :  { %6974 = vmatprep.mubr.msk.f32.mxu0 %vm909_vm1, %v894_v63  ;;  %v1049_v35 = vld [vmem:[%s8309_s9 + $0x30] sm:$0xff]  ;;  %s9954_s6 = sld [smem:[#allocation24_spill]]  ;;  %s9956_s28 = sld [smem:[#allocation23_spill]] }
  0xc3   :  { %s9957_s1 = sld [smem:[#allocation25_spill]]  ;;  %s9958_s2 = sld [smem:[#allocation26_spill]] }
  0xc4   :  { %7369 = vmatpush3.bf16.msra.mxu1 %v6589_v38  ;;  %s9959_s7 = sld [smem:[#allocation27_spill]]  ;;  %s9960_s10 = sld [smem:[#allocation30_spill]] }
  0xc5   :  { %6975 = vmatmul.mubr.msk.f32.gmra.mrb[2].mxu0 %vm909_vm1, %v895_v55  ;;  %s9961_s11 = sld [smem:[#allocation28_spill]]  ;;  %s9962_s15 = sld [smem:[#allocation29_spill]] }
  0xc6   :  { %6977 = vmatprep.mubr.msk.f32.mxu0 %vm909_vm1, %v896_v62  ;;  %v1044_v62 = vld [vmem:[%s8309_s9 + $0x8] sm:$0xff]  ;;  %s9963_s16 = sld [smem:[#allocation31_spill]]  ;;  %s9964_s18 = sld [smem:[#allocation32_spill]] }
  0xc7   :  { %s9965_s22 = sld [smem:[#allocation33_spill]]  ;;  %s8294_s23 = smov 32  }
  0xc9   :  { %6978 = vmatmul.mubr.msk.f32.gmra.mrb[4].mxu0 %vm909_vm1, %v897_v39 }
  0xca   :  { %6980 = vmatprep.mubr.msk.f32.mxu0 %vm909_vm1, %v898_v46 }
  0xcd   :  { %6981 = vmatmul.mubr.msk.f32.gmra.mrb[6].mxu0 %vm909_vm1, %v899_v47 }
 0x194   :  { %v6973_v63 = vpop.f32.mrb[0].mxu0 }
 0x195   :  { %v1010_v55 = vadd.f32 %v6973_v63, %v6319_v54  ;;  %v1004_v53 = vpop.f32.mrb[1].mxu0 }
 0x196   :  { %v1005_v61 = vadd.f32 %v6319_v54, %v1004_v53 }
 0x197   :  { %v8851_v52 = vadd.f32 %v1044_v62, %v1010_v55 }
 0x198   :  { %v6976_v39 = vpop.f32.mrb[2].mxu0  ;;  %v8849_v46 = vadd.f32 %v1043_v37, %v1005_v61  ;;  %v1048_v61 = vld [vmem:[%s8309_s9 + $0x28] sm:$0xff] }
 0x199   :  { %v1020_v47 = vadd.f32 %v6976_v39, %v6319_v54  ;;  %v1014_v36 = vpop.f32.mrb[3].mxu0  ;;  %v1047_v39 = vld [vmem:[%s8309_s9 + $0x20] sm:$0xff] }
 0x19a   :  { %v1015_v38 = vadd.f32 %v6319_v54, %v1014_v36  ;;  %6991 = vmatprep.mubr.msk.f32.mxu1 %vm1137_vm2, %v8849_v46 }
 0x19b   :  { %v8856_v63 = vadd.f32 %v1046_v45, %v1020_v47  ;;  %6992 = vmatmul.mubr.msk.f32.vlgmr.msra.gmra.mrb[0].mxu1 %vm1137_vm2, %v8851_v52 }
 0x19c   :  { %v8860_v53 = vadd.f32 %v1045_v60, %v1015_v38  ;;  %v6979_v37 = vpop.f32.mrb[4].mxu0  ;;  %v1050_v60 = vld [vmem:[%s8309_s9 + $0x38] sm:$0xff]  ;;  %s8288_s9 = smov 80  }
 0x19d   :  { %v1030_v55 = vadd.f32 %v6979_v37, %v6319_v54  ;;  %v1024_v62 = vpop.f32.mrb[5].mxu0 }
 0x19e   :  { %6994 = vmatprep.mubr.msk.f32.mxu1 %vm1137_vm2, %v8860_v53  ;;  %v1025_v36 = vadd.f32 %v6319_v54, %v1024_v62 }
 0x19f   :  { %6995 = vmatmul.mubr.msk.f32.gmra.mrb[2].mxu1 %vm1137_vm2, %v8856_v63  ;;  %v8868_v45 = vadd.f32 %v1048_v61, %v1030_v55 }
 0x1a0   :  { %v8870_v47 = vadd.f32 %v1047_v39, %v1025_v36  ;;  %v6982_v44 = vpop.f32.mrb[6].mxu0 }
 0x1a1   :  { %v1040_v38 = vadd.f32 %v6982_v44, %v6319_v54  ;;  %v1034_v51 = vpop.f32.mrb[7].mxu0  ;;  %v6329_v44 = vld [vmem:[%s8329_s25] ss:$0 sm:$0xff]  ;;  %s9946_s25 = sld [smem:[#allocation14_spill]] }
 0x1a2   :  { %6997 = vmatprep.mubr.msk.f32.mxu1 %vm1137_vm2, %v8870_v47  ;;  %v1035_v37 = vadd.f32 %v6319_v54, %v1034_v51 }
 0x1a3   :  { %6998 = vmatmul.mubr.msk.f32.gmra.mrb[4].mxu1 %vm1137_vm2, %v8868_v45  ;;  %v8878_v62 = vadd.f32 %v1050_v60, %v1040_v38 }
 0x1a4   :  { %v8880_v59 = vadd.f32 %v1049_v35, %v1035_v37 }
 0x1a6   :  { %7000 = vmatprep.mubr.msk.f32.mxu1 %vm1137_vm2, %v8880_v59 }
 0x1a7   :  { %7001 = vmatmul.mubr.msk.f32.gmra.mrb[6].mxu1 %vm1137_vm2, %v8878_v62 }
 0x26e   :  { %v6993_v61 = vpop.f32.mrb[0].mxu1 }
 0x26f   :  { %v8887_v55 = vadd.f32 %v6993_v61, %v6329_v44  ;;  %v1228_v39 = vpop.f32.mrb[1].mxu1 }
 0x270   :  { %v8889_v51 = vadd.f32 %v6329_v44, %v1228_v39 }
 0x272   :  { %7019 = vmatprep.mubr.msk.f32.mxu0 %vm1299_vm3, %v8889_v51  ;;  %v6996_v54 = vpop.f32.mrb[2].mxu1  ;;  %v8895_v35 = vpack.i.bf16 %v8887_v55, %v8889_v51 }
 0x273   :  { %v8897_v36 = vadd.f32 %v6996_v54, %v6329_v44  ;;  %v1238_v60 = vpop.f32.mrb[3].mxu1 }
 0x274   :  { %v8899_v38 = vadd.f32 %v6329_v44, %v1238_v60  ;;  %7922 = vrot.lane.b32.xlu0 %v8895_v35, %s8285_s0 }
 0x276   :  { %v8905_v37 = vpack.i.bf16 %v8897_v36, %v8899_v38  ;;  %v6999_v61 = vpop.f32.mrb[4].mxu1 }
 0x277   :  { %v8907_v39 = vadd.f32 %v6999_v61, %v6329_v44  ;;  %v1248_v43 = vpop.f32.mrb[5].mxu1 }
 0x278   :  { %7927 = vrot.lane.b32.xlu0 %v8905_v37, %s8285_s0  ;;  %v8911_v54 = vadd.f32 %v6329_v44, %v1248_v43 }
 0x27a   :  { %v8915_v60 = vpack.i.bf16 %v8907_v39, %v8911_v54  ;;  %v7002_v50 = vpop.f32.mrb[6].mxu1 }
 0x27b   :  { %v8917_v34 = vadd.f32 %v7002_v50, %v6329_v44  ;;  %v1258_v58 = vpop.f32.mrb[7].mxu1 }
 0x27c   :  { %7932 = vrot.lane.b32.xlu1 %v8915_v60, %s8285_s0  ;;  %v8921_v42 = vadd.f32 %v6329_v44, %v1258_v58 }
 0x27e   :  { %v8925_v61 = vpack.i.bf16 %v8917_v34, %v8921_v42 }
 0x280   :  { %7937 = vrot.lane.b32.xlu1 %v8925_v61, %s8285_s0 }
 0x2e6   :  { %v7923_v43 = vpop.permute.xlu0 %7922 }
 0x2e7   :  { %v7925_v49 = vunpack.i.h.bf16 %v7923_v43  ;;  %v7924_v33 = vunpack.i.l.bf16 %v7923_v43 }
 0x2e9   :  { %v7370_v57 = vpack.c.bf16 %v7925_v49, %v7924_v33 }
 0x2ea   :  { %v7928_v41 = vpop.permute.xlu0 %7927 }
 0x2eb   :  { %v7930_v58 = vunpack.i.h.bf16 %v7928_v41  ;;  %v7929_v44 = vunpack.i.l.bf16 %v7928_v41  ;;  %7372 = vmatprep.subr.msk.bf16.mxu0 %vm8931_vm4, %v7370_v57 }
 0x2ec   :  { %7375 = vmatpush3.bf16.xpose.msk.msra.mxu0 %vm8931_vm4, %v7370_v57 }
 0x2ed   :  { %v7376_v48 = vpack.c.bf16 %v7930_v58, %v7929_v44 }
 0x2ee   :  { %v7933_v32 = vpop.permute.xlu1 %7932 }
 0x2ef   :  { %7378 = vmatprep.subr.msk.bf16.mxu0 %vm8931_vm4, %v7376_v48  ;;  %v7935_v43 = vunpack.i.h.bf16 %v7933_v32  ;;  %v7934_v56 = vunpack.i.l.bf16 %v7933_v32 }
 0x2f1   :  { %v7382_v40 = vpack.c.bf16 %v7935_v43, %v7934_v56 }
 0x2f2   :  { %v7938_v23 = vpop.permute.xlu1 %7937 }
 0x2f3   :  { %v7940_v33 = vunpack.i.h.bf16 %v7938_v23  ;;  %v7939_v41 = vunpack.i.l.bf16 %v7938_v23  ;;  %v1059_v23 = vlaneseq }
 0x2f4   :  { %7381 = vmatpush3.bf16.xpose.msk.msra.mxu0 %vm8931_vm4, %v7376_v48 }
 0x2f5   :  { %7384 = vmatprep.subr.msk.bf16.mxu0 %vm8931_vm4, %v7382_v40  ;;  %v7388_v49 = vpack.c.bf16 %v7940_v33, %v7939_v41  ;;  %v1077_v32 = vand.u32 127, %v1059_v23  ;;  %v8965_v48 = vshrl.u32 %v1059_v23, 7 }
 0x2f7   :  { %9941 = vst [vmem:[#allocation95_spill] sm:$0xff] %v8965_v48  ;;  %v1066_v57 = vadd.s32 48, %v8965_v48  ;;  %v1061_v23 = vadd.s32 8, %v8965_v48  ;;  %v1068_v31 = vcvt.s32.f32 %v8965_v48  ;;  %v1065_v22 = vadd.s32 40, %v8965_v48 }
 0x2f9   :  { %v1074_v58 = vcvt.s32.f32 %v1066_v57 }
 0x2fb   :  { %v1085_v43 = vadd.f32 0.5, %v1074_v58  ;;  %v1062_v58 = vadd.s32 16, %v8965_v48 }
 0x2fc   :  { %7387 = vmatpush3.bf16.xpose.msk.msra.mxu0 %vm8931_vm4, %v7382_v40  ;;  %v1078_v40 = vcvt.s32.f32 %v1077_v32  ;;  %v1069_v32 = vcvt.s32.f32 %v1061_v23 }
 0x2fd   :  { %7390 = vmatprep.subr.msk.bf16.mxu0 %vm8931_vm4, %v7388_v49  ;;  %v1093_v33 = vmul.f32 0.125, %v1085_v43 }
 0x2fe   :  { %v8967_v56 = vadd.f32 0.5, %v1078_v40  ;;  %v1063_v40 = vadd.s32 24, %v8965_v48  ;;  %v8981_v57 = vadd.f32 0.5, %v1069_v32  ;;  %v1073_v32 = vcvt.s32.f32 %v1065_v22 }
 0x300   :  { %v1104_v44 = vmul.f32 0.125, %v8967_v56  ;;  %v1071_v15 = vcvt.s32.f32 %v1063_v40  ;;  %v1088_v43 = vmul.f32 0.125, %v8981_v57  ;;  %v1067_v40 = vadd.s32 56, %v8965_v48 }
 0x301   :  { %v1084_v5 = vadd.f32 0.5, %v1073_v32 }
 0x302   :  { %v8971_v41 = vfloor.f32 %v1104_v44  ;;  %v8984_v44 = vadd.f32 0.5, %v1068_v31  ;;  %v1096_v6 = vfloor.f32 %v1088_v43 }
 0x304   :  { %7393 = vmatpush3.bf16.xpose.msk.msra.mxu0 %vm8931_vm4, %v7388_v49  ;;  %v1101_v49 = vfloor.f32 %v1093_v33  ;;  %v8987_v33 = vadd.f32 0.5, %v1071_v15  ;;  %v1087_v23 = vmul.f32 0.125, %v8984_v44  ;;  %vm1107_vm6 = vcmp.eq.f32.partialorder %v1096_v6, %v8971_v41 }
 0x305   :  { %v8999_v43 = vsel %vm1107_vm6, 0.0, %v9853_v29 }
 0x306   :  { %vm8974_vm5 = vcmp.eq.f32.partialorder %v1101_v49, %v8971_v41  ;;  %v1070_v49 = vcvt.s32.f32 %v1062_v58  ;;  %v1090_v30 = vmul.f32 0.125, %v8987_v33  ;;  %v1095_v21 = vfloor.f32 %v1087_v23 }
 0x307   :  { %v1075_v58 = vcvt.s32.f32 %v1067_v40 }
 0x308   :  { %v8992_v14 = vadd.f32 0.5, %v1070_v49  ;;  %v1098_v31 = vfloor.f32 %v1090_v30  ;;  %vm1106_vm7 = vcmp.eq.f32.partialorder %v1095_v21, %v8971_v41  ;;  %v1092_v49 = vmul.f32 0.125, %v1084_v5 }
 0x309   :  { %v1086_v20 = vadd.f32 0.5, %v1075_v58  ;;  %v9003_v6 = vsel %vm1106_vm7, 0.0, %v9853_v29 }
 0x30a   :  { %v1089_v15 = vmul.f32 0.125, %v8992_v14  ;;  %vm1109_vm8 = vcmp.eq.f32.partialorder %v1098_v31, %v8971_v41  ;;  %v1100_v5 = vfloor.f32 %v1092_v49 }
 0x30b   :  { %7020 = vmatmul.mubr.msk.f32.vlgmr.msra.gmra.mrb[8].mxu0 %vm1299_vm3, %v8887_v55  ;;  %v9009_v21 = vsel %vm1109_vm8, 0.0, %v9853_v29  ;;  %v1094_v31 = vmul.f32 0.125, %v1086_v20 }
 0x30c   :  { %7022 = vmatprep.mubr.msk.f32.mxu0 %vm1299_vm3, %v8899_v38  ;;  %v1097_v22 = vfloor.f32 %v1089_v15  ;;  %vm1111_vm11 = vcmp.eq.f32.partialorder %v1100_v5, %v8971_v41 }
 0x30d   :  { %v1102_v20 = vfloor.f32 %v1094_v31 }
 0x30e   :  { %vm1108_vm10 = vcmp.eq.f32.partialorder %v1097_v22, %v8971_v41 }
 0x30f   :  { %7023 = vmatmul.mubr.msk.f32.gmra.mrb[10].mxu0 %vm1299_vm3, %v8897_v36  ;;  %v9020_v19 = vsel %vm1108_vm10, 0.0, %v9944_v12  ;;  %vm1113_vm12 = vcmp.eq.f32.partialorder %v1102_v20, %v8971_v41  ;;  %v1064_v20 = vadd.s32 32, %v8965_v48 }
 0x310   :  { %7025 = vmatprep.mubr.msk.f32.mxu0 %vm1299_vm3, %v8911_v54  ;;  %v9033_v31 = vsel %vm1113_vm12, 0.0, %v9944_v12 }
 0x313   :  { %7026 = vmatmul.mubr.msk.f32.gmra.mrb[12].mxu0 %vm1299_vm3, %v8907_v39 }
 0x314   :  { %7028 = vmatprep.mubr.msk.f32.mxu0 %vm1299_vm3, %v8921_v42 }
 0x317   :  { %7029 = vmatmul.mubr.msk.f32.gmra.mrb[14].mxu0 %vm1299_vm3, %v8917_v34 }
 0x3de   :  { %v7021_v13 = vpop.f32.mrb[8].mxu0 }
 0x3df   :  { %v1438_v23 = vmul.f32 0.25, %v7021_v13  ;;  %v1398_v4 = vpop.f32.mrb[9].mxu0 }
 0x3e0   :  { %v1437_v30 = vmul.f32 0.25, %v1398_v4 }
 0x3e1   :  { %v9006_v32 = vadd.f32 %v1438_v23, %v8999_v43 }
 0x3e2   :  { %v7024_v40 = vpop.f32.mrb[10].mxu0  ;;  %v1445_v28 = vadd.f32 %v1437_v30, %v9003_v6 }
 0x3e3   :  { %v1440_v13 = vmul.f32 0.25, %v7024_v40  ;;  %v1408_v15 = vpop.f32.mrb[11].mxu0  ;;  %v1457_v58 = vsel %vm1453_vm9, %v9006_v32, -inf }
 0x3e4   :  { %v1439_v4 = vmul.f32 0.25, %v1408_v15  ;;  %1458 = vmax.xlane.f32.xlu1 %v1457_v58  ;;  %v1454_v23 = vsel %vm1453_vm9, %v1445_v28, -inf  ;;  %v9027_v58 = vsel %vm1111_vm11, 0.0, %v9944_v12 }
 0x3e5   :  { %1455 = vmax.xlane.f32.xlu0 %v1454_v23  ;;  %v9017_v29 = vadd.f32 %v1440_v13, %v9009_v21 }
 0x3e6   :  { %v7027_v30 = vpop.f32.mrb[12].mxu0  ;;  %v1447_v15 = vadd.f32 %v1439_v4, %v9020_v19 }
 0x3e7   :  { %v1418_v22 = vpop.f32.mrb[13].mxu0  ;;  %v1463_v49 = vsel %vm1453_vm9, %v9017_v29, -inf  ;;  %v1442_v40 = vmul.f32 0.25, %v7027_v30 }
 0x3e8   :  { %v1460_v27 = vsel %vm1453_vm9, %v1447_v15, -inf }
 0x3e9   :  { %1464 = vmax.xlane.f32.xlu0 %v1463_v49  ;;  %v1450_v5 = vadd.f32 %v1442_v40, %v9027_v58 }
 0x3ea   :  { %v7030_v13 = vpop.f32.mrb[14].mxu0 }
 0x3eb   :  { %v1428_v23 = vpop.f32.mrb[15].mxu0  ;;  %v1444_v3 = vmul.f32 0.25, %v7030_v13  ;;  %v1469_v30 = vsel %vm1453_vm9, %v1450_v5, -inf }
 0x3ed   :  { %1461 = vmax.xlane.f32.xlu0 %v1460_v27  ;;  %v9037_v4 = vadd.f32 %v1444_v3, %v9033_v31  ;;  %v1072_v27 = vcvt.s32.f32 %v1064_v20  ;;  %v1441_v3 = vmul.f32 0.25, %v1418_v22  ;;  %v9057_v20 = vsel %vm8974_vm5, 0.0, %v9944_v12 }
 0x3ef   :  { %v1475_v49 = vsel %vm1453_vm9, %v9037_v4, -inf  ;;  %v1083_v40 = vadd.f32 0.5, %v1072_v27 }
 0x3f1   :  { %1470 = vmax.xlane.f32.xlu0 %v1469_v30  ;;  %v1091_v13 = vmul.f32 0.125, %v1083_v40 }
 0x3f3   :  { %v1099_v11 = vfloor.f32 %v1091_v13 }
 0x3f5   :  { %7942 = vrot.lane.b32.xlu1 %v8895_v35, %s8287_s5  ;;  %1476 = vmax.xlane.f32.xlu0 %v1475_v49  ;;  %vm1110_vm13 = vcmp.eq.f32.partialorder %v1099_v11, %v8971_v41  ;;  %v1443_v49 = vmul.f32 0.25, %v1428_v23 }
 0x3f6   :  { %v9048_v30 = vsel %vm1110_vm13, 0.0, %v9944_v12 }
 0x3f7   :  { %v1449_v18 = vadd.f32 %v1441_v3, %v9048_v30  ;;  %v9060_v11 = vadd.f32 %v1443_v49, %v9057_v20 }
 0x3f9   :  { %v1466_v2 = vsel %vm1453_vm9, %v1449_v18, -inf  ;;  %v1472_v41 = vsel %vm1453_vm9, %v9060_v11, -inf }
 0x40b   :  { %7947 = vrot.lane.b32.xlu0 %v8905_v37, %s8287_s5 }
 0x419   :  { %1467 = vmax.xlane.f32.xlu1 %v1466_v2 }
 0x42a   :  { %7952 = vrot.lane.b32.xlu1 %v8915_v60, %s8287_s5 }
 0x44e   :  { %1473 = vmax.xlane.f32.xlu1 %v1472_v41 }
 0x45f   :  { %7957 = vrot.lane.b32.xlu1 %v8925_v61, %s8287_s5 }
 0x471   :  { %v1459_v2 = vpop.xlane.xlu1 %1458 }
 0x472   :  { %v1479_v22 = vsub.f32 %v9006_v32, %v1459_v2  ;;  %v1456_v27 = vpop.xlane.xlu0 %1455 }
 0x473   :  { %v1478_v23 = vsub.f32 %v1445_v28, %v1456_v27 }
 0x474   :  { %v1488_v40 = vmul.f32 1.442695, %v1479_v22 }
 0x475   :  { %v1486_v13 = vmul.f32 1.442695, %v1478_v23  ;;  %v7943_v7 = vpop.permute.xlu1 %7942 }
 0x476   :  { %8061 = vpow2.f32 %v1488_v40  ;;  %v7945_v3 = vunpack.i.h.bf16 %v7943_v7  ;;  %v7944_v48 = vunpack.i.l.bf16 %v7943_v7  ;;  %v1465_v49 = vpop.xlane.xlu0 %1464 }
 0x477   :  { %8063 = vpow2.f32 %v1486_v13  ;;  %v1481_v40 = vsub.f32 %v9017_v29, %v1465_v49 }
 0x478   :  { %v7394_v26 = vpack.c.bf16 %v7945_v3, %v7944_v48 }
 0x479   :  { %v1492_v7 = vmul.f32 1.442695, %v1481_v40 }
 0x47a   :  { %7395 = vmatprep.subr.bf16.mxu1 %v7394_v26  ;;  %v1462_v10 = vpop.xlane.xlu0 %1461 }
 0x47b   :  { %v1480_v41 = vsub.f32 %v1447_v15, %v1462_v10  ;;  %7397 = vmatpush3.bf16.msra.mxu1 %v7394_v26 }
 0x47d   :  { %v1490_v17 = vmul.f32 1.442695, %v1480_v41 }
 0x47e   :  { %v1471_v1 = vpop.xlane.xlu0 %1470 }
 0x47f   :  { %8065 = vpow2.f32 %v1490_v17  ;;  %v1483_v25 = vsub.f32 %v1450_v5, %v1471_v1 }
 0x480   :  { %v9067_v32 = vpop.eup %8061 }
 0x481   :  { %v9069_v28 = vpop.eup %8063  ;;  %v1496_v2 = vmul.f32 1.442695, %v1483_v25  ;;  %v1505_v22 = vsel %vm1453_vm9, %v9067_v32, 0.0 }
 0x482   :  { %1506 = vadd.xlane.f32.xlu0 %v1505_v22  ;;  %v1477_v27 = vpop.xlane.xlu0 %1476  ;;  %v1502_v48 = vsel %vm1453_vm9, %v9069_v28, 0.0 }
 0x483   :  { %8067 = vpow2.f32 %v1496_v2  ;;  %1503 = vadd.xlane.f32.xlu1 %v1502_v48  ;;  %v1485_v13 = vsub.f32 %v9037_v4, %v1477_v27 }
 0x484   :  { %8069 = vpow2.f32 %v1492_v7 }
 0x485   :  { %v1500_v2 = vmul.f32 1.442695, %v1485_v13 }
 0x486   :  { %v7948_v10 = vpop.permute.xlu0 %7947 }
 0x487   :  { %v7950_v26 = vunpack.i.h.bf16 %v7948_v10  ;;  %v7949_v15 = vunpack.i.l.bf16 %v7948_v10 }
 0x489   :  { %v9075_v17 = vpop.eup %8065  ;;  %v7398_v1 = vpack.c.bf16 %v7950_v26, %v7949_v15 }
 0x48a   :  { %v1508_v5 = vsel %vm1453_vm9, %v9075_v17, 0.0 }
 0x48b   :  { %1509 = vadd.xlane.f32.xlu0 %v1508_v5  ;;  %7399 = vmatprep.subr.bf16.mxu1 %v7398_v1 }
 0x48c   :  { %7401 = vmatpush3.bf16.msra.mxu1 %v7398_v1 }
 0x48d   :  { %v9079_v25 = vpop.eup %8067 }
 0x48e   :  { %v1517_v23 = vsel %vm1453_vm9, %v9079_v25, 0.0  ;;  %v9087_v1 = vpop.eup %8069 }
 0x48f   :  { %1518 = vadd.xlane.f32.xlu0 %v1517_v23 }
 0x494   :  { %7962 = vrot.lane.b32.xlu1 %v8895_v35, %s8288_s9 }
 0x4a6   :  { %v1468_v3 = vpop.xlane.xlu1 %1467 }
 0x4a7   :  { %v1482_v41 = vsub.f32 %v1449_v18, %v1468_v3  ;;  %v1511_v18 = vsel %vm1453_vm9, %v9087_v1, 0.0 }
 0x4a9   :  { %v1494_v22 = vmul.f32 1.442695, %v1482_v41 }
 0x4aa   :  { %v7953_v48 = vpop.permute.xlu1 %7952 }
 0x4ab   :  { %8071 = vpow2.f32 %v1494_v22  ;;  %v7955_v10 = vunpack.i.h.bf16 %v7953_v48  ;;  %v7954_v26 = vunpack.i.l.bf16 %v7953_v48 }
 0x4ac   :  { %8073 = vpow2.f32 %v1500_v2 }
 0x4ad   :  { %v7402_v15 = vpack.c.bf16 %v7955_v10, %v7954_v26 }
 0x4af   :  { %7403 = vmatprep.subr.bf16.mxu1 %v7402_v15 }
 0x4b0   :  { %7405 = vmatpush3.bf16.msra.mxu1 %v7402_v15 }
 0x4b5   :  { %v9089_v5 = vpop.eup %8071 }
 0x4b6   :  { %v1514_v29 = vsel %vm1453_vm9, %v9089_v5, 0.0  ;;  %v9093_v4 = vpop.eup %8073 }
 0x4b7   :  { %1515 = vadd.xlane.f32.xlu0 %v1514_v29  ;;  %v1523_v49 = vsel %vm1453_vm9, %v9093_v4, 0.0 }
 0x4b8   :  { %1512 = vadd.xlane.f32.xlu1 %v1511_v18 }
 0x4bb   :  { %1524 = vadd.xlane.f32.xlu0 %v1523_v49 }
 0x4c9   :  { %7972 = vrot.lane.b32.xlu1 %v8915_v60, %s8288_s9 }
 0x4cd   :  { %7977 = vrot.lane.b32.xlu1 %v8925_v61, %s8288_s9 }
 0x4d1   :  { %1695 = vrot.lane.b32.xlu1 %v8889_v51, %s8289_s13 }
 0x4d5   :  { %1697 = vrot.lane.b32.xlu1 %v8887_v55, %s8289_s13 }
 0x4d9   :  { %1701 = vrot.lane.b32.xlu1 %v8897_v36, %s8289_s13 }
 0x4db   :  { %v1474_v27 = vpop.xlane.xlu1 %1473 }
 0x4dc   :  { %v1484_v23 = vsub.f32 %v9060_v11, %v1474_v27 }
 0x4dd   :  { %1705 = vrot.lane.b32.xlu1 %v8907_v39, %s8289_s13 }
 0x4de   :  { %v1498_v40 = vmul.f32 1.442695, %v1484_v23 }
 0x4df   :  { %v7958_v13 = vpop.permute.xlu1 %7957 }
 0x4e0   :  { %8075 = vpow2.f32 %v1498_v40  ;;  %v7960_v7 = vunpack.i.h.bf16 %v7958_v13  ;;  %v7959_v3 = vunpack.i.l.bf16 %v7958_v13 }
 0x4e1   :  { %1709 = vrot.lane.b32.xlu1 %v8917_v34, %s8289_s13 }
 0x4e2   :  { %v7406_v51 = vpack.c.bf16 %v7960_v7, %v7959_v3 }
 0x4e4   :  { %7407 = vmatprep.subr.bf16.mxu1 %v7406_v51 }
 0x4e5   :  { %7409 = vmatpush3.bf16.msra.mxu1 %v7406_v51 }
 0x4ea   :  { %v8076_v55 = vpop.eup %8075 }
 0x4eb   :  { %v1520_v36 = vsel %vm1453_vm9, %v8076_v55, 0.0 }
 0x4ec   :  { %1521 = vadd.xlane.f32.xlu0 %v1520_v36 }
 0x502   :  { %7967 = vrot.lane.b32.xlu0 %v8905_v37, %s8288_s9 }
 0x506   :  { %1699 = vrot.lane.b32.xlu0 %v8899_v38, %s8289_s13 }
 0x50a   :  { %1703 = vrot.lane.b32.xlu0 %v8911_v54, %s8289_s13 }
 0x50e   :  { %1707 = vrot.lane.b32.xlu0 %v8921_v42, %s8289_s13 }
 0x50f   :  { %v1507_v34 = vpop.xlane.xlu0 %1506 }
 0x510   :  { %8077 = vrcp.f32 %v1507_v34  ;;  %v1504_v39 = vpop.xlane.xlu1 %1503 }
 0x511   :  { %8079 = vrcp.f32 %v1504_v39 }
 0x514   :  { %v7963_v11 = vpop.permute.xlu1 %7962 }
 0x515   :  { %v7965_v41 = vunpack.i.h.bf16 %v7963_v11  ;;  %v7964_v2 = vunpack.i.l.bf16 %v7963_v11 }
 0x517   :  { %v7410_v22 = vpack.c.bf16 %v7965_v41, %v7964_v2 }
 0x518   :  { %v1510_v48 = vpop.xlane.xlu0 %1509 }
 0x519   :  { %8081 = vrcp.f32 %v1510_v48  ;;  %7412 = vmatprep.subr.msk.bf16.mxu1 %vm8931_vm4, %v7410_v22 }
 0x51a   :  { %v8078_v38 = vpop.eup %8077 }
 0x51b   :  { %v8080_v10 = vpop.eup %8079  ;;  %v1535_v26 = vmul.f32 %v8078_v38, %v9067_v32 }
 0x51c   :  { %v1534_v54 = vmul.f32 %v8080_v10, %v9069_v28  ;;  %v1519_v29 = vpop.xlane.xlu0 %1518 }
 0x51e   :  { %7047 = vmatprep.mubr.msk.f32.mxu1 %vm1453_vm9, %v1534_v54 }
 0x51f   :  { %7048 = vmatmul.mubr.msk.f32.vlgmr.msra.gmra.mrb[8].mxu1 %vm1453_vm9, %v1535_v26 }
 0x520   :  { %7415 = vmatpush3.bf16.xpose.msk.msra.mxu1 %vm8931_vm4, %v7410_v22 }
 0x523   :  { %v8082_v42 = vpop.eup %8081 }
 0x524   :  { %v1536_v15 = vmul.f32 %v8082_v42, %v9075_v17 }
 0x526   :  { %7050 = vmatprep.mubr.msk.f32.mxu1 %vm1453_vm9, %v1536_v15 }
 0x544   :  { %v1516_v18 = vpop.xlane.xlu0 %1515 }
 0x545   :  { %8083 = vrcp.f32 %v1516_v18  ;;  %v1513_v49 = vpop.xlane.xlu1 %1512 }
 0x546   :  { %8085 = vrcp.f32 %v1513_v49 }
 0x547   :  { %8087 = vrcp.f32 %v1519_v29 }
 0x548   :  { %v1525_v13 = vpop.xlane.xlu0 %1524 }
 0x549   :  { %8089 = vrcp.f32 %v1525_v13  ;;  %v7973_v3 = vpop.permute.xlu1 %7972 }
 0x54a   :  { %v7975_v36 = vunpack.i.h.bf16 %v7973_v3  ;;  %v7974_v34 = vunpack.i.l.bf16 %v7973_v3 }
 0x54d   :  { %v7978_v41 = vpop.permute.xlu1 %7977 }
 0x54e   :  { %v7980_v48 = vunpack.i.h.bf16 %v7978_v41  ;;  %v7979_v38 = vunpack.i.l.bf16 %v7978_v41 }
 0x54f   :  { %v8084_v28 = vpop.eup %8083 }
 0x550   :  { %v8086_v32 = vpop.eup %8085  ;;  %v1538_v40 = vmul.f32 %v8084_v28, %v9089_v5  ;;  %v7422_v5 = vpack.c.bf16 %v7975_v36, %v7974_v34  ;;  %v7428_v26 = vpack.c.bf16 %v7980_v48, %v7979_v38 }
 0x551   :  { %v1537_v27 = vmul.f32 %v8086_v32, %v9087_v1  ;;  %v8088_v23 = vpop.eup %8087  ;;  %v1696_v54 = vpop.permute.xlu1 %1695 }
 0x552   :  { %v1539_v17 = vmul.f32 %v8088_v23, %v9079_v25 }
 0x553   :  { %7051 = vmatmul.mubr.msk.f32.gmra.mrb[10].mxu1 %vm1453_vm9, %v1537_v27  ;;  %v8090_v2 = vpop.eup %8089 }
 0x554   :  { %7053 = vmatprep.mubr.msk.f32.mxu1 %vm1453_vm9, %v1538_v40  ;;  %v1541_v10 = vmul.f32 %v8090_v2, %v9093_v4 }
 0x555   :  { %v1698_v42 = vpop.permute.xlu1 %1697 }
 0x557   :  { %7054 = vmatmul.mubr.msk.f32.gmra.mrb[12].mxu1 %vm1453_vm9, %v1539_v17 }
 0x559   :  { %v1702_v4 = vpop.permute.xlu1 %1701 }
 0x55d   :  { %v1706_v29 = vpop.permute.xlu1 %1705 }
 0x561   :  { %v1710_v49 = vpop.permute.xlu1 %1709 }
 0x579   :  { %v1522_v7 = vpop.xlane.xlu0 %1521 }
 0x57a   :  { %8091 = vrcp.f32 %v1522_v7 }
 0x57d   :  { %v7968_v51 = vpop.permute.xlu0 %7967 }
 0x57e   :  { %v7970_v1 = vunpack.i.h.bf16 %v7968_v51  ;;  %v7969_v39 = vunpack.i.l.bf16 %v7968_v51 }
 0x580   :  { %v7416_v11 = vpack.c.bf16 %v7970_v1, %v7969_v39 }
 0x582   :  { %7418 = vmatprep.subr.msk.bf16.mxu1 %vm8931_vm4, %v7416_v11 }
 0x583   :  { %7421 = vmatpush3.bf16.xpose.msk.msra.mxu1 %vm8931_vm4, %v7416_v11 }
 0x584   :  { %v8092_v25 = vpop.eup %8091  ;;  %7424 = vmatprep.subr.msk.bf16.mxu1 %vm8931_vm4, %v7422_v5 }
 0x585   :  { %v1540_v22 = vmul.f32 %v8092_v25, %v8076_v55  ;;  %v1700_v55 = vpop.permute.xlu0 %1699 }
 0x587   :  { %7056 = vmatprep.mubr.msk.f32.mxu1 %vm1453_vm9, %v1540_v22 }
 0x588   :  { %7057 = vmatmul.mubr.msk.f32.gmra.mrb[14].mxu1 %vm1453_vm9, %v1541_v10 }
 0x589   :  { %7075 = vmatprep.mubr.msk.f32.mxu1 %vm1299_vm3, %v1696_v54  ;;  %v1704_v15 = vpop.permute.xlu0 %1703 }
 0x58b   :  { %7427 = vmatpush3.bf16.xpose.msk.msra.mxu1 %vm8931_vm4, %v7422_v5 }
 0x58c   :  { %7430 = vmatprep.subr.msk.bf16.mxu1 %vm8931_vm4, %v7428_v26 }
 0x58d   :  { %v1708_v18 = vpop.permute.xlu0 %1707 }
 0x593   :  { %7433 = vmatpush3.bf16.xpose.msk.msra.mxu1 %vm8931_vm4, %v7428_v26 }
 0x59a   :  { %7076 = vmatmul.mubr.msk.f32.vlgmr.msra.gmra.mrb[16].mxu1 %vm1299_vm3, %v1698_v42 }
 0x59b   :  { %7078 = vmatprep.mubr.msk.f32.mxu1 %vm1299_vm3, %v1700_v55 }
 0x59e   :  { %7079 = vmatmul.mubr.msk.f32.gmra.mrb[18].mxu1 %vm1299_vm3, %v1702_v4 }
 0x59f   :  { %7081 = vmatprep.mubr.msk.f32.mxu1 %vm1299_vm3, %v1704_v15 }
 0x5a2   :  { %7082 = vmatmul.mubr.msk.f32.gmra.mrb[20].mxu1 %vm1299_vm3, %v1706_v29 }
 0x5a3   :  { %7084 = vmatprep.mubr.msk.f32.mxu1 %vm1299_vm3, %v1708_v18 }
 0x5a6   :  { %7085 = vmatmul.mubr.msk.f32.gmra.mrb[22].mxu1 %vm1299_vm3, %v1710_v49 }
 0x5f2   :  { %v9162_v28 = vpop.f32.mrb[8].mxu1 }
 0x5f3   :  { %v9164_v32 = vpop.f32.mrb[9].mxu1 }
 0x626   :  { %v9166_v27 = vpop.f32.mrb[10].mxu1 }
 0x627   :  { %v9168_v23 = vpop.f32.mrb[11].mxu1 }
 0x62a   :  { %v9170_v40 = vpop.f32.mrb[12].mxu1 }
 0x62b   :  { %v9172_v17 = vpop.f32.mrb[13].mxu1 }
 0x65b   :  { %v9174_v13 = vpop.f32.mrb[14].mxu1 }
 0x65c   :  { %v9176_v7 = vpop.f32.mrb[15].mxu1 }
 0x66d   :  { %v7077_v3 = vpop.f32.mrb[16].mxu1 }
 0x66e   :  { %v1865_v51 = vmul.f32 0.25, %v7077_v3  ;;  %v1825_v36 = vpop.f32.mrb[17].mxu1 }
 0x66f   :  { %v1864_v34 = vmul.f32 0.25, %v1825_v36 }
 0x670   :  { %v1873_v1 = vadd.f32 %v1865_v51, %v8999_v43 }
 0x671   :  { %v7080_v39 = vpop.f32.mrb[18].mxu1  ;;  %v1872_v11 = vadd.f32 %v1864_v34, %v9003_v6 }
 0x672   :  { %v1867_v5 = vmul.f32 0.25, %v7080_v39  ;;  %v1835_v41 = vpop.f32.mrb[19].mxu1  ;;  %v1883_v2 = vsel %vm1453_vm9, %v1873_v1, -inf }
 0x673   :  { %v1866_v25 = vmul.f32 0.25, %v1835_v41  ;;  %1884 = vmax.xlane.f32.xlu1 %v1883_v2  ;;  %v1880_v22 = vsel %vm1453_vm9, %v1872_v11, -inf }
 0x674   :  { %1881 = vmax.xlane.f32.xlu0 %v1880_v22  ;;  %v1875_v54 = vadd.f32 %v1867_v5, %v9009_v21 }
 0x675   :  { %v7083_v48 = vpop.f32.mrb[20].mxu1  ;;  %v1874_v38 = vadd.f32 %v1866_v25, %v9020_v19 }
 0x676   :  { %v1845_v10 = vpop.f32.mrb[21].mxu1  ;;  %v1869_v26 = vmul.f32 0.25, %v7083_v48  ;;  %v1889_v15 = vsel %vm1453_vm9, %v1875_v54, -inf }
 0x677   :  { %v1868_v43 = vmul.f32 0.25, %v1845_v10  ;;  %v1886_v42 = vsel %vm1453_vm9, %v1874_v38, -inf }
 0x678   :  { %1887 = vmax.xlane.f32.xlu0 %v1886_v42  ;;  %v1877_v19 = vadd.f32 %v1869_v26, %v9027_v58 }
 0x679   :  { %v7086_v6 = vpop.f32.mrb[22].mxu1  ;;  %v1876_v55 = vadd.f32 %v1868_v43, %v9048_v30 }
 0x67a   :  { %v1855_v4 = vpop.f32.mrb[23].mxu1  ;;  %v1871_v29 = vmul.f32 0.25, %v7086_v6  ;;  %v1895_v3 = vsel %vm1453_vm9, %v1877_v19, -inf }
 0x67b   :  { %v1870_v18 = vmul.f32 0.25, %v1855_v4  ;;  %v1892_v49 = vsel %vm1453_vm9, %v1876_v55, -inf }
 0x67c   :  { %1890 = vmax.xlane.f32.xlu0 %v1889_v15  ;;  %1893 = vmax.xlane.f32.xlu1 %v1892_v49  ;;  %v1879_v36 = vadd.f32 %v1871_v29, %v9033_v31 }
 0x67d   :  { %v1878_v21 = vadd.f32 %v1870_v18, %v9057_v20 }
 0x67e   :  { %v1901_v30 = vsel %vm1453_vm9, %v1879_v36, -inf }
 0x67f   :  { %v1898_v51 = vsel %vm1453_vm9, %v1878_v21, -inf }
 0x680   :  { %1896 = vmax.xlane.f32.xlu0 %v1895_v3  ;;  %1899 = vmax.xlane.f32.xlu1 %v1898_v51 }
 0x684   :  { %1902 = vmax.xlane.f32.xlu0 %v1901_v30 }
 0x691   :  { %7982 = vrot.lane.b32.xlu1 %v8895_v35, %s8290_s17 }
 0x700   :  { %v1885_v58 = vpop.xlane.xlu1 %1884 }
 0x701   :  { %v1905_v34 = vsub.f32 %v1873_v1, %v1885_v58  ;;  %v1882_v39 = vpop.xlane.xlu0 %1881 }
 0x702   :  { %v1904_v5 = vsub.f32 %v1872_v11, %v1882_v39 }
 0x703   :  { %v1914_v20 = vmul.f32 1.442695, %v1905_v34 }
 0x704   :  { %v1912_v41 = vmul.f32 1.442695, %v1904_v5 }
 0x705   :  { %8093 = vpow2.f32 %v1914_v20  ;;  %v1888_v2 = vpop.xlane.xlu0 %1887 }
 0x706   :  { %8095 = vpow2.f32 %v1912_v41  ;;  %v1906_v25 = vsub.f32 %v1874_v38, %v1888_v2 }
 0x708   :  { %v1916_v31 = vmul.f32 1.442695, %v1906_v25 }
 0x709   :  { %v1891_v22 = vpop.xlane.xlu0 %1890  ;;  %v1894_v48 = vpop.xlane.xlu1 %1893 }
 0x70a   :  { %8097 = vpow2.f32 %v1916_v31  ;;  %v1907_v10 = vsub.f32 %v1875_v54, %v1891_v22  ;;  %v1908_v26 = vsub.f32 %v1876_v55, %v1894_v48 }
 0x70c   :  { %v1918_v43 = vmul.f32 1.442695, %v1907_v10  ;;  %v1920_v42 = vmul.f32 1.442695, %v1908_v26 }
 0x70d   :  { %v1897_v6 = vpop.xlane.xlu0 %1896  ;;  %v1900_v35 = vpop.xlane.xlu1 %1899 }
 0x70e   :  { %8099 = vpow2.f32 %v1918_v43  ;;  %v1909_v1 = vsub.f32 %v1877_v19, %v1897_v6  ;;  %v1910_v29 = vsub.f32 %v1878_v21, %v1900_v35 }
 0x70f   :  { %v9196_v4 = vpop.eup %8093  ;;  %8101 = vpow2.f32 %v1920_v42 }
 0x710   :  { %v8096_v11 = vpop.eup %8095  ;;  %v1922_v15 = vmul.f32 1.442695, %v1909_v1  ;;  %v1931_v38 = vsel %vm1453_vm9, %v9196_v4, 0.0  ;;  %v1924_v30 = vmul.f32 1.442695, %v1910_v29 }
 0x711   :  { %1932 = vadd.xlane.f32.xlu0 %v1931_v38  ;;  %v1903_v18 = vpop.xlane.xlu0 %1902  ;;  %v7983_v49 = vpop.permute.xlu1 %7982  ;;  %v1928_v54 = vsel %vm1453_vm9, %v8096_v11, 0.0 }
 0x712   :  { %8103 = vpow2.f32 %v1922_v15  ;;  %v1911_v55 = vsub.f32 %v1879_v36, %v1903_v18  ;;  %v7985_v3 = vunpack.i.h.bf16 %v7983_v49  ;;  %v7984_v51 = vunpack.i.l.bf16 %v7983_v49  ;;  %1929 = vadd.xlane.f32.xlu1 %v1928_v54 }
 0x714   :  { %v9201_v19 = vpop.eup %8097  ;;  %v1926_v58 = vmul.f32 1.442695, %v1911_v55  ;;  %v7434_v34 = vpack.c.bf16 %v7985_v3, %v7984_v51 }
 0x715   :  { %v1934_v21 = vsel %vm1453_vm9, %v9201_v19, 0.0 }
 0x716   :  { %8105 = vpow2.f32 %v1926_v58  ;;  %1935 = vadd.xlane.f32.xlu1 %v1934_v21  ;;  %7435 = vmatprep.subr.bf16.mxu0 %v7434_v34  ;;  %v6590_v21 = vld [vmem:[%s8334_s29 + $0x8] sm:$0xff]  }
 0x717   :  { %7437 = vmatpush3.bf16.msra.mxu0 %v7434_v34  ;;  %8107 = vpow2.f32 %v1924_v30 }
 0x718   :  { %v9205_v39 = vpop.eup %8099 }
 0x719   :  { %v9207_v5 = vpop.eup %8101  ;;  %v1937_v36 = vsel %vm1453_vm9, %v9205_v39, 0.0 }
 0x71a   :  { %1938 = vadd.xlane.f32.xlu0 %v1937_v36  ;;  %v1940_v20 = vsel %vm1453_vm9, %v9207_v5, 0.0 }
 0x71b   :  { %1941 = vadd.xlane.f32.xlu1 %v1940_v20 }
 0x71c   :  { %v9213_v41 = vpop.eup %8103 }
 0x71d   :  { %v1943_v2 = vsel %vm1453_vm9, %v9213_v41, 0.0 }
 0x71e   :  { %1944 = vadd.xlane.f32.xlu0 %v1943_v2 }
 0x720   :  { %v9217_v25 = vpop.eup %8105 }
 0x721   :  { %v1949_v31 = vsel %vm1453_vm9, %v9217_v25, 0.0  ;;  %v9221_v22 = vpop.eup %8107 }
 0x722   :  { %1950 = vadd.xlane.f32.xlu0 %v1949_v31  ;;  %v1946_v48 = vsel %vm1453_vm9, %v9221_v22, 0.0 }
 0x726   :  { %1947 = vadd.xlane.f32.xlu0 %v1946_v48 }
 0x72c   :  { %7992 = vrot.lane.b32.xlu1 %v8915_v60, %s8290_s17 }
 0x730   :  { %7997 = vrot.lane.b32.xlu1 %v8925_v61, %s8290_s17 }
 0x73c   :  { %7987 = vrot.lane.b32.xlu0 %v8905_v37, %s8290_s17 }
 0x79e   :  { %v1933_v26 = vpop.xlane.xlu0 %1932 }
 0x79f   :  { %v1930_v10 = vpop.xlane.xlu1 %1929 }
 0x7a0   :  { %8109 = vrcp.f32 %v1930_v10 }
 0x7a1   :  { %8111 = vrcp.f32 %v1933_v26 }
 0x7a3   :  { %v1936_v43 = vpop.xlane.xlu1 %1935 }
 0x7a4   :  { %8113 = vrcp.f32 %v1936_v43 }
 0x7a7   :  { %v1939_v42 = vpop.xlane.xlu0 %1938 }
 0x7a8   :  { %v1942_v15 = vpop.xlane.xlu1 %1941  ;;  %8115 = vrcp.f32 %v1939_v42 }
 0x7a9   :  { %8117 = vrcp.f32 %v1942_v15 }
 0x7aa   :  { %v8110_v6 = vpop.eup %8109 }
 0x7ab   :  { %v1945_v35 = vpop.xlane.xlu0 %1944  ;;  %v1960_v1 = vmul.f32 %v8110_v6, %v8096_v11  ;;  %v8112_v34 = vpop.eup %8111 }
 0x7ac   :  { %v7993_v38 = vpop.permute.xlu1 %7992  ;;  %8119 = vrcp.f32 %v1945_v35  ;;  %v1961_v20 = vmul.f32 %v8112_v34, %v9196_v4 }
 0x7ad   :  { %7103 = vmatprep.mubr.msk.f32.mxu0 %vm1453_vm9, %v1960_v1  ;;  %v7995_v49 = vunpack.i.h.bf16 %v7993_v38  ;;  %v7994_v61 = vunpack.i.l.bf16 %v7993_v38 }
 0x7ae   :  { %v8114_v36 = vpop.eup %8113 }
 0x7af   :  { %v1951_v29 = vpop.xlane.xlu0 %1950  ;;  %v7442_v51 = vpack.c.bf16 %v7995_v49, %v7994_v61  ;;  %v1962_v31 = vmul.f32 %v8114_v36, %v9201_v19 }
 0x7b0   :  { %v7998_v37 = vpop.permute.xlu1 %7997 }
 0x7b1   :  { %v8000_v30 = vunpack.i.h.bf16 %v7998_v37  ;;  %v7999_v58 = vunpack.i.l.bf16 %v7998_v37 }
 0x7b2   :  { %v8116_v2 = vpop.eup %8115 }
 0x7b3   :  { %v1948_v60 = vpop.xlane.xlu0 %1947  ;;  %v7446_v11 = vpack.c.bf16 %v8000_v30, %v7999_v58  ;;  %v8118_v48 = vpop.eup %8117  ;;  %v1963_v10 = vmul.f32 %v8116_v2, %v9205_v39  ;;  %v6502_v39 = vld [vmem:[%s8334_s29] sm:$0xff]   ;;  %s9947_s29 = sld [smem:[#allocation15_spill]] }
 0x7b4   :  { %8121 = vrcp.f32 %v1948_v60  ;;  %v1964_v43 = vmul.f32 %v8118_v48, %v9207_v5 }
 0x7b5   :  { %8123 = vrcp.f32 %v1951_v29 }
 0x7b6   :  { %v8120_v26 = vpop.eup %8119 }
 0x7b7   :  { %v7988_v18 = vpop.permute.xlu0 %7987  ;;  %v1965_v4 = vmul.f32 %v8120_v26, %v9213_v41 }
 0x7b8   :  { %v7990_v54 = vunpack.i.h.bf16 %v7988_v18  ;;  %v7989_v55 = vunpack.i.l.bf16 %v7988_v18 }
 0x7ba   :  { %v7438_v3 = vpack.c.bf16 %v7990_v54, %v7989_v55 }
 0x7bc   :  { %7439 = vmatprep.subr.bf16.mxu0 %v7438_v3 }
 0x7bd   :  { %7441 = vmatpush3.bf16.msra.mxu0 %v7438_v3 }
 0x7be   :  { %7443 = vmatprep.subr.bf16.mxu0 %v7442_v51  ;;  %v8122_v42 = vpop.eup %8121 }
 0x7bf   :  { %v8124_v19 = vpop.eup %8123  ;;  %v1966_v6 = vmul.f32 %v8122_v42, %v9221_v22 }
 0x7c0   :  { %v1967_v35 = vmul.f32 %v8124_v19, %v9217_v25 }
 0x7c1   :  { %7445 = vmatpush3.bf16.msra.mxu0 %v7442_v51 }
 0x7c2   :  { %7447 = vmatprep.subr.bf16.mxu0 %v7446_v11 }
 0x7c5   :  { %7449 = vmatpush3.bf16.msra.mxu0 %v7446_v11 }
 0x7c6   :  { %7451 = vmatprep.subr.bf16.mxu0 %v6590_v21 }
 0x7c8   :  { %7104 = vmatmul.mubr.msk.f32.vlgmr.msra.gmra.mrb[16].mxu0 %vm1453_vm9, %v1961_v20 }
 0x7c9   :  { %7106 = vmatprep.mubr.msk.f32.mxu0 %vm1453_vm9, %v1962_v31  ;;  %7453 = vmatpush3.bf16.msra.mxu0 %v6590_v21 }
 0x7ca   :  { %7455 = vmatprep.subr.bf16.mxu0 %v6502_v39 }
 0x7cc   :  { %7107 = vmatmul.mubr.msk.f32.gmra.mrb[18].mxu0 %vm1453_vm9, %v1963_v10 }
 0x7cd   :  { %7109 = vmatprep.mubr.msk.f32.mxu0 %vm1453_vm9, %v1964_v43 }
 0x7d0   :  { %7110 = vmatmul.mubr.msk.f32.gmra.mrb[20].mxu0 %vm1453_vm9, %v1965_v4 }
 0x7d1   :  { %7112 = vmatprep.mubr.msk.f32.mxu0 %vm1453_vm9, %v1966_v6 }
 0x7d4   :  { %7113 = vmatmul.mubr.msk.f32.gmra.mrb[22].mxu0 %vm1453_vm9, %v1967_v35 }
 0x89b   :  { %v7105_v5 = vpop.f32.mrb[16].mxu0 }
 0x89c   :  { %v2082_v1 = vpop.f32.mrb[17].mxu0 }
 0x89d   :  { %7119 = vmatprep.mubr.msk.f32.mxu0 %vm1299_vm3, %v2082_v1 }
 0x89e   :  { %7120 = vmatmul.mubr.msk.f32.vlgmr.msra.gmra.mrb[24].mxu0 %vm1299_vm3, %v7105_v5 }
 0x89f   :  { %v7108_v41 = vpop.f32.mrb[18].mxu0  ;;  %7457 = vmatpush3.bf16.msra.mxu0 %v6502_v39 }
 0x8a0   :  { %v2092_v15 = vpop.f32.mrb[19].mxu0 }
 0x8a1   :  { %7122 = vmatprep.mubr.msk.f32.mxu0 %vm1299_vm3, %v2092_v15 }
 0x8a2   :  { %7123 = vmatmul.mubr.msk.f32.gmra.mrb[26].mxu0 %vm1299_vm3, %v7108_v41 }
 0x8a3   :  { %v7111_v22 = vpop.f32.mrb[20].mxu0 }
 0x8a4   :  { %v2102_v25 = vpop.f32.mrb[21].mxu0 }
 0x8a5   :  { %7125 = vmatprep.mubr.msk.f32.mxu0 %vm1299_vm3, %v2102_v25 }
 0x8a6   :  { %7126 = vmatmul.mubr.msk.f32.gmra.mrb[28].mxu0 %vm1299_vm3, %v7111_v22 }
 0x8a7   :  { %v7114_v29 = vpop.f32.mrb[22].mxu0 }
 0x8a8   :  { %v2112_v38 = vpop.f32.mrb[23].mxu0 }
 0x8a9   :  { %7128 = vmatprep.mubr.msk.f32.mxu0 %vm1299_vm3, %v2112_v38 }
 0x8aa   :  { %7129 = vmatmul.mubr.msk.f32.gmra.mrb[30].mxu0 %vm1299_vm3, %v7114_v29 }
 0x8ab   :  { %7135 = vmatprep.mubr.msk.f32.mxu0 %vm1299_vm3, %v9164_v32  ;;  %v6402_v32 = vld [vmem:[%s8339_s3] ss:$0 sm:$0xff]  ;;  %s9948_s3 = sld [smem:[#allocation16_spill]] }
 0x8ae   :  { %7136 = vmatmul.mubr.msk.f32.vlgmr.msra.gmra.mrb[24].mxu0 %vm1299_vm3, %v9162_v28 }
 0x8af   :  { %7138 = vmatprep.mubr.msk.f32.mxu0 %vm1299_vm3, %v9168_v23 }
 0x8b2   :  { %7139 = vmatmul.mubr.msk.f32.gmra.mrb[26].mxu0 %vm1299_vm3, %v9166_v27 }
 0x8b3   :  { %7141 = vmatprep.mubr.msk.f32.mxu0 %vm1299_vm3, %v9172_v17 }
 0x8b6   :  { %7142 = vmatmul.mubr.msk.f32.gmra.mrb[28].mxu0 %vm1299_vm3, %v9170_v40 }
 0x8b7   :  { %7144 = vmatprep.mubr.msk.f32.mxu0 %vm1299_vm3, %v9176_v7 }
 0x8ba   :  { %7145 = vmatmul.mubr.msk.f32.gmra.mrb[30].mxu0 %vm1299_vm3, %v9174_v13 }
 0x981   :  { %v7137_v28 = vpop.f32.mrb[24].mxu0 }
 0x982   :  { %v2387_v60 = vadd.f32 %v7137_v28, %v6402_v32  ;;  %v2340_v18 = vpop.f32.mrb[25].mxu0 }
 0x983   :  { %v2386_v23 = vadd.f32 %v6402_v32, %v2340_v18 }
 0x984   :  { %v2399_v49 = vsel %vm1137_vm2, %v2387_v60, 0.0 }
 0x985   :  { %2400 = vadd.xlane.f32.xlu0 %v2399_v49  ;;  %v7140_v27 = vpop.f32.mrb[26].mxu0  ;;  %v2396_v17 = vsel %vm1137_vm2, %v2386_v23, 0.0 }
 0x986   :  { %v2389_v61 = vadd.f32 %v7140_v27, %v6402_v32  ;;  %2397 = vadd.xlane.f32.xlu1 %v2396_v17  ;;  %v2350_v40 = vpop.f32.mrb[27].mxu0 }
 0x987   :  { %v2388_v54 = vadd.f32 %v6402_v32, %v2350_v40 }
 0x988   :  { %v2405_v7 = vsel %vm1137_vm2, %v2389_v61, 0.0 }
 0x989   :  { %2406 = vadd.xlane.f32.xlu0 %v2405_v7  ;;  %v7143_v55 = vpop.f32.mrb[28].mxu0  ;;  %v2402_v13 = vsel %vm1137_vm2, %v2388_v54, 0.0 }
 0x98a   :  { %v2391_v37 = vadd.f32 %v7143_v55, %v6402_v32  ;;  %2403 = vadd.xlane.f32.xlu1 %v2402_v13  ;;  %v2360_v3 = vpop.f32.mrb[29].mxu0 }
 0x98b   :  { %v2390_v51 = vadd.f32 %v6402_v32, %v2360_v3 }
 0x98c   :  { %v2411_v30 = vsel %vm1137_vm2, %v2391_v37, 0.0 }
 0x98d   :  { %2412 = vadd.xlane.f32.xlu0 %v2411_v30  ;;  %v7146_v58 = vpop.f32.mrb[30].mxu0  ;;  %v2408_v11 = vsel %vm1137_vm2, %v2390_v51, 0.0 }
 0x98e   :  { %v2393_v34 = vadd.f32 %v7146_v58, %v6402_v32  ;;  %2409 = vadd.xlane.f32.xlu1 %v2408_v11  ;;  %v2370_v21 = vpop.f32.mrb[31].mxu0 }
 0x98f   :  { %v2392_v36 = vadd.f32 %v6402_v32, %v2370_v21  ;;  %v6592_v21 = vld [vmem:[%s8354_s19 + $0x10] sm:$0xff]  }
 0x990   :  { %v2417_v20 = vsel %vm1137_vm2, %v2393_v34, 0.0  ;;  %7459 = vmatprep.subr.bf16.mxu1 %v6592_v21 }
 0x991   :  { %2418 = vadd.xlane.f32.xlu0 %v2417_v20  ;;  %v2414_v2 = vsel %vm1137_vm2, %v2392_v36, 0.0  ;;  %7461 = vmatpush3.bf16.msra.mxu1 %v6592_v21  ;;  %v9324_v20 = vld [vmem:[%s8354_s19] sm:$0xff]  }
 0x992   :  { %2415 = vadd.xlane.f32.xlu1 %v2414_v2 }
 0xa12   :  { %v2401_v31 = vpop.xlane.xlu0 %2400 }
 0xa13   :  { %v2422_v48 = vmul.f32 0.03125, %v2401_v31  ;;  %v2398_v10 = vpop.xlane.xlu1 %2397 }
 0xa14   :  { %v2421_v26 = vmul.f32 0.03125, %v2398_v10 }
 0xa15   :  { %v9281_v43 = vsub.f32 %v2387_v60, %v2422_v48 }
 0xa16   :  { %v9283_v42 = vsub.f32 %v2386_v23, %v2421_v26  ;;  %v2407_v4 = vpop.xlane.xlu0 %2406 }
 0xa17   :  { %v2424_v19 = vmul.f32 0.03125, %v2407_v4  ;;  %v2404_v6 = vpop.xlane.xlu1 %2403  ;;  %v2438_v35 = vmul.f32 %v9281_v43, %v9281_v43 }
 0xa18   :  { %v2423_v39 = vmul.f32 0.03125, %v2404_v6  ;;  %v2437_v5 = vmul.f32 %v9283_v42, %v9283_v42 }
 0xa19   :  { %v9289_v1 = vsub.f32 %v2389_v61, %v2424_v19  ;;  %v2448_v41 = vsel %vm1137_vm2, %v2438_v35, 0.0 }
 0xa1a   :  { %v9292_v15 = vsub.f32 %v2388_v54, %v2423_v39  ;;  %v2413_v22 = vpop.xlane.xlu0 %2412  ;;  %2449 = vadd.xlane.f32.xlu0 %v2448_v41  ;;  %v2445_v25 = vsel %vm1137_vm2, %v2437_v5, 0.0 }
 0xa1b   :  { %v2426_v29 = vmul.f32 0.03125, %v2413_v22  ;;  %v2410_v38 = vpop.xlane.xlu1 %2409  ;;  %2446 = vadd.xlane.f32.xlu1 %v2445_v25  ;;  %v2440_v32 = vmul.f32 %v9289_v1, %v9289_v1 }
 0xa1c   :  { %v2425_v28 = vmul.f32 0.03125, %v2410_v38  ;;  %v2439_v60 = vmul.f32 %v9292_v15, %v9292_v15 }
 0xa1d   :  { %v9299_v18 = vsub.f32 %v2391_v37, %v2426_v29  ;;  %v2454_v23 = vsel %vm1137_vm2, %v2440_v32, 0.0 }
 0xa1e   :  { %v9302_v49 = vsub.f32 %v2390_v51, %v2425_v28  ;;  %2455 = vadd.xlane.f32.xlu0 %v2454_v23  ;;  %v2419_v27 = vpop.xlane.xlu0 %2418  ;;  %v2451_v17 = vsel %vm1137_vm2, %v2439_v60, 0.0 }
 0xa1f   :  { %v2428_v61 = vmul.f32 0.03125, %v2419_v27  ;;  %2452 = vadd.xlane.f32.xlu1 %v2451_v17  ;;  %v2416_v40 = vpop.xlane.xlu1 %2415  ;;  %v2442_v54 = vmul.f32 %v9299_v18, %v9299_v18 }
 0xa20   :  { %v2427_v7 = vmul.f32 0.03125, %v2416_v40  ;;  %v2441_v55 = vmul.f32 %v9302_v49, %v9302_v49  ;;  %v6403_v40 = vld [vmem:[%s8344_s8] ss:$0 sm:$0xff]  ;;  %s9949_s8 = sld [smem:[#allocation17_spill]] }
 0xa21   :  { %v9309_v13 = vsub.f32 %v2393_v34, %v2428_v61  ;;  %v2460_v37 = vsel %vm1137_vm2, %v2442_v54, 0.0 }
 0xa22   :  { %v9312_v3 = vsub.f32 %v2392_v36, %v2427_v7  ;;  %2461 = vadd.xlane.f32.xlu0 %v2460_v37  ;;  %v2457_v51 = vsel %vm1137_vm2, %v2441_v55, 0.0  ;;  %v6593_v36 = vld [vmem:[%s8354_s19 + $0x18] sm:$0xff]  }
 0xa23   :  { %2458 = vadd.xlane.f32.xlu1 %v2457_v51  ;;  %v2444_v30 = vmul.f32 %v9309_v13, %v9309_v13  ;;  %7463 = vmatprep.subr.bf16.mxu1 %v6593_v36  ;;  %v6404_v51 = vld [vmem:[%s8349_s14] ss:$0 sm:$0xff]  ;;  %s9950_s14 = sld [smem:[#allocation20_spill]] }
 0xa24   :  { %v2443_v58 = vmul.f32 %v9312_v3, %v9312_v3  ;;  %7465 = vmatpush3.bf16.msra.mxu1 %v6593_v36 }
 0xa25   :  { %v2466_v11 = vsel %vm1137_vm2, %v2444_v30, 0.0  ;;  %7467 = vmatprep.subr.bf16.mxu1 %v9324_v20 }
 0xa26   :  { %2467 = vadd.xlane.f32.xlu0 %v2466_v11  ;;  %v2463_v34 = vsel %vm1137_vm2, %v2443_v58, 0.0 }
 0xa27   :  { %2464 = vadd.xlane.f32.xlu1 %v2463_v34 }
 0xaa7   :  { %v2450_v2 = vpop.xlane.xlu0 %2449 }
 0xaa8   :  { %v2470_v31 = vmul.f32 0.03125, %v2450_v2  ;;  %v2447_v48 = vpop.xlane.xlu1 %2446 }
 0xaa9   :  { %v2469_v10 = vmul.f32 0.03125, %v2447_v48 }
 0xaaa   :  { %v2478_v26 = vadd.f32 1e-05, %v2470_v31 }
 0xaab   :  { %v2477_v4 = vadd.f32 1e-05, %v2469_v10  ;;  %v2456_v19 = vpop.xlane.xlu0 %2455 }
 0xaac   :  { %8125 = vrsqrt.f32 %v2478_v26  ;;  %v2472_v6 = vmul.f32 0.03125, %v2456_v19  ;;  %v2453_v35 = vpop.xlane.xlu1 %2452 }
 0xaad   :  { %8127 = vrsqrt.f32 %v2477_v4  ;;  %v2471_v39 = vmul.f32 0.03125, %v2453_v35 }
 0xaae   :  { %v2480_v5 = vadd.f32 1e-05, %v2472_v6 }
 0xaaf   :  { %v2479_v41 = vadd.f32 1e-05, %v2471_v39  ;;  %v2462_v22 = vpop.xlane.xlu0 %2461 }
 0xab0   :  { %8129 = vrsqrt.f32 %v2480_v5  ;;  %v2474_v25 = vmul.f32 0.03125, %v2462_v22  ;;  %v2459_v29 = vpop.xlane.xlu1 %2458 }
 0xab1   :  { %8131 = vrsqrt.f32 %v2479_v41  ;;  %v2473_v38 = vmul.f32 0.03125, %v2459_v29 }
 0xab2   :  { %v2482_v32 = vadd.f32 1e-05, %v2474_v25 }
 0xab3   :  { %v2481_v28 = vadd.f32 1e-05, %v2473_v38  ;;  %v2468_v60 = vpop.xlane.xlu0 %2467 }
 0xab4   :  { %8133 = vrsqrt.f32 %v2482_v32  ;;  %v2476_v23 = vmul.f32 0.03125, %v2468_v60  ;;  %v2465_v27 = vpop.xlane.xlu1 %2464 }
 0xab5   :  { %8135 = vrsqrt.f32 %v2481_v28  ;;  %v2475_v17 = vmul.f32 0.03125, %v2465_v27 }
 0xab6   :  { %v8126_v61 = vpop.eup %8125  ;;  %v2484_v54 = vadd.f32 1e-05, %v2476_v23 }
 0xab7   :  { %v8128_v7 = vpop.eup %8127  ;;  %v2494_v55 = vmul.f32 %v8126_v61, %v9281_v43  ;;  %v2483_v37 = vadd.f32 1e-05, %v2475_v17 }
 0xab8   :  { %v2493_v30 = vmul.f32 %v8128_v7, %v9283_v42  ;;  %8137 = vrsqrt.f32 %v2484_v54 }
 0xab9   :  { %v2508_v58 = vmul.f32 %v6403_v40, %v2494_v55  ;;  %8139 = vrsqrt.f32 %v2483_v37 }
 0xaba   :  { %v8130_v11 = vpop.eup %8129  ;;  %v2507_v34 = vmul.f32 %v6403_v40, %v2493_v30 }
 0xabb   :  { %v8132_v21 = vpop.eup %8131  ;;  %v2522_v36 = vadd.f32 %v6404_v51, %v2508_v58  ;;  %v2496_v2 = vmul.f32 %v8130_v11, %v9289_v1 }
 0xabc   :  { %v2521_v31 = vadd.f32 %v6404_v51, %v2507_v34  ;;  %v2495_v48 = vmul.f32 %v8132_v21, %v9292_v15 }
 0xabd   :  { %v2530_v10 = vadd.f32 %v2522_v36, %v8851_v52  ;;  %v2510_v26 = vmul.f32 %v6403_v40, %v2496_v2 }
 0xabe   :  { %v8134_v43 = vpop.eup %8133  ;;  %v2529_v4 = vadd.f32 %v2521_v31, %v8849_v46  ;;  %v2509_v19 = vmul.f32 %v6403_v40, %v2495_v48 }
 0xabf   :  { %v8136_v42 = vpop.eup %8135  ;;  %v2538_v6 = vmax.f32 %v2530_v10, 0.0  ;;  %v2524_v35 = vadd.f32 %v6404_v51, %v2510_v26  ;;  %v2498_v39 = vmul.f32 %v8134_v43, %v9299_v18 }
 0xac0   :  { %v2537_v5 = vmax.f32 %v2529_v4, 0.0  ;;  %v2523_v41 = vadd.f32 %v6404_v51, %v2509_v19  ;;  %v2497_v22 = vmul.f32 %v8136_v42, %v9302_v49 }
 0xac1   :  { %2546 = vst.msk [vmem:[#allocation5 + $0x8] sm:$0xff] %vm1137_vm2, %v2538_v6  ;;  %v2532_v1 = vadd.f32 %v2524_v35, %v8856_v63  ;;  %v2512_v15 = vmul.f32 %v6403_v40, %v2498_v39 }
 0xac2   :  { %v8138_v52 = vpop.eup %8137  ;;  %2545 = vst.msk [vmem:[#allocation5] sm:$0xff] %vm1137_vm2, %v2537_v5  ;;  %v2531_v46 = vadd.f32 %v2523_v41, %v8860_v53  ;;  %v2511_v25 = vmul.f32 %v6403_v40, %v2497_v22 }
 0xac3   :  { %v8140_v29 = vpop.eup %8139  ;;  %v2540_v38 = vmax.f32 %v2532_v1, 0.0  ;;  %v2526_v32 = vadd.f32 %v6404_v51, %v2512_v15  ;;  %v2500_v18 = vmul.f32 %v8138_v52, %v9309_v13 }
 0xac4   :  { %v2539_v28 = vmax.f32 %v2531_v46, 0.0  ;;  %v2525_v60 = vadd.f32 %v6404_v51, %v2511_v25  ;;  %v2499_v49 = vmul.f32 %v8140_v29, %v9312_v3 }
 0xac5   :  { %2548 = vst.msk [vmem:[#allocation5 + $0x18] sm:$0xff] %vm1137_vm2, %v2540_v38  ;;  %v2534_v63 = vadd.f32 %v2526_v32, %v8868_v45  ;;  %v2514_v23 = vmul.f32 %v6403_v40, %v2500_v18 }
 0xac6   :  { %2547 = vst.msk [vmem:[#allocation5 + $0x10] sm:$0xff] %vm1137_vm2, %v2539_v28  ;;  %v2533_v27 = vadd.f32 %v2525_v60, %v8870_v47  ;;  %v2513_v53 = vmul.f32 %v6403_v40, %v2499_v49  ;;  %v6591_v40 = vld [vmem:[%s8354_s19 + $0x8] sm:$0xff]   ;;  %s9951_s19 = sld [smem:[#allocation18_spill]] }
 0xac7   :  { %v2542_v17 = vmax.f32 %v2534_v63, 0.0  ;;  %v2528_v61 = vadd.f32 %v6404_v51, %v2514_v23 }
 0xac8   :  { %v2541_v54 = vmax.f32 %v2533_v27, 0.0  ;;  %v2527_v7 = vadd.f32 %v6404_v51, %v2513_v53  ;;  %v6526_v27 = vld [vmem:[%s8374_s12] sm:$0xff]   ;;  %v6594_v53 = vld [vmem:[%s8374_s12 + $0x8] sm:$0xff]   ;;  %s9955_s12 = sld [smem:[#allocation22_spill]] }
 0xac9   :  { %2550 = vst.msk [vmem:[#allocation5 + $0x28] sm:$0xff] %vm1137_vm2, %v2542_v17  ;;  %v2536_v13 = vadd.f32 %v2528_v61, %v8878_v62  ;;  %v2561_v3 = vld [vmem:[#allocation5 + $0x1] ss:$2 sm:$0xff]  ;;  %v2553_v51 = vld [vmem:[#allocation5] ss:$2 sm:$0xff] }
 0xaca   :  { %2549 = vst.msk [vmem:[#allocation5 + $0x20] sm:$0xff] %vm1137_vm2, %v2541_v54  ;;  %v2535_v45 = vadd.f32 %v2527_v7, %v8880_v59  ;;  %7155 = vmatprep.mubr.msk.f32.mxu1 %vm1137_vm2, %v2561_v3 }
 0xacb   :  { %v2544_v55 = vmax.f32 %v2536_v13, 0.0 }
 0xacc   :  { %v2543_v37 = vmax.f32 %v2535_v45, 0.0 }
 0xacd   :  { %2552 = vst.msk [vmem:[#allocation5 + $0x38] sm:$0xff] %vm1137_vm2, %v2544_v55  ;;  %v2563_v47 = vld [vmem:[#allocation5 + $0x11] ss:$2 sm:$0xff]  ;;  %v2555_v30 = vld [vmem:[#allocation5 + $0x10] ss:$2 sm:$0xff] }
 0xace   :  { %2551 = vst.msk [vmem:[#allocation5 + $0x30] sm:$0xff] %vm1137_vm2, %v2543_v37  ;;  %7156 = vmatmul.mubr.msk.f32.vlgmr.msra.gmra.mrb[24].mxu1 %vm1137_vm2, %v2563_v47 }
 0xacf   :  { %7469 = vmatpush3.bf16.msra.mxu1 %v9324_v20  ;;  %v6413_v20 = vld [vmem:[%s8359_s24] ss:$0 sm:$0xff]  ;;  %s9952_s24 = sld [smem:[#allocation19_spill]] }
 0xad0   :  { %7471 = vmatprep.subr.bf16.mxu1 %v6591_v40 }
 0xad1   :  { %v2565_v62 = vld [vmem:[#allocation5 + $0x21] ss:$2 sm:$0xff]  ;;  %v2557_v58 = vld [vmem:[#allocation5 + $0x20] ss:$2 sm:$0xff] }
 0xad2   :  { %7158 = vmatprep.mubr.msk.f32.mxu1 %vm1137_vm2, %v2565_v62 }
 0xad3   :  { %7473 = vmatpush3.bf16.msra.mxu1 %v6591_v40 }
 0xad4   :  { %7475 = vmatprep.subr.bf16.mxu1 %v6526_v27 }
 0xad5   :  { %v2567_v59 = vld [vmem:[#allocation5 + $0x31] ss:$2 sm:$0xff]  ;;  %v2559_v11 = vld [vmem:[#allocation5 + $0x30] ss:$2 sm:$0xff] }
 0xad6   :  { %7159 = vmatmul.mubr.msk.f32.gmra.mrb[26].mxu1 %vm1137_vm2, %v2567_v59 }
 0xad7   :  { %7169 = vmatprep.mubr.msk.f32.mxu1 %vm1137_vm2, %v2553_v51  ;;  %v6414_v51 = vld [vmem:[%s9945_s21] ss:$0 sm:$0xff] }
 0xada   :  { %7170 = vmatmul.mubr.msk.f32.vlgmr.msra.gmra.mrb[24].mxu1 %vm1137_vm2, %v2555_v30 }
 0xadb   :  { %7172 = vmatprep.mubr.msk.f32.mxu1 %vm1137_vm2, %v2557_v58  ;;  %7477 = vmatpush3.bf16.msra.mxu1 %v6526_v27 }
 0xadc   :  { %7479 = vmatprep.subr.bf16.mxu1 %v6594_v53 }
 0xade   :  { %7173 = vmatmul.mubr.msk.f32.gmra.mrb[26].mxu1 %vm1137_vm2, %v2559_v11  ;;  %v6415_v11 = vld [vmem:[%s9946_s25] ss:$0 sm:$0xff] }
 0xadf   :  { %7481 = vmatpush3.bf16.msra.mxu1 %v6594_v53 }
 0xbad   :  { %v7171_v34 = vpop.f32.mrb[24].mxu1 }
 0xbae   :  { %v2786_v21 = vadd.f32 %v7171_v34, %v6413_v20  ;;  %v2759_v36 = vpop.f32.mrb[25].mxu1 }
 0xbaf   :  { %v2785_v2 = vadd.f32 %v6413_v20, %v2759_v36 }
 0xbb0   :  { %v2794_v31 = vsel %vm1137_vm2, %v2786_v21, 0.0 }
 0xbb1   :  { %2795 = vadd.xlane.f32.xlu0 %v2794_v31  ;;  %v7174_v48 = vpop.f32.mrb[26].mxu1  ;;  %v2791_v10 = vsel %vm1137_vm2, %v2785_v2, 0.0 }
 0xbb2   :  { %v2788_v26 = vadd.f32 %v7174_v48, %v6413_v20  ;;  %2792 = vadd.xlane.f32.xlu1 %v2791_v10  ;;  %v2769_v43 = vpop.f32.mrb[27].mxu1 }
 0xbb3   :  { %v2787_v4 = vadd.f32 %v6413_v20, %v2769_v43 }
 0xbb4   :  { %v2800_v19 = vsel %vm1137_vm2, %v2788_v26, 0.0 }
 0xbb5   :  { %2801 = vadd.xlane.f32.xlu0 %v2800_v19  ;;  %v2797_v42 = vsel %vm1137_vm2, %v2787_v4, 0.0 }
 0xbb6   :  { %2798 = vadd.xlane.f32.xlu1 %v2797_v42 }
 0xc3e   :  { %v2796_v6 = vpop.xlane.xlu0 %2795 }
 0xc3f   :  { %v2804_v35 = vmul.f32 0.03125, %v2796_v6  ;;  %v2793_v39 = vpop.xlane.xlu1 %2792 }
 0xc40   :  { %v2803_v5 = vmul.f32 0.03125, %v2793_v39 }
 0xc41   :  { %v2808_v41 = vsub.f32 %v2786_v21, %v2804_v35 }
 0xc42   :  { %v2807_v22 = vsub.f32 %v2785_v2, %v2803_v5  ;;  %v2802_v1 = vpop.xlane.xlu0 %2801 }
 0xc43   :  { %v2806_v15 = vmul.f32 0.03125, %v2802_v1  ;;  %v2799_v52 = vpop.xlane.xlu1 %2798  ;;  %v2812_v46 = vmul.f32 %v2808_v41, %v2808_v41 }
 0xc44   :  { %v2805_v25 = vmul.f32 0.03125, %v2799_v52  ;;  %v2811_v29 = vmul.f32 %v2807_v22, %v2807_v22 }
 0xc45   :  { %v2810_v38 = vsub.f32 %v2788_v26, %v2806_v15  ;;  %v2818_v32 = vsel %vm1137_vm2, %v2812_v46, 0.0 }
 0xc46   :  { %v2809_v18 = vsub.f32 %v2787_v4, %v2805_v25  ;;  %2819 = vadd.xlane.f32.xlu0 %v2818_v32  ;;  %v2815_v28 = vsel %vm1137_vm2, %v2811_v29, 0.0 }
 0xc47   :  { %2816 = vadd.xlane.f32.xlu1 %v2815_v28  ;;  %v2814_v60 = vmul.f32 %v2810_v38, %v2810_v38 }
 0xc48   :  { %v2813_v49 = vmul.f32 %v2809_v18, %v2809_v18 }
 0xc49   :  { %v2824_v63 = vsel %vm1137_vm2, %v2814_v60, 0.0 }
 0xc4a   :  { %2825 = vadd.xlane.f32.xlu0 %v2824_v63  ;;  %v2821_v23 = vsel %vm1137_vm2, %v2813_v49, 0.0 }
 0xc4b   :  { %2822 = vadd.xlane.f32.xlu1 %v2821_v23 }
 0xcd3   :  { %v2820_v17 = vpop.xlane.xlu0 %2819 }
 0xcd4   :  { %v2828_v61 = vmul.f32 0.03125, %v2820_v17  ;;  %v2817_v54 = vpop.xlane.xlu1 %2816 }
 0xcd5   :  { %v2827_v7 = vmul.f32 0.03125, %v2817_v54  ;;  %v2875_v54 = vmul.f32 0.25, %v8967_v56 }
 0xcd6   :  { %v2832_v13 = vadd.f32 1e-05, %v2828_v61  ;;  %v2868_v61 = vmul.f32 0.25, %v8981_v57 }
 0xcd7   :  { %v2831_v3 = vadd.f32 1e-05, %v2827_v7  ;;  %v2826_v45 = vpop.xlane.xlu0 %2825  ;;  %v2867_v7 = vmul.f32 0.25, %v8984_v44 }
 0xcd8   :  { %8141 = vrsqrt.f32 %v2832_v13  ;;  %v2830_v55 = vmul.f32 0.03125, %v2826_v45  ;;  %v2823_v37 = vpop.xlane.xlu1 %2822  ;;  %v2872_v13 = vfloor.f32 %v2868_v61  ;;  %v2870_v45 = vmul.f32 0.25, %v8987_v33 }
 0xcd9   :  { %8143 = vrsqrt.f32 %v2831_v3  ;;  %v2829_v47 = vmul.f32 0.03125, %v2823_v37  ;;  %v2876_v3 = vfloor.f32 %v2875_v54 }
 0xcda   :  { %v2834_v40 = vadd.f32 1e-05, %v2830_v55  ;;  %v2871_v55 = vfloor.f32 %v2867_v7  ;;  %v2874_v37 = vfloor.f32 %v2870_v45 }
 0xcdb   :  { %v2833_v62 = vadd.f32 1e-05, %v2829_v47  ;;  %vm2878_vm14 = vcmp.eq.f32.partialorder %v2872_v13, %v2876_v3 }
 0xcdc   :  { %8145 = vrsqrt.f32 %v2834_v40  ;;  %vm2877_vm15 = vcmp.eq.f32.partialorder %v2871_v55, %v2876_v3  ;;  %v9442_v40 = vsel %vm2878_vm14, 0.0, %v9944_v12  ;;  %vm2880_vm0 = vcmp.eq.f32.partialorder %v2874_v37, %v2876_v3 }
 0xcdd   :  { %8147 = vrsqrt.f32 %v2833_v62 }
 0xce2   :  { %v8142_v59 = vpop.eup %8141 }
 0xce3   :  { %v8144_v30 = vpop.eup %8143  ;;  %v2840_v58 = vmul.f32 %v8142_v59, %v2808_v41  ;;  %v6416_v41 = vld [vmem:[%s9947_s29] ss:$0 sm:$0xff] }
 0xce4   :  { %v2839_v20 = vmul.f32 %v8144_v30, %v2807_v22 }
 0xce5   :  { %v2850_v34 = vmul.f32 %v6414_v51, %v2840_v58 }
 0xce6   :  { %v8146_v21 = vpop.eup %8145  ;;  %v2849_v36 = vmul.f32 %v6414_v51, %v2839_v20  ;;  %v9450_v20 = vsel %vm2880_vm0, 0.0, %v9944_v12 }
 0xce7   :  { %v8148_v2 = vpop.eup %8147  ;;  %v9376_v31 = vadd.f32 %v6415_v11, %v2850_v34  ;;  %v2842_v48 = vmul.f32 %v8146_v21, %v2810_v38 }
 0xce8   :  { %v9378_v10 = vadd.f32 %v6415_v11, %v2849_v36  ;;  %v2841_v26 = vmul.f32 %v8148_v2, %v2809_v18 }
 0xce9   :  { %v2852_v43 = vmul.f32 %v6414_v51, %v2842_v48  ;;  %v2864_v42 = vmax.f32 %v9376_v31, 0.0 }
 0xcea   :  { %v2863_v4 = vmax.f32 %v9378_v10, 0.0  ;;  %v2851_v19 = vmul.f32 %v6414_v51, %v2841_v26  ;;  %v9445_v51 = vsel %vm2877_vm15, 0.0, %v9944_v12 }
 0xceb   :  { %v9382_v6 = vadd.f32 %v6415_v11, %v2852_v43  ;;  %v2869_v43 = vmul.f32 0.25, %v8992_v14 }
 0xcec   :  { %7183 = vmatprep.mubr.msk.f32.mxu1 %vm1137_vm2, %v2863_v4  ;;  %v9387_v35 = vadd.f32 %v6415_v11, %v2851_v19 }
 0xced   :  { %7184 = vmatmul.mubr.msk.f32.vlgmr.msra.gmra.mrb[28].mxu1 %vm1137_vm2, %v2864_v42  ;;  %v2866_v5 = vmax.f32 %v9382_v6, 0.0  ;;  %v2873_v19 = vfloor.f32 %v2869_v43 }
 0xcee   :  { %v2865_v39 = vmax.f32 %v9387_v35, 0.0 }
 0xcef   :  { %vm2879_vm1 = vcmp.eq.f32.partialorder %v2873_v19, %v2876_v3 }
 0xcf0   :  { %7186 = vmatprep.mubr.msk.f32.mxu1 %vm1137_vm2, %v2865_v39 }
 0xcf1   :  { %7187 = vmatmul.mubr.msk.f32.gmra.mrb[30].mxu1 %vm1137_vm2, %v2866_v5 }
 0xdc0   :  { %v7185_v22 = vpop.f32.mrb[28].mxu1 }
 0xdc1   :  { %v9401_v1 = vadd.f32 %v7185_v22, %v6416_v41  ;;  %v2978_v15 = vpop.f32.mrb[29].mxu1  ;;  %v9460_v22 = vsel %vm2879_vm1, 0.0, %v9944_v12 }
 0xdc2   :  { %v9403_v52 = vadd.f32 %v6416_v41, %v2978_v15 }
 0xdc4   :  { %v7188_v46 = vpop.f32.mrb[30].mxu1  ;;  %7197 = vmatprep.mubr.msk.f32.mxu0 %vm1299_vm3, %v9403_v52  ;;  %v9409_v25 = vpack.i.bf16 %v9401_v1, %v9403_v52 }
 0xdc5   :  { %v9411_v29 = vadd.f32 %v7188_v46, %v6416_v41  ;;  %v2988_v38 = vpop.f32.mrb[31].mxu1 }
 0xdc6   :  { %v9413_v32 = vadd.f32 %v6416_v41, %v2988_v38  ;;  %8002 = vrot.lane.b32.xlu1 %v9409_v25, %s8285_s0 }
 0xdc8   :  { %v9419_v18 = vpack.i.bf16 %v9411_v29, %v9413_v32 }
 0xdca   :  { %8007 = vrot.lane.b32.xlu0 %v9419_v18, %s8285_s0 }
 0xe38   :  { %v8003_v28 = vpop.permute.xlu1 %8002 }
 0xe39   :  { %v8005_v60 = vunpack.i.h.bf16 %v8003_v28  ;;  %v8004_v49 = vunpack.i.l.bf16 %v8003_v28 }
 0xe3b   :  { %v7482_v63 = vpack.c.bf16 %v8005_v60, %v8004_v49 }
 0xe3c   :  { %v8008_v23 = vpop.permute.xlu0 %8007 }
 0xe3d   :  { %v8010_v27 = vunpack.i.h.bf16 %v8008_v23  ;;  %v8009_v53 = vunpack.i.l.bf16 %v8008_v23  ;;  %7484 = vmatprep.subr.msk.bf16.mxu0 %vm8931_vm4, %v7482_v63 }
 0xe3e   :  { %7487 = vmatpush3.bf16.xpose.msk.msra.mxu0 %vm8931_vm4, %v7482_v63 }
 0xe3f   :  { %v7488_v17 = vpack.c.bf16 %v8010_v27, %v8009_v53 }
 0xe41   :  { %7490 = vmatprep.subr.msk.bf16.mxu0 %vm8931_vm4, %v7488_v17 }
 0xe46   :  { %7493 = vmatpush3.bf16.xpose.msk.msra.mxu0 %vm8931_vm4, %v7488_v17 }
 0xe4d   :  { %7198 = vmatmul.mubr.msk.f32.vlgmr.msra.gmra.mrb[32].mxu0 %vm1299_vm3, %v9401_v1 }
 0xe4e   :  { %7200 = vmatprep.mubr.msk.f32.mxu0 %vm1299_vm3, %v9413_v32 }
 0xe51   :  { %7201 = vmatmul.mubr.msk.f32.gmra.mrb[34].mxu0 %vm1299_vm3, %v9411_v29 }
 0xf20   :  { %v7199_v47 = vpop.f32.mrb[32].mxu0 }
 0xf21   :  { %v3119_v62 = vmul.f32 0.25, %v7199_v47  ;;  %v3099_v59 = vpop.f32.mrb[33].mxu0 }
 0xf22   :  { %v3118_v30 = vmul.f32 0.25, %v3099_v59 }
 0xf23   :  { %v3123_v58 = vadd.f32 %v3119_v62, %v9442_v40 }
 0xf24   :  { %v7202_v11 = vpop.f32.mrb[34].mxu0  ;;  %v3122_v33 = vadd.f32 %v3118_v30, %v9445_v51 }
 0xf25   :  { %v3121_v34 = vmul.f32 0.25, %v7202_v11  ;;  %v3109_v21 = vpop.f32.mrb[35].mxu0  ;;  %v3129_v36 = vsel %vm1137_vm2, %v3123_v58, -inf }
 0xf26   :  { %3130 = vmax.xlane.f32.xlu0 %v3129_v36  ;;  %v3126_v2 = vsel %vm1137_vm2, %v3122_v33, -inf  ;;  %v3120_v41 = vmul.f32 0.25, %v3109_v21 }
 0xf27   :  { %3127 = vmax.xlane.f32.xlu1 %v3126_v2  ;;  %v3125_v48 = vadd.f32 %v3121_v34, %v9450_v20 }
 0xf28   :  { %v3124_v15 = vadd.f32 %v3120_v41, %v9460_v22 }
 0xf29   :  { %v3135_v26 = vsel %vm1137_vm2, %v3125_v48, -inf }
 0xf2a   :  { %3136 = vmax.xlane.f32.xlu0 %v3135_v26  ;;  %v3132_v46 = vsel %vm1137_vm2, %v3124_v15, -inf }
 0xf38   :  { %8012 = vrot.lane.b32.xlu1 %v9409_v25, %s8287_s5 }
 0xf5c   :  { %3133 = vmax.xlane.f32.xlu1 %v3132_v46 }
 0xf6d   :  { %8022 = vrot.lane.b32.xlu1 %v9409_v25, %s8288_s9 }
 0xf71   :  { %8027 = vrot.lane.b32.xlu1 %v9419_v18, %s8288_s9 }
 0xfb3   :  { %v3131_v38 = vpop.xlane.xlu0 %3130 }
 0xfb4   :  { %v3139_v28 = vsub.f32 %v3123_v58, %v3131_v38  ;;  %v3128_v14 = vpop.xlane.xlu1 %3127 }
 0xfb5   :  { %v3138_v60 = vsub.f32 %v3122_v33, %v3128_v14 }
 0xfb6   :  { %v3144_v49 = vmul.f32 1.442695, %v3139_v28 }
 0xfb7   :  { %v3142_v63 = vmul.f32 1.442695, %v3138_v60  ;;  %v3137_v3 = vpop.xlane.xlu0 %3136 }
 0xfb8   :  { %8149 = vpow2.f32 %v3144_v49  ;;  %v8013_v23 = vpop.permute.xlu1 %8012  ;;  %v3141_v45 = vsub.f32 %v3125_v48, %v3137_v3 }
 0xfb9   :  { %8151 = vpow2.f32 %v3142_v63  ;;  %v8015_v27 = vunpack.i.h.bf16 %v8013_v23  ;;  %v8014_v53 = vunpack.i.l.bf16 %v8013_v23 }
 0xfba   :  { %v3148_v55 = vmul.f32 1.442695, %v3141_v45 }
 0xfbb   :  { %v7494_v17 = vpack.c.bf16 %v8015_v27, %v8014_v53 }
 0xfbc   :  { %8153 = vpow2.f32 %v3148_v55 }
 0xfbd   :  { %7495 = vmatprep.subr.bf16.mxu1 %v7494_v17 }
 0xfbe   :  { %7497 = vmatpush3.bf16.msra.mxu1 %v7494_v17 }
 0xfc2   :  { %v8150_v61 = vpop.eup %8149 }
 0xfc3   :  { %v8152_v54 = vpop.eup %8151  ;;  %v3153_v7 = vsel %vm1137_vm2, %v8150_v61, 0.0 }
 0xfc4   :  { %3154 = vadd.xlane.f32.xlu0 %v3153_v7  ;;  %v3150_v13 = vsel %vm1137_vm2, %v8152_v54, 0.0 }
 0xfc5   :  { %3151 = vadd.xlane.f32.xlu1 %v3150_v13 }
 0xfc6   :  { %v8154_v59 = vpop.eup %8153 }
 0xfc7   :  { %v3159_v58 = vsel %vm1137_vm2, %v8154_v59, 0.0 }
 0xfd6   :  { %3281 = vrot.lane.b32.xlu1 %v9401_v1, %s8289_s13 }
 0xfda   :  { %8017 = vrot.lane.b32.xlu0 %v9419_v18, %s8287_s5 }
 0xfe9   :  { %v3134_v37 = vpop.xlane.xlu1 %3133 }
 0xfea   :  { %v3140_v47 = vsub.f32 %v3124_v15, %v3134_v37 }
 0xfec   :  { %v3146_v62 = vmul.f32 1.442695, %v3140_v47 }
 0xfed   :  { %v8023_v1 = vpop.permute.xlu1 %8022 }
 0xfee   :  { %8155 = vpow2.f32 %v3146_v62  ;;  %v8025_v2 = vunpack.i.h.bf16 %v8023_v1  ;;  %v8024_v48 = vunpack.i.l.bf16 %v8023_v1 }
 0xff0   :  { %v7502_v41 = vpack.c.bf16 %v8025_v2, %v8024_v48 }
 0xff1   :  { %v8028_v33 = vpop.permute.xlu1 %8027 }
 0xff2   :  { %v8030_v15 = vunpack.i.h.bf16 %v8028_v33  ;;  %v8029_v46 = vunpack.i.l.bf16 %v8028_v33 }
 0xff4   :  { %v7508_v28 = vpack.c.bf16 %v8030_v15, %v8029_v46 }
 0xff8   :  { %v8156_v30 = vpop.eup %8155 }
 0xff9   :  { %3160 = vadd.xlane.f32.xlu0 %v3159_v58  ;;  %v3156_v11 = vsel %vm1137_vm2, %v8156_v30, 0.0 }
 0xffa   :  { %3157 = vadd.xlane.f32.xlu1 %v3156_v11 }
0x100b   :  { %3285 = vrot.lane.b32.xlu1 %v9411_v29, %s8289_s13 }
0x100f   :  { %3279 = vrot.lane.b32.xlu0 %v9403_v52, %s8289_s13 }
0x1013   :  { %3283 = vrot.lane.b32.xlu0 %v9413_v32, %s8289_s13 }
0x1051   :  { %v3155_v34 = vpop.xlane.xlu0 %3154 }
0x1052   :  { %8157 = vrcp.f32 %v3155_v34  ;;  %v3152_v21 = vpop.xlane.xlu1 %3151 }
0x1053   :  { %8159 = vrcp.f32 %v3152_v21 }
0x1055   :  { %v8018_v36 = vpop.permute.xlu0 %8017 }
0x1056   :  { %v8020_v26 = vunpack.i.h.bf16 %v8018_v36  ;;  %v8019_v43 = vunpack.i.l.bf16 %v8018_v36  ;;  %v3282_v14 = vpop.permute.xlu1 %3281 }
0x1058   :  { %v7498_v19 = vpack.c.bf16 %v8020_v26, %v8019_v43 }
0x105a   :  { %7499 = vmatprep.subr.bf16.mxu1 %v7498_v19 }
0x105b   :  { %7501 = vmatpush3.bf16.msra.mxu1 %v7498_v19 }
0x105c   :  { %v8158_v29 = vpop.eup %8157  ;;  %7504 = vmatprep.subr.msk.bf16.mxu1 %vm8931_vm4, %v7502_v41 }
0x105d   :  { %v8160_v52 = vpop.eup %8159  ;;  %v3167_v38 = vmul.f32 %v8158_v29, %v8150_v61 }
0x105e   :  { %v3166_v32 = vmul.f32 %v8160_v52, %v8152_v54 }
0x1060   :  { %7211 = vmatprep.mubr.msk.f32.mxu1 %vm1137_vm2, %v3166_v32 }
0x1061   :  { %7212 = vmatmul.mubr.msk.f32.vlgmr.msra.gmra.mrb[32].mxu1 %vm1137_vm2, %v3167_v38 }
0x1064   :  { %7507 = vmatpush3.bf16.xpose.msk.msra.mxu1 %vm8931_vm4, %v7502_v41 }
0x1065   :  { %7510 = vmatprep.subr.msk.bf16.mxu1 %vm8931_vm4, %v7508_v28 }
0x106c   :  { %7513 = vmatpush3.bf16.xpose.msk.msra.mxu1 %vm8931_vm4, %v7508_v28 }
0x1086   :  { %v3161_v60 = vpop.xlane.xlu0 %3160 }
0x1087   :  { %8161 = vrcp.f32 %v3161_v60  ;;  %v3158_v49 = vpop.xlane.xlu1 %3157 }
0x1088   :  { %8163 = vrcp.f32 %v3158_v49 }
0x108a   :  { %v3280_v53 = vpop.permute.xlu0 %3279 }
0x108b   :  { %v3286_v54 = vpop.permute.xlu1 %3285 }
0x108e   :  { %v3284_v61 = vpop.permute.xlu0 %3283 }
0x1091   :  { %v8162_v63 = vpop.eup %8161 }
0x1092   :  { %v8164_v23 = vpop.eup %8163  ;;  %v3169_v17 = vmul.f32 %v8162_v63, %v8154_v59 }
0x1093   :  { %v3168_v27 = vmul.f32 %v8164_v23, %v8156_v30 }
0x1095   :  { %7214 = vmatprep.mubr.msk.f32.mxu1 %vm1137_vm2, %v3168_v27 }
0x1096   :  { %7215 = vmatmul.mubr.msk.f32.gmra.mrb[34].mxu1 %vm1137_vm2, %v3169_v17 }
0x1097   :  { %7225 = vmatprep.mubr.msk.f32.mxu1 %vm1299_vm3, %v3280_v53 }
0x109a   :  { %7226 = vmatmul.mubr.msk.f32.vlgmr.msra.gmra.mrb[36].mxu1 %vm1299_vm3, %v3282_v14 }
0x109b   :  { %7228 = vmatprep.mubr.msk.f32.mxu1 %vm1299_vm3, %v3284_v61 }
0x109e   :  { %7229 = vmatmul.mubr.msk.f32.gmra.mrb[38].mxu1 %vm1299_vm3, %v3286_v54 }
0x1134   :  { %v9498_v7 = vpop.f32.mrb[32].mxu1 }
0x1135   :  { %v9500_v13 = vpop.f32.mrb[33].mxu1 }
0x1169   :  { %v9502_v3 = vpop.f32.mrb[34].mxu1 }
0x116a   :  { %v9504_v45 = vpop.f32.mrb[35].mxu1 }
0x116d   :  { %v7227_v55 = vpop.f32.mrb[36].mxu1 }
0x116e   :  { %v3397_v37 = vmul.f32 0.25, %v7227_v55  ;;  %v3377_v47 = vpop.f32.mrb[37].mxu1 }
0x116f   :  { %v3396_v62 = vmul.f32 0.25, %v3377_v47 }
0x1170   :  { %v3401_v59 = vadd.f32 %v3397_v37, %v9442_v40 }
0x1171   :  { %v3400_v30 = vadd.f32 %v3396_v62, %v9445_v51  ;;  %v7230_v58 = vpop.f32.mrb[38].mxu1 }
0x1172   :  { %v3387_v11 = vpop.f32.mrb[39].mxu1  ;;  %v3407_v1 = vsel %vm1137_vm2, %v3401_v59, -inf  ;;  %v3399_v33 = vmul.f32 0.25, %v7230_v58 }
0x1173   :  { %v3398_v34 = vmul.f32 0.25, %v3387_v11  ;;  %3408 = vmax.xlane.f32.xlu1 %v3407_v1  ;;  %v3404_v21 = vsel %vm1137_vm2, %v3400_v30, -inf }
0x1174   :  { %3405 = vmax.xlane.f32.xlu0 %v3404_v21  ;;  %v3403_v2 = vadd.f32 %v3399_v33, %v9450_v20  ;;  %v6595_v33 = vld [vmem:[%s9948_s3 + $0x8] sm:$0xff]  }
0x1175   :  { %v3402_v36 = vadd.f32 %v3398_v34, %v9460_v22 }
0x1176   :  { %v3413_v40 = vsel %vm1137_vm2, %v3403_v2, -inf }
0x1177   :  { %v3410_v48 = vsel %vm1137_vm2, %v3402_v36, -inf }
0x1178   :  { %3411 = vmax.xlane.f32.xlu0 %v3410_v48 }
0x117c   :  { %3414 = vmax.xlane.f32.xlu0 %v3413_v40  ;;  %v6534_v40 = vld [vmem:[%s9948_s3] sm:$0xff]  }
0x1200   :  { %v3409_v51 = vpop.xlane.xlu1 %3408 }
0x1201   :  { %v3417_v26 = vsub.f32 %v3401_v59, %v3409_v51  ;;  %v3406_v43 = vpop.xlane.xlu0 %3405 }
0x1202   :  { %v3416_v19 = vsub.f32 %v3400_v30, %v3406_v43 }
0x1203   :  { %v3422_v41 = vmul.f32 1.442695, %v3417_v26 }
0x1204   :  { %v3420_v29 = vmul.f32 1.442695, %v3416_v19 }
0x1205   :  { %8165 = vpow2.f32 %v3422_v41  ;;  %v3412_v52 = vpop.xlane.xlu0 %3411  ;;  %v6453_v41 = vld [vmem:[%s9949_s8] ss:$0 sm:$0xff] }
0x1206   :  { %8167 = vpow2.f32 %v3420_v29  ;;  %v3418_v32 = vsub.f32 %v3402_v36, %v3412_v52 }
0x1208   :  { %v3424_v15 = vmul.f32 1.442695, %v3418_v32 }
0x1209   :  { %v3415_v22 = vpop.xlane.xlu0 %3414 }
0x120a   :  { %8169 = vpow2.f32 %v3424_v15  ;;  %v3419_v20 = vsub.f32 %v3403_v2, %v3415_v22 }
0x120c   :  { %v3426_v46 = vmul.f32 1.442695, %v3419_v20 }
0x120e   :  { %8171 = vpow2.f32 %v3426_v46 }
0x120f   :  { %v8166_v38 = vpop.eup %8165 }
0x1210   :  { %v8168_v28 = vpop.eup %8167  ;;  %v3431_v14 = vsel %vm1137_vm2, %v8166_v38, 0.0 }
0x1211   :  { %3432 = vadd.xlane.f32.xlu0 %v3431_v14  ;;  %v3428_v60 = vsel %vm1137_vm2, %v8168_v28, 0.0 }
0x1212   :  { %3429 = vadd.xlane.f32.xlu1 %v3428_v60 }
0x1214   :  { %v8170_v49 = vpop.eup %8169 }
0x1215   :  { %v3434_v63 = vsel %vm1137_vm2, %v8170_v49, 0.0 }
0x1216   :  { %3435 = vadd.xlane.f32.xlu1 %v3434_v63 }
0x1218   :  { %v8172_v23 = vpop.eup %8171 }
0x1219   :  { %v3437_v27 = vsel %vm1137_vm2, %v8172_v23, 0.0 }
0x121a   :  { %3438 = vadd.xlane.f32.xlu0 %v3437_v27 }
0x1227   :  { %8032 = vrot.lane.b32.xlu1 %v9409_v25, %s8290_s17 }
0x1230   :  { %8037 = vrot.lane.b32.xlu0 %v9419_v18, %s8290_s17 }
0x129e   :  { %v3433_v17 = vpop.xlane.xlu0 %3432 }
0x129f   :  { %v3430_v53 = vpop.xlane.xlu1 %3429 }
0x12a0   :  { %8173 = vrcp.f32 %v3430_v53 }
0x12a1   :  { %8175 = vrcp.f32 %v3433_v17 }
0x12a3   :  { %v3436_v61 = vpop.xlane.xlu1 %3435 }
0x12a4   :  { %8177 = vrcp.f32 %v3436_v61 }
0x12a7   :  { %v8033_v54 = vpop.permute.xlu1 %8032  ;;  %v3439_v55 = vpop.xlane.xlu0 %3438 }
0x12a8   :  { %v8035_v37 = vunpack.i.h.bf16 %v8033_v54  ;;  %v8034_v47 = vunpack.i.l.bf16 %v8033_v54  ;;  %8179 = vrcp.f32 %v3439_v55 }
0x12aa   :  { %v8174_v62 = vpop.eup %8173  ;;  %v7514_v59 = vpack.c.bf16 %v8035_v37, %v8034_v47 }
0x12ab   :  { %v8038_v30 = vpop.permute.xlu0 %8037  ;;  %v3444_v58 = vmul.f32 %v8174_v62, %v8168_v28  ;;  %v8176_v1 = vpop.eup %8175 }
0x12ac   :  { %v8040_v25 = vunpack.i.h.bf16 %v8038_v30  ;;  %v8039_v11 = vunpack.i.l.bf16 %v8038_v30  ;;  %7515 = vmatprep.subr.bf16.mxu0 %v7514_v59  ;;  %v3445_v21 = vmul.f32 %v8176_v1, %v8166_v38  ;;  %v6598_v1 = vld [vmem:[%s9950_s14 + $0x18] sm:$0xff]  }
0x12ad   :  { %7517 = vmatpush3.bf16.msra.mxu0 %v7514_v59  ;;  %7239 = vmatprep.mubr.msk.f32.mxu0 %vm1137_vm2, %v3444_v58 }
0x12ae   :  { %v7518_v18 = vpack.c.bf16 %v8040_v25, %v8039_v11  ;;  %v8178_v34 = vpop.eup %8177 }
0x12af   :  { %v3446_v2 = vmul.f32 %v8178_v34, %v8170_v49 }
0x12b0   :  { %7519 = vmatprep.subr.bf16.mxu0 %v7518_v18 }
0x12b1   :  { %7521 = vmatpush3.bf16.msra.mxu0 %v7518_v18  ;;  %v6597_v18 = vld [vmem:[%s9950_s14 + $0x10] sm:$0xff]  }
0x12b2   :  { %7523 = vmatprep.subr.bf16.mxu0 %v6595_v33  ;;  %v8180_v36 = vpop.eup %8179  ;;  %7531 = vmatprep.subr.bf16.mxu1 %v6597_v18 }
0x12b3   :  { %v3447_v48 = vmul.f32 %v8180_v36, %v8172_v23  ;;  %7533 = vmatpush3.bf16.msra.mxu1 %v6597_v18 }
0x12b4   :  { %7240 = vmatmul.mubr.msk.f32.vlgmr.msra.gmra.mrb[36].mxu0 %vm1137_vm2, %v3445_v21  ;;  %7535 = vmatprep.subr.bf16.mxu1 %v6598_v1 }
0x12b5   :  { %7242 = vmatprep.mubr.msk.f32.mxu0 %vm1137_vm2, %v3446_v2  ;;  %7525 = vmatpush3.bf16.msra.mxu0 %v6595_v33  ;;  %v6542_v33 = vld [vmem:[%s9950_s14] sm:$0xff]  }
0x12b6   :  { %7527 = vmatprep.subr.bf16.mxu0 %v6534_v40 }
0x12b7   :  { %7537 = vmatpush3.bf16.msra.mxu1 %v6598_v1 }
0x12b8   :  { %7243 = vmatmul.mubr.msk.f32.gmra.mrb[38].mxu0 %vm1137_vm2, %v3447_v48  ;;  %7539 = vmatprep.subr.bf16.mxu1 %v6542_v33 }
0x1387   :  { %v7241_v51 = vpop.f32.mrb[36].mxu0 }
0x1388   :  { %v3538_v26 = vpop.f32.mrb[37].mxu0 }
0x1389   :  { %7249 = vmatprep.mubr.msk.f32.mxu0 %vm1299_vm3, %v3538_v26 }
0x138a   :  { %7250 = vmatmul.mubr.msk.f32.vlgmr.msra.gmra.mrb[40].mxu0 %vm1299_vm3, %v7241_v51 }
0x138b   :  { %v7244_v43 = vpop.f32.mrb[38].mxu0  ;;  %7529 = vmatpush3.bf16.msra.mxu0 %v6534_v40 }
0x138c   :  { %v3548_v19 = vpop.f32.mrb[39].mxu0 }
0x138d   :  { %7252 = vmatprep.mubr.msk.f32.mxu0 %vm1299_vm3, %v3548_v19 }
0x138e   :  { %7253 = vmatmul.mubr.msk.f32.gmra.mrb[42].mxu0 %vm1299_vm3, %v7244_v43 }
0x138f   :  { %7259 = vmatprep.mubr.msk.f32.mxu0 %vm1299_vm3, %v9500_v13 }
0x1392   :  { %7260 = vmatmul.mubr.msk.f32.vlgmr.msra.gmra.mrb[40].mxu0 %vm1299_vm3, %v9498_v7 }
0x1393   :  { %7262 = vmatprep.mubr.msk.f32.mxu0 %vm1299_vm3, %v9504_v45 }
0x1396   :  { %7263 = vmatmul.mubr.msk.f32.gmra.mrb[42].mxu0 %vm1299_vm3, %v9502_v3 }
0x1465   :  { %v7261_v29 = vpop.f32.mrb[40].mxu0 }
0x1466   :  { %v3759_v52 = vadd.f32 %v7261_v29, %v6453_v41  ;;  %v3732_v32 = vpop.f32.mrb[41].mxu0 }
0x1467   :  { %v3758_v15 = vadd.f32 %v6453_v41, %v3732_v32  ;;  %v6454_v32 = vld [vmem:[%s9951_s19] ss:$0 sm:$0xff] }
0x1468   :  { %v3767_v22 = vsel %vm1137_vm2, %v3759_v52, 0.0 }
0x1469   :  { %3768 = vadd.xlane.f32.xlu0 %v3767_v22  ;;  %v7264_v20 = vpop.f32.mrb[42].mxu0  ;;  %v3764_v13 = vsel %vm1137_vm2, %v3758_v15, 0.0 }
0x146a   :  { %v3761_v46 = vadd.f32 %v7264_v20, %v6453_v41  ;;  %3765 = vadd.xlane.f32.xlu1 %v3764_v13  ;;  %v3742_v7 = vpop.f32.mrb[43].mxu0  ;;  %v6455_v20 = vld [vmem:[%s9952_s24] ss:$0 sm:$0xff] }
0x146b   :  { %v3760_v38 = vadd.f32 %v6453_v41, %v3742_v7 }
0x146c   :  { %v3773_v45 = vsel %vm1137_vm2, %v3761_v46, 0.0 }
0x146d   :  { %3774 = vadd.xlane.f32.xlu0 %v3773_v45  ;;  %v3770_v3 = vsel %vm1137_vm2, %v3760_v38, 0.0 }
0x146e   :  { %3771 = vadd.xlane.f32.xlu1 %v3770_v3 }
0x14f6   :  { %v3769_v28 = vpop.xlane.xlu0 %3768 }
0x14f7   :  { %v3777_v14 = vmul.f32 0.03125, %v3769_v28  ;;  %v3766_v60 = vpop.xlane.xlu1 %3765 }
0x14f8   :  { %v3776_v49 = vmul.f32 0.03125, %v3766_v60 }
0x14f9   :  { %v3781_v63 = vsub.f32 %v3759_v52, %v3777_v14 }
0x14fa   :  { %v3780_v23 = vsub.f32 %v3758_v15, %v3776_v49  ;;  %v3775_v27 = vpop.xlane.xlu0 %3774 }
0x14fb   :  { %v3779_v53 = vmul.f32 0.03125, %v3775_v27  ;;  %v3772_v17 = vpop.xlane.xlu1 %3771  ;;  %v3785_v61 = vmul.f32 %v3781_v63, %v3781_v63 }
0x14fc   :  { %v3778_v54 = vmul.f32 0.03125, %v3772_v17  ;;  %v3784_v55 = vmul.f32 %v3780_v23, %v3780_v23 }
0x14fd   :  { %v3783_v37 = vsub.f32 %v3761_v46, %v3779_v53  ;;  %v3791_v47 = vsel %vm1137_vm2, %v3785_v61, 0.0 }
0x14fe   :  { %v3782_v62 = vsub.f32 %v3760_v38, %v3778_v54  ;;  %3792 = vadd.xlane.f32.xlu0 %v3791_v47  ;;  %v3788_v59 = vsel %vm1137_vm2, %v3784_v55, 0.0  ;;  %v6596_v47 = vld [vmem:[%s9950_s14 + $0x8] sm:$0xff]  }
0x14ff   :  { %3789 = vadd.xlane.f32.xlu1 %v3788_v59  ;;  %v3787_v30 = vmul.f32 %v3783_v37, %v3783_v37 }
0x1500   :  { %v3786_v58 = vmul.f32 %v3782_v62, %v3782_v62 }
0x1501   :  { %v3797_v25 = vsel %vm1137_vm2, %v3787_v30, 0.0 }
0x1502   :  { %3798 = vadd.xlane.f32.xlu0 %v3797_v25  ;;  %v3794_v11 = vsel %vm1137_vm2, %v3786_v58, 0.0 }
0x1503   :  { %3795 = vadd.xlane.f32.xlu1 %v3794_v11 }
0x158b   :  { %v3793_v34 = vpop.xlane.xlu0 %3792 }
0x158c   :  { %v3801_v21 = vmul.f32 0.03125, %v3793_v34  ;;  %v3790_v36 = vpop.xlane.xlu1 %3789 }
0x158d   :  { %v3800_v2 = vmul.f32 0.03125, %v3790_v36 }
0x158e   :  { %v3805_v48 = vadd.f32 1e-05, %v3801_v21 }
0x158f   :  { %v3804_v40 = vadd.f32 1e-05, %v3800_v2  ;;  %v3799_v51 = vpop.xlane.xlu0 %3798 }
0x1590   :  { %8181 = vrsqrt.f32 %v3805_v48  ;;  %v3803_v26 = vmul.f32 0.03125, %v3799_v51  ;;  %v3796_v43 = vpop.xlane.xlu1 %3795  ;;  %v6558_v51 = vld [vmem:[%s9954_s6] sm:$0xff]  }
0x1591   :  { %8183 = vrsqrt.f32 %v3804_v40  ;;  %v3802_v19 = vmul.f32 0.03125, %v3796_v43  ;;  %7547 = vmatprep.subr.bf16.mxu0 %v6558_v51 }
0x1592   :  { %v3807_v41 = vadd.f32 1e-05, %v3803_v26  ;;  %v6599_v26 = vld [vmem:[%s9954_s6 + $0x8] sm:$0xff]   ;;  %7549 = vmatpush3.bf16.msra.mxu0 %v6558_v51 }
0x1593   :  { %v3806_v29 = vadd.f32 1e-05, %v3802_v19  ;;  %7551 = vmatprep.subr.bf16.mxu0 %v6599_v26 }
0x1594   :  { %8185 = vrsqrt.f32 %v3807_v41 }
0x1595   :  { %8187 = vrsqrt.f32 %v3806_v29 }
0x1596   :  { %7553 = vmatpush3.bf16.msra.mxu0 %v6599_v26 }
0x159a   :  { %v8182_v52 = vpop.eup %8181 }
0x159b   :  { %v8184_v15 = vpop.eup %8183  ;;  %v3813_v22 = vmul.f32 %v8182_v52, %v3781_v63 }
0x159c   :  { %v3812_v13 = vmul.f32 %v8184_v15, %v3780_v23 }
0x159d   :  { %v3823_v46 = vmul.f32 %v6454_v32, %v3813_v22  ;;  %v6461_v22 = vld [vmem:[%s9955_s12] ss:$0 sm:$0xff] }
0x159e   :  { %v8186_v7 = vpop.eup %8185  ;;  %v3822_v38 = vmul.f32 %v6454_v32, %v3812_v13 }
0x159f   :  { %v8188_v45 = vpop.eup %8187  ;;  %v3833_v3 = vadd.f32 %v6455_v20, %v3823_v46  ;;  %v3815_v28 = vmul.f32 %v8186_v7, %v3783_v37  ;;  %v6462_v46 = vld [vmem:[%s9956_s28] ss:$0 sm:$0xff] }
0x15a0   :  { %v3832_v14 = vadd.f32 %v6455_v20, %v3822_v38  ;;  %v3814_v60 = vmul.f32 %v8188_v45, %v3782_v62 }
0x15a1   :  { %v3837_v49 = vadd.f32 %v3833_v3, %v2864_v42  ;;  %v3825_v27 = vmul.f32 %v6454_v32, %v3815_v28 }
0x15a2   :  { %v3836_v53 = vadd.f32 %v3832_v14, %v2863_v4  ;;  %v3824_v17 = vmul.f32 %v6454_v32, %v3814_v60 }
0x15a3   :  { %v3841_v63 = vmax.f32 %v3837_v49, 0.0  ;;  %v3835_v61 = vadd.f32 %v6455_v20, %v3825_v27  ;;  %v6463_v49 = vld [vmem:[%s9957_s1] ss:$0 sm:$0xff] }
0x15a4   :  { %v3840_v23 = vmax.f32 %v3836_v53, 0.0  ;;  %v3834_v54 = vadd.f32 %v6455_v20, %v3824_v17 }
0x15a5   :  { %3845 = vst.msk [vmem:[#allocation5 + $0x8] sm:$0xff] %vm1137_vm2, %v3841_v63  ;;  %v3839_v55 = vadd.f32 %v3835_v61, %v2866_v5 }
0x15a6   :  { %3844 = vst.msk [vmem:[#allocation5] sm:$0xff] %vm1137_vm2, %v3840_v23  ;;  %v3838_v31 = vadd.f32 %v3834_v54, %v2865_v39  ;;  %v6460_v39 = vld [vmem:[%s9953_s30] ss:$0 sm:$0xff] }
0x15a7   :  { %v3843_v42 = vmax.f32 %v3839_v55, 0.0 }
0x15a8   :  { %v3842_v10 = vmax.f32 %v3838_v31, 0.0 }
0x15a9   :  { %3847 = vst.msk [vmem:[#allocation5 + $0x18] sm:$0xff] %vm1137_vm2, %v3843_v42 }
0x15aa   :  { %3846 = vst.msk [vmem:[#allocation5 + $0x10] sm:$0xff] %vm1137_vm2, %v3842_v10 }
0x15ad   :  { %v3850_v4 = vld [vmem:[#allocation5 + $0x1] ss:$2 sm:$0xff]  ;;  %v3848_v6 = vld [vmem:[#allocation5] ss:$2 sm:$0xff] }
0x15ae   :  { %7273 = vmatprep.mubr.msk.f32.mxu1 %vm1137_vm2, %v3850_v4 }
0x15b1   :  { %v3851_v37 = vld [vmem:[#allocation5 + $0x11] ss:$2 sm:$0xff]  ;;  %v3849_v35 = vld [vmem:[#allocation5 + $0x10] ss:$2 sm:$0xff] }
0x15b2   :  { %7274 = vmatmul.mubr.msk.f32.vlgmr.msra.gmra.mrb[40].mxu1 %vm1137_vm2, %v3851_v37 }
0x15b3   :  { %7541 = vmatpush3.bf16.msra.mxu1 %v6542_v33  ;;  %7284 = vmatprep.mubr.msk.f32.mxu1 %vm1137_vm2, %v3848_v6  ;;  %v4085_v6 = vmul.f32 0.5, %v8984_v44 }
0x15b4   :  { %7543 = vmatprep.subr.bf16.mxu1 %v6596_v47 }
0x15b7   :  { %7545 = vmatpush3.bf16.msra.mxu1 %v6596_v47  ;;  %v4089_v47 = vmul.f32 0.5, %v8967_v56 }
0x15ba   :  { %7285 = vmatmul.mubr.msk.f32.vlgmr.msra.gmra.mrb[40].mxu1 %vm1137_vm2, %v3849_v35  ;;  %v4086_v35 = vmul.f32 0.5, %v8981_v57 }
0x168d   :  { %v7286_v5 = vpop.f32.mrb[40].mxu1 }
0x168e   :  { %v4038_v62 = vadd.f32 %v7286_v5, %v6460_v39  ;;  %v4021_v59 = vpop.f32.mrb[41].mxu1  ;;  %v4087_v5 = vfloor.f32 %v4085_v6 }
0x168f   :  { %v4037_v30 = vadd.f32 %v6460_v39, %v4021_v59  ;;  %v4090_v39 = vfloor.f32 %v4089_v47 }
0x1690   :  { %v4044_v58 = vsel %vm1137_vm2, %v4038_v62, 0.0 }
0x1691   :  { %4045 = vadd.xlane.f32.xlu0 %v4044_v58  ;;  %v4041_v25 = vsel %vm1137_vm2, %v4037_v30, 0.0  ;;  %vm4091_vm5 = vcmp.eq.f32.partialorder %v4087_v5, %v4090_v39 }
0x1692   :  { %4042 = vadd.xlane.f32.xlu1 %v4041_v25 }
0x171e   :  { %v4046_v11 = vpop.xlane.xlu0 %4045 }
0x171f   :  { %v4048_v18 = vmul.f32 0.03125, %v4046_v11  ;;  %v4043_v1 = vpop.xlane.xlu1 %4042 }
0x1720   :  { %v4047_v33 = vmul.f32 0.03125, %v4043_v1 }
0x1721   :  { %v4050_v34 = vsub.f32 %v4038_v62, %v4048_v18  ;;  %v4088_v62 = vfloor.f32 %v4086_v35 }
0x1722   :  { %v4049_v21 = vsub.f32 %v4037_v30, %v4047_v33  ;;  %v4093_v30 = vsel %vm4091_vm5, 0.0, %v9944_v12 }
0x1723   :  { %v4052_v36 = vmul.f32 %v4050_v34, %v4050_v34  ;;  %vm4092_vm6 = vcmp.eq.f32.partialorder %v4088_v62, %v4090_v39 }
0x1724   :  { %v4051_v2 = vmul.f32 %v4049_v21, %v4049_v21  ;;  %v4094_v18 = vsel %vm4092_vm6, 0.0, %v9944_v12 }
0x1725   :  { %v4056_v48 = vsel %vm1137_vm2, %v4052_v36, 0.0 }
0x1726   :  { %4057 = vadd.xlane.f32.xlu0 %v4056_v48  ;;  %v4053_v40 = vsel %vm1137_vm2, %v4051_v2, 0.0 }
0x1727   :  { %4054 = vadd.xlane.f32.xlu1 %v4053_v40 }
0x17b3   :  { %v4058_v43 = vpop.xlane.xlu0 %4057 }
0x17b4   :  { %v4060_v19 = vmul.f32 0.03125, %v4058_v43  ;;  %v4055_v41 = vpop.xlane.xlu1 %4054 }
0x17b5   :  { %v4059_v29 = vmul.f32 0.03125, %v4055_v41 }
0x17b6   :  { %v4062_v52 = vadd.f32 1e-05, %v4060_v19 }
0x17b7   :  { %v4061_v32 = vadd.f32 1e-05, %v4059_v29 }
0x17b8   :  { %8189 = vrsqrt.f32 %v4062_v52 }
0x17b9   :  { %8191 = vrsqrt.f32 %v4061_v32 }
0x17c2   :  { %v8190_v15 = vpop.eup %8189 }
0x17c3   :  { %v8192_v20 = vpop.eup %8191  ;;  %v4066_v13 = vmul.f32 %v8190_v15, %v4050_v34 }
0x17c4   :  { %v4065_v7 = vmul.f32 %v8192_v20, %v4049_v21 }
0x17c5   :  { %v4074_v38 = vmul.f32 %v6461_v22, %v4066_v13 }
0x17c6   :  { %v4073_v45 = vmul.f32 %v6461_v22, %v4065_v7 }
0x17c7   :  { %v9580_v3 = vadd.f32 %v6462_v46, %v4074_v38 }
0x17c8   :  { %v9582_v28 = vadd.f32 %v6462_v46, %v4073_v45 }
0x17c9   :  { %v4084_v60 = vmax.f32 %v9580_v3, 0.0 }
0x17ca   :  { %v4083_v14 = vmax.f32 %v9582_v28, 0.0 }
0x17cc   :  { %7295 = vmatprep.mubr.msk.f32.mxu0 %vm1137_vm2, %v4083_v14 }
0x17cd   :  { %7296 = vmatmul.mubr.msk.f32.vlgmr.msra.gmra.mrb[44].mxu0 %vm1137_vm2, %v4084_v60 }
0x18a0   :  { %v7297_v27 = vpop.f32.mrb[44].mxu0 }
0x18a1   :  { %v4188_v53 = vadd.f32 %v7297_v27, %v6463_v49  ;;  %v4182_v17 = vpop.f32.mrb[45].mxu0 }
0x18a2   :  { %v4183_v63 = vadd.f32 %v6463_v49, %v4182_v17 }
0x18a4   :  { %7302 = vmatprep.mubr.msk.f32.mxu1 %vm1299_vm3, %v4183_v63  ;;  %v9594_v61 = vpack.i.bf16 %v4188_v53, %v4183_v63 }
0x18a6   :  { %8042 = vrot.lane.b32.xlu1 %v9594_v61, %s8285_s0 }
0x18aa   :  { %8047 = vrot.lane.b32.xlu1 %v9594_v61, %s8287_s5 }
0x18ae   :  { %4401 = vrot.lane.b32.xlu1 %v4183_v63, %s8289_s13 }
0x18b2   :  { %4403 = vrot.lane.b32.xlu1 %v4188_v53, %s8289_s13 }
0x1918   :  { %v8043_v23 = vpop.permute.xlu1 %8042 }
0x1919   :  { %v8045_v54 = vunpack.i.h.bf16 %v8043_v23  ;;  %v8044_v55 = vunpack.i.l.bf16 %v8043_v23 }
0x191b   :  { %v7554_v31 = vpack.c.bf16 %v8045_v54, %v8044_v55 }
0x191c   :  { %v8048_v42 = vpop.permute.xlu1 %8047 }
0x191d   :  { %v8050_v10 = vunpack.i.h.bf16 %v8048_v42  ;;  %v8049_v4 = vunpack.i.l.bf16 %v8048_v42  ;;  %7556 = vmatprep.subr.msk.bf16.mxu1 %vm8931_vm4, %v7554_v31 }
0x191e   :  { %7559 = vmatpush3.bf16.xpose.msk.msra.mxu1 %vm8931_vm4, %v7554_v31 }
0x191f   :  { %v7560_v37 = vpack.c.bf16 %v8050_v10, %v8049_v4 }
0x1920   :  { %v4402_v46 = vpop.permute.xlu1 %4401 }
0x1921   :  { %7561 = vmatprep.subr.bf16.mxu0 %v7560_v37 }
0x1922   :  { %7563 = vmatpush3.bf16.msra.mxu0 %v7560_v37 }
0x1924   :  { %v4404_v7 = vpop.permute.xlu1 %4403 }
0x1925   :  { %7303 = vmatmul.mubr.msk.f32.vlgmr.msra.gmra.mrb[42].mxu1 %vm1299_vm3, %v4188_v53 }
0x19f8   :  { %v7304_v59 = vpop.f32.mrb[42].mxu1 }
0x19f9   :  { %v4279_v58 = vpop.f32.mrb[43].mxu1  ;;  %v4289_v25 = vmul.f32 0.25, %v7304_v59 }
0x19fa   :  { %v4288_v11 = vmul.f32 0.25, %v4279_v58 }
0x19fb   :  { %v4291_v33 = vadd.f32 %v4289_v25, %v4094_v18 }
0x19fc   :  { %v4290_v1 = vadd.f32 %v4288_v11, %v4093_v30 }
0x19fd   :  { %v4295_v57 = vsel %vm1299_vm3, %v4291_v33, -inf }
0x19fe   :  { %v4292_v56 = vsel %vm1299_vm3, %v4290_v1, -inf }
0x19ff   :  { %4293 = vmax.xlane.f32.xlu0 %v4292_v56  ;;  %v6566_v56 = vld [vmem:[%s9958_s2] sm:$0xff]  }
0x1a03   :  { %4296 = vmax.xlane.f32.xlu0 %v4295_v57 }
0x1a8c   :  { %v4294_v44 = vpop.xlane.xlu0 %4293 }
0x1a8d   :  { %v4298_v34 = vsub.f32 %v4290_v1, %v4294_v44 }
0x1a8f   :  { %v4300_v2 = vmul.f32 1.442695, %v4298_v34  ;;  %v6482_v34 = vld [vmem:[%s9959_s7] ss:$0 sm:$0xff] }
0x1a90   :  { %v4297_v21 = vpop.xlane.xlu0 %4296 }
0x1a91   :  { %v4299_v36 = vsub.f32 %v4291_v33, %v4297_v21 }
0x1a93   :  { %v4302_v48 = vmul.f32 1.442695, %v4299_v36 }
0x1a95   :  { %8193 = vpow2.f32 %v4302_v48 }
0x1a96   :  { %8195 = vpow2.f32 %v4300_v2 }
0x1a9f   :  { %v8194_v40 = vpop.eup %8193 }
0x1aa0   :  { %v4307_v51 = vsel %vm1299_vm3, %v8194_v40, 0.0  ;;  %v8196_v12 = vpop.eup %8195 }
0x1aa1   :  { %4308 = vadd.xlane.f32.xlu0 %v4307_v51  ;;  %v4304_v26 = vsel %vm1299_vm3, %v8196_v12, 0.0 }
0x1aa5   :  { %4305 = vadd.xlane.f32.xlu0 %v4304_v26 }
0x1abb   :  { %8052 = vrot.lane.b32.xlu0 %v9594_v61, %s8288_s9 }
0x1b2e   :  { %v4309_v43 = vpop.xlane.xlu0 %4308 }
0x1b2f   :  { %8197 = vrcp.f32 %v4309_v43 }
0x1b32   :  { %v4306_v19 = vpop.xlane.xlu0 %4305 }
0x1b33   :  { %8199 = vrcp.f32 %v4306_v19 }
0x1b36   :  { %v8053_v41 = vpop.permute.xlu0 %8052 }
0x1b37   :  { %v8055_v29 = vunpack.i.h.bf16 %v8053_v41  ;;  %v8054_v52 = vunpack.i.l.bf16 %v8053_v41 }
0x1b39   :  { %v7564_v32 = vpack.c.bf16 %v8055_v29, %v8054_v52  ;;  %v8198_v15 = vpop.eup %8197 }
0x1b3a   :  { %v4313_v13 = vmul.f32 %v8198_v15, %v8194_v40 }
0x1b3b   :  { %7566 = vmatprep.subr.msk.bf16.mxu0 %vm8931_vm4, %v7564_v32 }
0x1b3d   :  { %v8200_v22 = vpop.eup %8199 }
0x1b3e   :  { %v4312_v20 = vmul.f32 %v8200_v22, %v8196_v12 }
0x1b40   :  { %7309 = vmatprep.mubr.msk.f32.mxu0 %vm1299_vm3, %v4312_v20  ;;  %v8291_v20 = vmov 0.0|0.0  }
0x1b41   :  { %7310 = vmatmul.mubr.msk.f32.vlgmr.msra.gmra.mrb[46].mxu0 %vm1299_vm3, %v4313_v13  ;;  %v6602_v13 = vld [vmem:[%s9960_s10 + $0x10] sm:$0xff]  }
0x1b42   :  { %7569 = vmatpush3.bf16.xpose.msk.msra.mxu0 %vm8931_vm4, %v7564_v32  ;;  %7316 = vmatprep.mubr.msk.f32.mxu0 %vm1299_vm3, %v4402_v46  ;;  %v6574_v46 = vld [vmem:[%s9960_s10] sm:$0xff]   ;;  %vm5049_vm4 = vcmask 785408  }
0x1b49   :  { %7317 = vmatmul.mubr.msk.f32.vlgmr.msra.gmra.mrb[48].mxu0 %vm1299_vm3, %v4404_v7  ;;  %v6603_v7 = vld [vmem:[%s9960_s10 + $0x18] sm:$0xff]  }
0x1c14   :  { %v7311_v38 = vpop.f32.mrb[46].mxu0 }
0x1c15   :  { %v4392_v45 = vpop.f32.mrb[47].mxu0 }
0x1c1c   :  { %v7318_v49 = vpop.f32.mrb[48].mxu0 }
0x1c1d   :  { %v4493_v27 = vmul.f32 0.25, %v7318_v49  ;;  %v4483_v53 = vpop.f32.mrb[49].mxu0 }
0x1c1e   :  { %v4492_v17 = vmul.f32 0.25, %v4483_v53 }
0x1c1f   :  { %v4495_v63 = vadd.f32 %v4493_v27, %v4094_v18 }
0x1c20   :  { %v4494_v23 = vadd.f32 %v4492_v17, %v4093_v30  ;;  %v6600_v30 = vld [vmem:[%s9958_s2 + $0x8] sm:$0xff]  }
0x1c21   :  { %v4499_v54 = vsel %vm1299_vm3, %v4495_v63, -inf  ;;  %7575 = vmatprep.subr.bf16.mxu1 %v6600_v30 }
0x1c22   :  { %4500 = vmax.xlane.f32.xlu0 %v4499_v54  ;;  %v4496_v55 = vsel %vm1299_vm3, %v4494_v23, -inf  ;;  %7577 = vmatpush3.bf16.msra.mxu1 %v6600_v30 }
0x1c23   :  { %4497 = vmax.xlane.f32.xlu1 %v4496_v55  ;;  %7579 = vmatprep.subr.bf16.mxu1 %v6566_v56  ;;  %v6483_v55 = vld [vmem:[%s9961_s11] ss:$0 sm:$0xff] }
0x1c38   :  { %8057 = vrot.lane.b32.xlu0 %v9594_v61, %s8290_s17 }
0x1caf   :  { %v4501_v50 = vpop.xlane.xlu0 %4500 }
0x1cb0   :  { %v4503_v31 = vsub.f32 %v4495_v63, %v4501_v50  ;;  %v4498_v42 = vpop.xlane.xlu1 %4497 }
0x1cb1   :  { %v4502_v10 = vsub.f32 %v4494_v23, %v4498_v42 }
0x1cb2   :  { %v4506_v4 = vmul.f32 1.442695, %v4503_v31  ;;  %v6484_v31 = vld [vmem:[%s9962_s15] ss:$0 sm:$0xff] }
0x1cb3   :  { %v4504_v37 = vmul.f32 1.442695, %v4502_v10  ;;  %v8058_v47 = vpop.permute.xlu0 %8057 }
0x1cb4   :  { %v8060_v6 = vunpack.i.h.bf16 %v8058_v47  ;;  %v8059_v35 = vunpack.i.l.bf16 %v8058_v47 }
0x1cb5   :  { %8201 = vpow2.f32 %v4504_v37 }
0x1cb6   :  { %v7570_v39 = vpack.c.bf16 %v8060_v6, %v8059_v35  ;;  %8203 = vpow2.f32 %v4506_v4 }
0x1cb8   :  { %7571 = vmatprep.subr.bf16.mxu0 %v7570_v39 }
0x1cb9   :  { %7573 = vmatpush3.bf16.msra.mxu0 %v7570_v39 }
0x1cba   :  { %7582 = vmatprep.subr.bf16.mxu0 %v8291_v20 }
0x1cbf   :  { %v8202_v5 = vpop.eup %8201 }
0x1cc0   :  { %v4508_v62 = vsel %vm1299_vm3, %v8202_v5, 0.0  ;;  %v8204_v59 = vpop.eup %8203 }
0x1cc1   :  { %4509 = vadd.xlane.f32.xlu1 %v4508_v62  ;;  %v4511_v61 = vsel %vm1299_vm3, %v8204_v59, 0.0 }
0x1cc5   :  { %4512 = vadd.xlane.f32.xlu1 %v4511_v61 }
0x1d4e   :  { %v4510_v58 = vpop.xlane.xlu1 %4509 }
0x1d4f   :  { %8205 = vrcp.f32 %v4510_v58 }
0x1d52   :  { %v4513_v25 = vpop.xlane.xlu1 %4512 }
0x1d53   :  { %8207 = vrcp.f32 %v4513_v25 }
0x1d59   :  { %v8206_v11 = vpop.eup %8205 }
0x1d5a   :  { %v4516_v18 = vmul.f32 %v8206_v11, %v8202_v5 }
0x1d5c   :  { %7323 = vmatprep.mubr.msk.f32.mxu0 %vm1299_vm3, %v4516_v18 }
0x1d5d   :  { %v8208_v1 = vpop.eup %8207 }
0x1d5e   :  { %v4517_v33 = vmul.f32 %v8208_v1, %v8204_v59 }
0x1d60   :  { %7324 = vmatmul.mubr.msk.f32.vlgmr.msra.gmra.mrb[50].mxu0 %vm1299_vm3, %v4517_v33 }
0x1d61   :  { %7584 = vmatpush3.bf16.msra.mxu0 %v6602_v13 }
0x1d62   :  { %7585 = vmatprep.subr.bf16.mxu0 %v8291_v20 }
0x1d65   :  { %7587 = vmatpush3.bf16.msra.mxu0 %v6603_v7 }
0x1e33   :  { %v7325_v57 = vpop.f32.mrb[50].mxu0 }
0x1e34   :  { %v4596_v44 = vpop.f32.mrb[51].mxu0 }
0x1e35   :  { %7330 = vmatprep.mubr.msk.f32.mxu1 %vm1299_vm3, %v4596_v44 }
0x1e36   :  { %7331 = vmatmul.mubr.msk.f32.vlgmr.msra.gmra.mrb[44].mxu1 %vm1299_vm3, %v7325_v57 }
0x1e37   :  { %7581 = vmatpush3.bf16.msra.mxu1 %v6566_v56  ;;  %7337 = vmatprep.mubr.msk.f32.mxu1 %vm1299_vm3, %v4392_v45  ;;  %v8293_v45 = vmov 0.0  }
0x1e38   :  { %7588 = vmatprep.subr.bf16.mxu1 %v8291_v20 }
0x1e3e   :  { %7338 = vmatmul.mubr.msk.f32.vlgmr.msra.gmra.mrb[44].mxu1 %vm1299_vm3, %v7311_v38  ;;  %v6601_v38 = vld [vmem:[%s9960_s10 + $0x8] sm:$0xff]   ;;  %vm8292_vm3 = vmmov 0  }
0x1e3f   :  { %7590 = vmatpush3.bf16.msra.mxu1 %v6574_v46  ;;  %7348 = vmatprep.mubr.msk.f32.mxu0 %vm8292_vm3, %v8293_v45 }
0x1e40   :  { %7591 = vmatprep.subr.bf16.mxu1 %v8291_v20  ;;  %7359 = vmatprep.mubr.msk.f32.mxu1 %vm8292_vm3, %v8293_v45 }
0x1e43   :  { %7593 = vmatpush3.bf16.msra.mxu1 %v6601_v38 }
0x1f11   :  { %v7339_v21 = vpop.f32.mrb[44].mxu1 }
0x1f12   :  { %v4758_v36 = vpop.f32.mrb[45].mxu1  ;;  %v4775_v48 = vadd.f32 %v7339_v21, %v6482_v34 }
0x1f13   :  { %v4774_v2 = vadd.f32 %v6482_v34, %v4758_v36 }
0x1f14   :  { %v4781_v51 = vsel %vm1137_vm2, %v4775_v48, 0.0 }
0x1f15   :  { %v4778_v40 = vsel %vm1137_vm2, %v4774_v2, 0.0 }
0x1f16   :  { %4779 = vadd.xlane.f32.xlu1 %v4778_v40  ;;  %v6489_v40 = vld [vmem:[%s9965_s22] ss:$0 sm:$0xff] }
0x1f1a   :  { %4782 = vadd.xlane.f32.xlu1 %v4781_v51 }
0x1fa3   :  { %v4780_v12 = vpop.xlane.xlu1 %4779 }
0x1fa4   :  { %v4784_v26 = vmul.f32 0.03125, %v4780_v12 }
0x1fa6   :  { %v4786_v43 = vsub.f32 %v4774_v2, %v4784_v26  ;;  %v6488_v2 = vld [vmem:[%s9964_s18] ss:$0 sm:$0xff] }
0x1fa7   :  { %v4783_v19 = vpop.xlane.xlu1 %4782 }
0x1fa8   :  { %v4785_v41 = vmul.f32 0.03125, %v4783_v19  ;;  %v4788_v29 = vmul.f32 %v4786_v43, %v4786_v43 }
0x1faa   :  { %v4787_v52 = vsub.f32 %v4775_v48, %v4785_v41  ;;  %v4790_v32 = vsel %vm1137_vm2, %v4788_v29, 0.0 }
0x1fab   :  { %4791 = vadd.xlane.f32.xlu1 %v4790_v32 }
0x1fac   :  { %v4789_v15 = vmul.f32 %v4787_v52, %v4787_v52 }
0x1fae   :  { %v4793_v22 = vsel %vm1137_vm2, %v4789_v15, 0.0 }
0x1faf   :  { %4794 = vadd.xlane.f32.xlu1 %v4793_v22 }
0x2038   :  { %v4792_v49 = vpop.xlane.xlu1 %4791 }
0x2039   :  { %v4796_v27 = vmul.f32 0.03125, %v4792_v49 }
0x203b   :  { %v4798_v53 = vadd.f32 1e-05, %v4796_v27 }
0x203c   :  { %v4795_v17 = vpop.xlane.xlu1 %4794 }
0x203d   :  { %8209 = vrsqrt.f32 %v4798_v53  ;;  %v4797_v63 = vmul.f32 0.03125, %v4795_v17 }
0x203f   :  { %v4799_v23 = vadd.f32 1e-05, %v4797_v63 }
0x2041   :  { %8211 = vrsqrt.f32 %v4799_v23 }
0x2047   :  { %v8210_v54 = vpop.eup %8209 }
0x2048   :  { %v4802_v50 = vmul.f32 %v8210_v54, %v4786_v43 }
0x204a   :  { %v4810_v42 = vmul.f32 %v6483_v55, %v4802_v50 }
0x204b   :  { %v8212_v10 = vpop.eup %8211 }
0x204c   :  { %v4818_v4 = vadd.f32 %v6484_v31, %v4810_v42  ;;  %v4803_v37 = vmul.f32 %v8212_v10, %v4787_v52 }
0x204e   :  { %v4820_v47 = vadd.f32 %v4818_v4, %v4083_v14  ;;  %v4811_v6 = vmul.f32 %v6483_v55, %v4803_v37  ;;  %v6487_v14 = vld [vmem:[%s9963_s16] ss:$0 sm:$0xff] }
0x2050   :  { %v4822_v35 = vmax.f32 %v4820_v47, 0.0  ;;  %v4819_v39 = vadd.f32 %v6484_v31, %v4811_v6 }
0x2052   :  { %4824 = vst.msk [vmem:[#allocation5] sm:$0xff] %vm1137_vm2, %v4822_v35  ;;  %v4821_v5 = vadd.f32 %v4819_v39, %v4084_v60 }
0x2054   :  { %v4823_v62 = vmax.f32 %v4821_v5, 0.0 }
0x2056   :  { %4825 = vst.msk [vmem:[#allocation5 + $0x8] sm:$0xff] %vm1137_vm2, %v4823_v62 }
0x205d   :  { %v4827_v59 = vld [vmem:[#allocation5 + $0x1] ss:$2 sm:$0xff]  ;;  %v4826_v61 = vld [vmem:[#allocation5] ss:$2 sm:$0xff] }
0x205e   :  { %7349 = vmatmul.mubr.msk.f32.vlgmr.msra.gmra.mrb[52].mxu0 %vm1137_vm2, %v4827_v59  ;;  %7360 = vmatmul.mubr.msk.f32.vlgmr.msra.gmra.mrb[46].mxu1 %vm1137_vm2, %v4826_v61 }
0x2131   :  { %v4913_v30 = vpop.f32.mrb[52].mxu0  ;;  %v4986_v28 = vpop.f32.mrb[46].mxu1 }
0x2132   :  { %v4987_v58 = vadd.f32 %v4986_v28, %v4913_v30  ;;  %v7350_v25 = vpop.f32.mrb[53].mxu0  ;;  %v7361_v11 = vpop.f32.mrb[47].mxu1 }
0x2134   :  { %v4997_v18 = vadd.f32 %v6487_v14, %v4987_v58 }
0x2136   :  { %v5000_v3 = vsel %vm1137_vm2, %v4997_v18, 0.0 }
0x2137   :  { %5001 = vadd.xlane.f32.xlu1 %v5000_v3 }
0x21c4   :  { %v5002_v60 = vpop.xlane.xlu1 %5001 }
0x21c5   :  { %v5003_v1 = vmul.f32 0.03125, %v5002_v60 }
0x21c7   :  { %v5004_v33 = vsub.f32 %v4997_v18, %v5003_v1 }
0x21c9   :  { %v5005_v56 = vmul.f32 %v5004_v33, %v5004_v33 }
0x21cb   :  { %v5006_v57 = vsel %vm1137_vm2, %v5005_v56, 0.0 }
0x21cc   :  { %5007 = vadd.xlane.f32.xlu1 %v5006_v57 }
0x2259   :  { %v5008_v44 = vpop.xlane.xlu1 %5007 }
0x225a   :  { %v5009_v34 = vmul.f32 0.03125, %v5008_v44 }
0x225c   :  { %v5010_v21 = vadd.f32 1e-05, %v5009_v34 }
0x225e   :  { %8213 = vrsqrt.f32 %v5010_v21 }
0x2268   :  { %v8214_v36 = vpop.eup %8213 }
0x2269   :  { %v5012_v48 = vmul.f32 %v8214_v36, %v5004_v33 }
0x226b   :  { %v5019_v51 = vmul.f32 %v6488_v2, %v5012_v48 }
0x226d   :  { %v5026_v12 = vadd.f32 %v6489_v40, %v5019_v51 }
0x226f   :  { %v5027_v26 = vmax.f32 %v5026_v12, 0.0 }
0x2271   :  { %5028 = vst.msk [vmem:[#allocation5] sm:$0xff] %vm1137_vm2, %v5027_v26 }
0x2278   :  { %v5032_v43 = vld [vmem:[#allocation5 + $0x2] ss:$4 sm:$0x3]  ;;  %v5030_v19 = vld [vmem:[#allocation5 + $0x1] ss:$4 sm:$0x3] }
0x2279   :  { %5040 = vrot.lane.b32.xlu1 %v5032_v43, %s8287_s5  ;;  %5036 = vrot.lane.b32.xlu0 %v5030_v19, %s8294_s23  ;;  %v5034_v41 = vld [vmem:[#allocation5 + $0x3] ss:$4 sm:$0x3]  ;;  %v5029_v52 = vld [vmem:[#allocation5] ss:$4 sm:$0x3] }
0x227d   :  { %5044 = vrot.lane.b32.xlu0 %v5034_v41, %s8285_s0 }
0x22eb   :  { %v5037_v29 = vpop.permute.xlu0 %5036  ;;  %v5041_v32 = vpop.permute.xlu1 %5040 }
0x22ec   :  { %v5047_v15 = vsel %vm1137_vm2, %v5029_v52, %v5037_v29 }
0x22ed   :  { %v5048_v20 = vsel %vm1453_vm9, %v5047_v15, %v5041_v32 }
0x22ef   :  { %v5045_v22 = vpop.permute.xlu0 %5044 }
0x22f0   :  { %v9671_v13 = vsel %vm5049_vm4, %v5048_v20, %v5045_v22 }
0x22f1   :  { %8239 = dma.done.wait [#allocation4], 8192 }
0x22f2   :  { %8240 = vsyncadd [#allocation4], 4294959104 }
0x22f3   :  { %8241 = dma.done.wait [#allocation4 + $0x1], 8192 }
0x22f4   :  { %8242 = vsyncadd [#allocation4 + $0x1], 4294959104  ;;  %5357 = vmatprep.mubr.f32.mxu0 %v8293_v45  ;;  %5428 = vmatprep.mubr.f32.mxu1 %v8293_v45  ;;  %v5060_v46 = vld [vmem:[#allocation2 + $0x8] sm:$0xff]  ;;  %v5059_v7 = vld [vmem:[#allocation2] sm:$0xff]  ;;  %s9987_s26 = sld [smem:[#allocation34_spill]]  ;;  %vm5579_vm2 = vcmask 1041408  }
0x22f5   :  { %v5062_v38 = vld [vmem:[#allocation2 + $0x18] sm:$0xff]  ;;  %7595 = vmatprep.subr.bf16.mxu0 %v5060_v46  ;;  %v5068_v49 = vld [vmem:[#allocation2 + $0x48] sm:$0xff]  ;;  %v5061_v27 = vld [vmem:[#allocation2 + $0x10] sm:$0xff]  ;;  %s9997_s0 = sld [smem:[#allocation35_spill]]  ;;  %vm6228_vm7 = vcmask 41984  }
0x22f6   :  { %7627 = vmatprep.subr.bf16.mxu1 %v5062_v38  ;;  %7597 = vmatpush1.bf16.msra.mxu0 %v5059_v7  ;;  %v5070_v53 = vld [vmem:[#allocation2 + $0x58] sm:$0xff]  ;;  %v5067_v17 = vld [vmem:[#allocation2 + $0x40] sm:$0xff]  ;;  %v5069_v63 = vld [vmem:[#allocation2 + $0x50] sm:$0xff] }
0x22f7   :  { %7629 = vmatpush1.bf16.msra.mxu1 %v5061_v27  ;;  %7599 = vmatprep.subr.bf16.mxu0 %v5068_v49  ;;  %v5076_v23 = vld [vmem:[#allocation2 + $0x88] sm:$0xff]  ;;  %v5078_v54 = vld [vmem:[#allocation2 + $0x98] sm:$0xff]  ;;  %v5075_v55 = vld [vmem:[#allocation2 + $0x80] sm:$0xff] }
0x22f8   :  { %7631 = vmatprep.subr.bf16.mxu1 %v5070_v53  ;;  %v5077_v50 = vld [vmem:[#allocation2 + $0x90] sm:$0xff]  ;;  %v5084_v31 = vld [vmem:[#allocation2 + $0xc8] sm:$0xff]  ;;  %v5086_v42 = vld [vmem:[#allocation2 + $0xd8] sm:$0xff] }
0x22f9   :  { %v5083_v10 = vld [vmem:[#allocation2 + $0xc0] sm:$0xff]  ;;  %v5085_v4 = vld [vmem:[#allocation2 + $0xd0] sm:$0xff]  ;;  %v5092_v37 = vld [vmem:[#allocation2 + $0x108] sm:$0xff] }
0x22fa   :  { %7601 = vmatpush1.bf16.msra.mxu0 %v5067_v17  ;;  %v5094_v47 = vld [vmem:[#allocation2 + $0x118] sm:$0xff]  ;;  %v5091_v6 = vld [vmem:[#allocation2 + $0x100] sm:$0xff]  ;;  %v5093_v35 = vld [vmem:[#allocation2 + $0x110] sm:$0xff] }
0x22fb   :  { %7633 = vmatpush1.bf16.msra.mxu1 %v5069_v63  ;;  %7603 = vmatprep.subr.bf16.mxu0 %v5076_v23  ;;  %v5100_v39 = vld [vmem:[#allocation2 + $0x148] sm:$0xff]  ;;  %v5102_v5 = vld [vmem:[#allocation2 + $0x158] sm:$0xff]  ;;  %v5099_v62 = vld [vmem:[#allocation2 + $0x140] sm:$0xff] }
0x22fc   :  { %7635 = vmatprep.subr.bf16.mxu1 %v5078_v54  ;;  %v5101_v59 = vld [vmem:[#allocation2 + $0x150] sm:$0xff]  ;;  %v5108_v61 = vld [vmem:[#allocation2 + $0x188] sm:$0xff]  ;;  %v5110_v30 = vld [vmem:[#allocation2 + $0x198] sm:$0xff] }
0x22fd   :  { %v5107_v28 = vld [vmem:[#allocation2 + $0x180] sm:$0xff]  ;;  %v5109_v14 = vld [vmem:[#allocation2 + $0x190] sm:$0xff]  ;;  %v5116_v58 = vld [vmem:[#allocation2 + $0x1c8] sm:$0xff] }
0x22fe   :  { %7605 = vmatpush1.bf16.msra.mxu0 %v5075_v55  ;;  %v5118_v25 = vld [vmem:[#allocation2 + $0x1d8] sm:$0xff]  ;;  %v5115_v11 = vld [vmem:[#allocation2 + $0x1c0] sm:$0xff]  ;;  %v5117_v18 = vld [vmem:[#allocation2 + $0x1d0] sm:$0xff] }
0x22ff   :  { %7637 = vmatpush1.bf16.msra.mxu1 %v5077_v50  ;;  %7607 = vmatprep.subr.bf16.mxu0 %v5084_v31  ;;  %v5064_v3 = vld [vmem:[#allocation2 + $0x28] sm:$0xff]  ;;  %v5066_v60 = vld [vmem:[#allocation2 + $0x38] sm:$0xff]  ;;  %v5063_v1 = vld [vmem:[#allocation2 + $0x20] sm:$0xff] }
0x2300   :  { %7639 = vmatprep.subr.bf16.mxu1 %v5086_v42  ;;  %v5065_v33 = vld [vmem:[#allocation2 + $0x30] sm:$0xff]  ;;  %v5072_v56 = vld [vmem:[#allocation2 + $0x68] sm:$0xff]  ;;  %v5074_v57 = vld [vmem:[#allocation2 + $0x78] sm:$0xff] }
0x2301   :  { %v5071_v44 = vld [vmem:[#allocation2 + $0x60] sm:$0xff]  ;;  %v5073_v34 = vld [vmem:[#allocation2 + $0x70] sm:$0xff]  ;;  %v5080_v21 = vld [vmem:[#allocation2 + $0xa8] sm:$0xff] }
0x2302   :  { %7609 = vmatpush1.bf16.msra.mxu0 %v5083_v10  ;;  %v5082_v36 = vld [vmem:[#allocation2 + $0xb8] sm:$0xff]  ;;  %v5079_v2 = vld [vmem:[#allocation2 + $0xa0] sm:$0xff]  ;;  %v5081_v48 = vld [vmem:[#allocation2 + $0xb0] sm:$0xff] }
0x2303   :  { %7641 = vmatpush1.bf16.msra.mxu1 %v5085_v4  ;;  %7611 = vmatprep.subr.bf16.mxu0 %v5092_v37  ;;  %v5088_v40 = vld [vmem:[#allocation2 + $0xe8] sm:$0xff]  ;;  %v5090_v51 = vld [vmem:[#allocation2 + $0xf8] sm:$0xff]  ;;  %v5087_v12 = vld [vmem:[#allocation2 + $0xe0] sm:$0xff] }
0x2304   :  { %7643 = vmatprep.subr.bf16.mxu1 %v5094_v47  ;;  %v5089_v26 = vld [vmem:[#allocation2 + $0xf0] sm:$0xff]  ;;  %v5096_v43 = vld [vmem:[#allocation2 + $0x128] sm:$0xff]  ;;  %v5098_v19 = vld [vmem:[#allocation2 + $0x138] sm:$0xff] }
0x2305   :  { %v5097_v41 = vld [vmem:[#allocation2 + $0x130] sm:$0xff]  ;;  %v5104_v29 = vld [vmem:[#allocation2 + $0x168] sm:$0xff]  ;;  %v5106_v52 = vld [vmem:[#allocation2 + $0x178] sm:$0xff] }
0x2306   :  { %7613 = vmatpush1.bf16.msra.mxu0 %v5091_v6  ;;  %v5103_v32 = vld [vmem:[#allocation2 + $0x160] sm:$0xff]  ;;  %v5105_v15 = vld [vmem:[#allocation2 + $0x170] sm:$0xff]  ;;  %v5112_v22 = vld [vmem:[#allocation2 + $0x1a8] sm:$0xff] }
0x2307   :  { %7645 = vmatpush1.bf16.msra.mxu1 %v5093_v35  ;;  %7615 = vmatprep.subr.bf16.mxu0 %v5100_v39  ;;  %v5114_v20 = vld [vmem:[#allocation2 + $0x1b8] sm:$0xff]  ;;  %v5111_v46 = vld [vmem:[#allocation2 + $0x1a0] sm:$0xff]  ;;  %v5113_v7 = vld [vmem:[#allocation2 + $0x1b0] sm:$0xff] }
0x2308   :  { %7647 = vmatprep.subr.bf16.mxu1 %v5102_v5  ;;  %v5120_v38 = vld [vmem:[#allocation2 + $0x1e8] sm:$0xff]  ;;  %v5122_v49 = vld [vmem:[#allocation2 + $0x1f8] sm:$0xff]  ;;  %v5119_v27 = vld [vmem:[#allocation2 + $0x1e0] sm:$0xff] }
0x2309   :  { %v5121_v53 = vld [vmem:[#allocation2 + $0x1f0] sm:$0xff]  ;;  %v9966_v17 = vld [vmem:[#allocation56_spill] sm:$0xff]  ;;  %v9969_v54 = vld [vmem:[#allocation43_spill] sm:$0xff] }
0x230a   :  { %7617 = vmatpush1.bf16.msra.mxu0 %v5099_v62  ;;  %v9967_v63 = vld [vmem:[#allocation36_spill] sm:$0xff]  ;;  %v9968_v23 = vld [vmem:[#allocation49_spill] sm:$0xff]  ;;  %v9972_v55 = vld [vmem:[#allocation50_spill] sm:$0xff] }
0x230b   :  { %7649 = vmatpush1.bf16.msra.mxu1 %v5101_v59  ;;  %7619 = vmatprep.subr.bf16.mxu0 %v5108_v61  ;;  %v9977_v50 = vld [vmem:[#allocation45_spill] sm:$0xff]  ;;  %v9978_v31 = vld [vmem:[#allocation59_spill] sm:$0xff]  ;;  %v9980_v10 = vld [vmem:[#allocation52_spill] sm:$0xff] }
0x230c   :  { %7651 = vmatprep.subr.bf16.mxu1 %v5110_v30  ;;  %v9979_v42 = vld [vmem:[#allocation39_spill] sm:$0xff]  ;;  %v9981_v4 = vld [vmem:[#allocation46_spill] sm:$0xff]  ;;  %v9982_v37 = vld [vmem:[#allocation60_spill] sm:$0xff] }
0x230d   :  { %v9983_v47 = vld [vmem:[#allocation40_spill] sm:$0xff]  ;;  %v9984_v6 = vld [vmem:[#allocation53_spill] sm:$0xff]  ;;  %v9985_v35 = vld [vmem:[#allocation47_spill] sm:$0xff] }
0x230e   :  { %7621 = vmatpush1.bf16.msra.mxu0 %v5107_v28  ;;  %v9986_v39 = vld [vmem:[#allocation61_spill] sm:$0xff]  ;;  %v9989_v62 = vld [vmem:[#allocation54_spill] sm:$0xff]  ;;  %v9990_v59 = vld [vmem:[#allocation48_spill] sm:$0xff] }
0x230f   :  { %7653 = vmatpush1.bf16.msra.mxu1 %v5109_v14  ;;  %7623 = vmatprep.subr.bf16.mxu0 %v5116_v58  ;;  %v9988_v5 = vld [vmem:[#allocation41_spill] sm:$0xff]  ;;  %v9991_v61 = vld [vmem:[#allocation62_spill] sm:$0xff]  ;;  %v9993_v28 = vld [vmem:[#allocation55_spill] sm:$0xff] }
0x2310   :  { %7655 = vmatprep.subr.bf16.mxu1 %v5118_v25  ;;  %v9992_v30 = vld [vmem:[#allocation42_spill] sm:$0xff]  ;;  %v9994_v14 = vld [vmem:[#allocation71_spill] sm:$0xff] }
0x2311   :  { %v9995_v58 = vld [vmem:[#allocation87_spill] sm:$0xff] }
0x2312   :  { %7625 = vmatpush1.bf16.msra.mxu0 %v5115_v11 }
0x2313   :  { %7657 = vmatpush1.bf16.msra.mxu1 %v5117_v18  ;;  %7659 = vmatprep.subr.bf16.mxu0 %v5064_v3 }
0x2314   :  { %7691 = vmatprep.subr.bf16.mxu1 %v5066_v60  ;;  %v9996_v60 = vld [vmem:[#allocation95_spill] sm:$0xff] }
0x2315   :  { %5358 = vmatmul.mubr.f32.vlgmr.msra.gmra.mrb[54].mxu0 %v9671_v13 }
0x2316   :  { %5429 = vmatmul.mubr.f32.vlgmr.msra.gmra.mrb[48].mxu1 %v9671_v13  ;;  %7661 = vmatpush1.bf16.msra.mxu0 %v5063_v1  ;;  %v9716_v1 = vsub.s32 0, %v9996_v60 }
0x2317   :  { %7693 = vmatpush1.bf16.msra.mxu1 %v5065_v33  ;;  %7663 = vmatprep.subr.bf16.mxu0 %v5072_v56  ;;  %v9719_v33 = vsub.s32 1, %v9996_v60  ;;  %v5251_v56 = vld [vmem:[%s9987_s26] sm:$0xff] }
0x2318   :  { %7695 = vmatprep.subr.bf16.mxu1 %v5074_v57  ;;  %5499 = vmatprep.mubr.f32.mxu0 %v8293_v45  ;;  %v5256_v57 = vrot.slane %v5251_v56, %v9716_v1 }
0x2319   :  { %5570 = vmatprep.mubr.f32.mxu1 %v8293_v45  ;;  %v5095_v45 = vld [vmem:[#allocation2 + $0x120] sm:$0xff] }
0x231a   :  { %7665 = vmatpush1.bf16.msra.mxu0 %v5071_v44  ;;  %v5260_v44 = vrot.slane %v5251_v56, %v9719_v33 }
0x231b   :  { %7697 = vmatpush1.bf16.msra.mxu1 %v5073_v34  ;;  %7667 = vmatprep.subr.bf16.mxu0 %v5080_v21  ;;  %v9725_v34 = vsub.s32 2, %v9996_v60 }
0x231c   :  { %7699 = vmatprep.subr.bf16.mxu1 %v5082_v36 }
0x231e   :  { %7669 = vmatpush1.bf16.msra.mxu0 %v5079_v2  ;;  %v5264_v2 = vrot.slane %v5251_v56, %v9725_v34 }
0x231f   :  { %7701 = vmatpush1.bf16.msra.mxu1 %v5081_v48  ;;  %7671 = vmatprep.subr.bf16.mxu0 %v5088_v40  ;;  %v9729_v48 = vsub.s32 3, %v9996_v60 }
0x2320   :  { %7703 = vmatprep.subr.bf16.mxu1 %v5090_v51 }
0x2322   :  { %7673 = vmatpush1.bf16.msra.mxu0 %v5087_v12 }
0x2323   :  { %7705 = vmatpush1.bf16.msra.mxu1 %v5089_v26  ;;  %7675 = vmatprep.subr.bf16.mxu0 %v5096_v43  ;;  %v5268_v26 = vrot.slane %v5251_v56, %v9729_v48  ;;  %v9735_v43 = vsub.s32 4, %v9996_v60 }
0x2324   :  { %7707 = vmatprep.subr.bf16.mxu1 %v5098_v19  ;;  %v9738_v19 = vsub.s32 6, %v9996_v60 }
0x2326   :  { %7677 = vmatpush1.bf16.msra.mxu0 %v5095_v45 }
0x2327   :  { %7709 = vmatpush1.bf16.msra.mxu1 %v5097_v41  ;;  %7679 = vmatprep.subr.bf16.mxu0 %v5104_v29  ;;  %v9741_v41 = vsub.s32 5, %v9996_v60 }
0x2328   :  { %7711 = vmatprep.subr.bf16.mxu1 %v5106_v52 }
0x232a   :  { %7681 = vmatpush1.bf16.msra.mxu0 %v5103_v32  ;;  %v5272_v32 = vrot.slane %v5251_v56, %v9735_v43 }
0x232b   :  { %7713 = vmatpush1.bf16.msra.mxu1 %v5105_v15  ;;  %7683 = vmatprep.subr.bf16.mxu0 %v5112_v22  ;;  %v5280_v15 = vrot.slane %v5251_v56, %v9738_v19  ;;  %v9747_v22 = vsub.s32 7, %v9996_v60 }
0x232c   :  { %7715 = vmatprep.subr.bf16.mxu1 %v5114_v20 }
0x232e   :  { %7685 = vmatpush1.bf16.msra.mxu0 %v5111_v46  ;;  %v5276_v46 = vrot.slane %v5251_v56, %v9741_v41 }
0x232f   :  { %7717 = vmatpush1.bf16.msra.mxu1 %v5113_v7  ;;  %7687 = vmatprep.subr.bf16.mxu0 %v5120_v38 }
0x2330   :  { %7719 = vmatprep.subr.bf16.mxu1 %v5122_v49 }
0x2332   :  { %7689 = vmatpush1.bf16.msra.mxu0 %v5119_v27 }
0x2333   :  { %7721 = vmatpush1.bf16.msra.mxu1 %v5121_v53  ;;  %7723 = vmatprep.subr.bf16.mxu0 %v8659_v8  ;;  %v9970_v8 = vld [vmem:[#allocation57_spill] sm:$0xff] }
0x2334   :  { %7755 = vmatprep.subr.bf16.mxu1 %v8707_v24  ;;  %v9971_v24 = vld [vmem:[#allocation37_spill] sm:$0xff] }
0x2335   :  { %5500 = vmatmul.mubr.f32.vlgmr.msra.gmra.mrb[56].mxu0 %v9671_v13 }
0x2336   :  { %5571 = vmatmul.mubr.f32.vlgmr.msra.gmra.mrb[50].mxu1 %v9671_v13  ;;  %7725 = vmatpush3.bf16.msra.mxu0 %v8635_v0  ;;  %v9973_v13 = vld [vmem:[#allocation44_spill] sm:$0xff]  ;;  %v9974_v0 = vld [vmem:[#allocation58_spill] sm:$0xff] }
0x2337   :  { %7757 = vmatpush3.bf16.msra.mxu1 %v8683_v16  ;;  %7727 = vmatprep.subr.bf16.mxu0 %v8662_v9  ;;  %v9975_v16 = vld [vmem:[#allocation38_spill] sm:$0xff]  ;;  %v9976_v9 = vld [vmem:[#allocation51_spill] sm:$0xff] }
0x2338   :  { %7759 = vmatprep.subr.bf16.mxu1 %v9966_v17 }
0x233a   :  { %7729 = vmatpush3.bf16.msra.mxu0 %v9967_v63  ;;  %v5284_v63 = vrot.slane %v5251_v56, %v9747_v22 }
0x233b   :  { %7761 = vmatpush3.bf16.msra.mxu1 %v9968_v23  ;;  %7731 = vmatprep.subr.bf16.mxu0 %v9969_v54 }
0x233c   :  { %7763 = vmatprep.subr.bf16.mxu1 %v9970_v8 }
0x233e   :  { %7733 = vmatpush3.bf16.msra.mxu0 %v9971_v24 }
0x233f   :  { %7765 = vmatpush3.bf16.msra.mxu1 %v9972_v55  ;;  %7735 = vmatprep.subr.bf16.mxu0 %v9973_v13 }
0x2340   :  { %7767 = vmatprep.subr.bf16.mxu1 %v9974_v0 }
0x2342   :  { %7737 = vmatpush3.bf16.msra.mxu0 %v9975_v16 }
0x2343   :  { %7769 = vmatpush3.bf16.msra.mxu1 %v9976_v9  ;;  %7739 = vmatprep.subr.bf16.mxu0 %v9977_v50 }
0x2344   :  { %7771 = vmatprep.subr.bf16.mxu1 %v9978_v31 }
0x2346   :  { %7741 = vmatpush3.bf16.msra.mxu0 %v9979_v42 }
0x2347   :  { %7773 = vmatpush3.bf16.msra.mxu1 %v9980_v10  ;;  %7743 = vmatprep.subr.bf16.mxu0 %v9981_v4 }
0x2348   :  { %7775 = vmatprep.subr.bf16.mxu1 %v9982_v37 }
0x234a   :  { %7745 = vmatpush3.bf16.msra.mxu0 %v9983_v47 }
0x234b   :  { %7777 = vmatpush3.bf16.msra.mxu1 %v9984_v6  ;;  %7747 = vmatprep.subr.bf16.mxu0 %v9985_v35 }
0x234c   :  { %7779 = vmatprep.subr.bf16.mxu1 %v9986_v39 }
0x234e   :  { %7749 = vmatpush3.bf16.msra.mxu0 %v9988_v5 }
0x234f   :  { %7781 = vmatpush3.bf16.msra.mxu1 %v9989_v62  ;;  %7751 = vmatprep.subr.bf16.mxu0 %v9990_v59 }
0x2350   :  { %7783 = vmatprep.subr.bf16.mxu1 %v9991_v61 }
0x2352   :  { %7753 = vmatpush3.bf16.msra.mxu0 %v9992_v30 }
0x2353   :  { %7785 = vmatpush3.bf16.msra.mxu1 %v9993_v28  ;;  %7787 = vmatprep.subr.bf16.mxu0 %v9994_v14 }
0x2354   :  { %7819 = vmatprep.subr.bf16.mxu1 %v9995_v58 }
0x23e8   :  { %v5359_v25 = vpop.f32.mrb[54].mxu0 }
0x23e9   :  { %v5430_v11 = vpop.f32.mrb[48].mxu1  ;;  %v5361_v18 = vpop.f32.mrb[55].mxu0  ;;  %v5360_v21 = vadd.f32 %v5359_v25, %v5256_v57 }
0x23ea   :  { %v5432_v3 = vpop.f32.mrb[49].mxu1  ;;  %v5362_v36 = vadd.f32 %v5361_v18, %v5260_v44  ;;  %v5431_v12 = vadd.f32 %v5430_v11, %v5264_v2 }
0x23eb   :  { %v5580_v40 = vsel %vm5579_vm2, %v5360_v21, 0.0  ;;  %v5433_v52 = vadd.f32 %v5432_v3, %v5268_v26 }
0x23ec   :  { %v5581_v51 = vsel %vm5579_vm2, %v5362_v36, 0.0  ;;  %v5583_v29 = vsel %vm5579_vm2, %v5431_v12, 0.0 }
0x23ed   :  { %v5582_v45 = vadd.f32 %v5581_v51, %v5580_v40  ;;  %v5585_v7 = vsel %vm5579_vm2, %v5433_v52, 0.0 }
0x23ef   :  { %v5584_v20 = vadd.f32 %v5583_v29, %v5582_v45 }
0x23f1   :  { %v5586_v54 = vadd.f32 %v5585_v7, %v5584_v20  ;;  %v9776_v7 = vld [vmem:[%s8489_s4] sm:$0xff]  ;;  %s8295_s4 = smov [#allocation6]  }
0x23f2   :  { %s6236_s5 = sshll.u32 %s8295_s4, 4  ;;  %s6237_s5 = int_to_ptr.vmem [resolvable:$true] %s6236_s5 }
0x23f3   :  { %p8222_p1 = scmp.lt.s32.totalorder %s6237_s5, %s6237_s5 }
0x2408   :  { %v5501_v38 = vpop.f32.mrb[56].mxu0 }
0x2409   :  { %v5572_v49 = vpop.f32.mrb[50].mxu1  ;;  %v5502_v27 = vadd.f32 %v5501_v38, %v5272_v32  ;;  %v5503_v53 = vpop.f32.mrb[57].mxu0 }
0x240a   :  { %v5573_v17 = vadd.f32 %v5572_v49, %v5280_v15  ;;  %v5574_v23 = vpop.f32.mrb[51].mxu1  ;;  %v5504_v8 = vadd.f32 %v5503_v53, %v5276_v46  ;;  %v9773_v46 = vld [vmem:[%s9997_s0] sm:$0xff]  ;;  %v5700_v53 = vrot.slane %v9776_v7, %v9719_v33 }
0x240b   :  { %v5587_v24 = vsel %vm5579_vm2, %v5502_v27, 0.0  ;;  %v5575_v16 = vadd.f32 %v5574_v23, %v5284_v63  ;;  %v5647_v38 = vrot.slane %v9773_v46, %v9716_v1  ;;  %v5655_v49 = vrot.slane %v9773_v46, %v9725_v34 }
0x240c   :  { %v5588_v55 = vadd.f32 %v5587_v24, %v5586_v54  ;;  %v5589_v13 = vsel %vm5579_vm2, %v5504_v8, 0.0  ;;  %v5591_v0 = vsel %vm5579_vm2, %v5573_v17, 0.0  ;;  %v5667_v63 = vrot.slane %v9773_v46, %v9741_v41 }
0x240d   :  { %v5593_v31 = vsel %vm5579_vm2, %v5575_v16, 0.0  ;;  %v5708_v54 = vrot.slane %v9776_v7, %v9729_v48  ;;  %v5704_v24 = vrot.slane %v9776_v7, %v9725_v34 }
0x240e   :  { %v5590_v9 = vadd.f32 %v5589_v13, %v5588_v55  ;;  %v5675_v55 = vrot.slane %v9773_v46, %v9747_v22 }
0x2410   :  { %v5592_v50 = vadd.f32 %v5591_v0, %v5590_v9 }
0x2412   :  { %v5594_v42 = vadd.f32 %v5593_v31, %v5592_v50  ;;  %v5716_v50 = vrot.slane %v9776_v7, %v9741_v41 }
0x2414   :  { %5595 = vadd.xlane.f32.xlu0 %v5594_v42 }
0x24a1   :  { %v5596_v10 = vpop.xlane.xlu0 %5595 }
0x24a2   :  { %v5598_v4 = vmul.f32 0.0009765625, %v5596_v10 }
0x24a4   :  { %v5599_v37 = vsub.f32 %v5360_v21, %v5598_v4  ;;  %v5600_v47 = vsub.f32 %v5362_v36, %v5598_v4  ;;  %v5601_v6 = vsub.f32 %v5431_v12, %v5598_v4  ;;  %v5602_v35 = vsub.f32 %v5433_v52, %v5598_v4 }
0x24a5   :  { %v9756_v39 = vsub.f32 %v5502_v27, %v5598_v4  ;;  %v5604_v61 = vsub.f32 %v5504_v8, %v5598_v4  ;;  %v9760_v25 = vsub.f32 %v5573_v17, %v5598_v4  ;;  %v5606_v60 = vsub.f32 %v5575_v16, %v5598_v4 }
0x24a6   :  { %v5607_v5 = vmul.f32 %v5599_v37, %v5599_v37  ;;  %v5608_v62 = vmul.f32 %v5600_v47, %v5600_v47  ;;  %v5609_v59 = vmul.f32 %v5601_v6, %v5601_v6  ;;  %v5610_v30 = vmul.f32 %v5602_v35, %v5602_v35 }
0x24a7   :  { %v5611_v11 = vmul.f32 %v9756_v39, %v9756_v39  ;;  %v5612_v56 = vmul.f32 %v5604_v61, %v5604_v61  ;;  %v5613_v21 = vmul.f32 %v9760_v25, %v9760_v25  ;;  %v5614_v40 = vmul.f32 %v5606_v60, %v5606_v60 }
0x24a8   :  { %v5615_v28 = vsel %vm5579_vm2, %v5607_v5, 0.0  ;;  %v5616_v14 = vsel %vm5579_vm2, %v5608_v62, 0.0  ;;  %v5618_v18 = vsel %vm5579_vm2, %v5609_v59, 0.0  ;;  %v5620_v57 = vsel %vm5579_vm2, %v5610_v30, 0.0 }
0x24a9   :  { %v5617_v58 = vadd.f32 %v5616_v14, %v5615_v28  ;;  %v5622_v36 = vsel %vm5579_vm2, %v5611_v11, 0.0  ;;  %v5624_v51 = vsel %vm5579_vm2, %v5612_v56, 0.0  ;;  %v5626_v26 = vsel %vm5579_vm2, %v5613_v21, 0.0  ;;  %v9999_v11 = vld [vmem:[#allocation79_spill] sm:$0xff]  ;;  %v10003_v56 = vld [vmem:[#allocation80_spill] sm:$0xff]  ;;  %v10006_v21 = vld [vmem:[#allocation65_spill] sm:$0xff] }
0x24aa   :  { %v5628_v29 = vsel %vm5579_vm2, %v5614_v40, 0.0  ;;  %v5651_v27 = vrot.slane %v9773_v46, %v9719_v33  ;;  %v5659_v17 = vrot.slane %v9773_v46, %v9729_v48  ;;  %v5696_v8 = vrot.slane %v9776_v7, %v9716_v1  ;;  %v10009_v40 = vld [vmem:[#allocation90_spill] sm:$0xff] }
0x24ab   :  { %v5619_v3 = vadd.f32 %v5618_v18, %v5617_v58  ;;  %v5724_v48 = vrot.slane %v9776_v7, %v9747_v22  ;;  %v9998_v58 = vld [vmem:[#allocation63_spill] sm:$0xff]  ;;  %v10000_v18 = vld [vmem:[#allocation72_spill] sm:$0xff] }
0x24ad   :  { %v5621_v44 = vadd.f32 %v5620_v57, %v5619_v3  ;;  %v10001_v3 = vld [vmem:[#allocation88_spill] sm:$0xff]  ;;  %v10004_v57 = vld [vmem:[#allocation73_spill] sm:$0xff] }
0x24af   :  { %v5623_v2 = vadd.f32 %v5622_v36, %v5621_v44  ;;  %v10005_v44 = vld [vmem:[#allocation89_spill] sm:$0xff] }
0x24b0   :  { %v10007_v36 = vld [vmem:[#allocation81_spill] sm:$0xff] }
0x24b1   :  { %v5625_v12 = vadd.f32 %v5624_v51, %v5623_v2  ;;  %v10008_v2 = vld [vmem:[#allocation74_spill] sm:$0xff] }
0x24b2   :  { %v10010_v51 = vld [vmem:[#allocation66_spill] sm:$0xff] }
0x24b3   :  { %v5627_v45 = vadd.f32 %v5626_v26, %v5625_v12  ;;  %v10011_v12 = vld [vmem:[#allocation82_spill] sm:$0xff]  ;;  %v10012_v26 = vld [vmem:[#allocation75_spill] sm:$0xff] }
0x24b5   :  { %v5629_v52 = vadd.f32 %v5628_v29, %v5627_v45  ;;  %v10013_v45 = vld [vmem:[#allocation91_spill] sm:$0xff]  ;;  %v5663_v29 = vrot.slane %v9773_v46, %v9735_v43 }
0x24b7   :  { %5630 = vadd.xlane.f32.xlu0 %v5629_v52  ;;  %v10014_v52 = vld [vmem:[#allocation67_spill] sm:$0xff] }
0x2544   :  { %v5631_v32 = vpop.xlane.xlu0 %5630 }
0x2545   :  { %v5632_v15 = vmul.f32 0.0009765625, %v5631_v32  ;;  %v10015_v32 = vld [vmem:[#allocation83_spill] sm:$0xff] }
0x2547   :  { %v5633_v20 = vadd.f32 1e-05, %v5632_v15  ;;  %v5671_v15 = vrot.slane %v9773_v46, %v9738_v19 }
0x2549   :  { %8215 = vrsqrt.f32 %v5633_v20  ;;  %v10016_v20 = vld [vmem:[#allocation76_spill] sm:$0xff] }
0x2553   :  { %v8216_v23 = vpop.eup %8215 }
0x2554   :  { %v5636_v33 = vmul.f32 %v8216_v23, %v5600_v47  ;;  %v5638_v13 = vmul.f32 %v8216_v23, %v5602_v35  ;;  %v5635_v0 = vmul.f32 %v8216_v23, %v5599_v37  ;;  %v5637_v16 = vmul.f32 %v8216_v23, %v5601_v6 }
0x2555   :  { %v5640_v9 = vmul.f32 %v8216_v23, %v5604_v61  ;;  %v5642_v31 = vmul.f32 %v8216_v23, %v5606_v60  ;;  %v10002_v60 = vld [vmem:[#allocation64_spill] sm:$0xff] }
0x2556   :  { %v5685_v42 = vmul.f32 %v5651_v27, %v5636_v33  ;;  %v5687_v1 = vmul.f32 %v5659_v17, %v5638_v13  ;;  %v5684_v10 = vmul.f32 %v5647_v38, %v5635_v0  ;;  %v5686_v4 = vmul.f32 %v5655_v49, %v5637_v16  ;;  %v10017_v38 = vld [vmem:[#allocation92_spill] sm:$0xff]  ;;  %v10025_v33 = vld [vmem:[#allocation94_spill] sm:$0xff] }
0x2557   :  { %v5689_v34 = vmul.f32 %v5667_v63, %v5640_v9  ;;  %v5691_v5 = vmul.f32 %v5675_v55, %v5642_v31  ;;  %v5639_v49 = vmul.f32 %v8216_v23, %v9756_v39  ;;  %v5641_v27 = vmul.f32 %v8216_v23, %v9760_v25  ;;  %v10019_v17 = vld [vmem:[#allocation84_spill] sm:$0xff]  ;;  %v10022_v39 = vld [vmem:[#allocation69_spill] sm:$0xff]  ;;  %v10024_v23 = vld [vmem:[#allocation78_spill] sm:$0xff] }
0x2558   :  { %v5734_v62 = vadd.f32 %v5700_v53, %v5685_v42  ;;  %v5736_v59 = vadd.f32 %v5708_v54, %v5687_v1  ;;  %v5733_v47 = vadd.f32 %v5696_v8, %v5684_v10  ;;  %v5735_v35 = vadd.f32 %v5704_v24, %v5686_v4  ;;  %v10018_v53 = vld [vmem:[#allocation68_spill] sm:$0xff]  ;;  %v10020_v54 = vld [vmem:[#allocation77_spill] sm:$0xff]  ;;  %v10026_v0 = vld [vmem:[#allocation70_spill] sm:$0xff] }
0x2559   :  { %v5738_v37 = vadd.f32 %v5716_v50, %v5689_v34  ;;  %v5740_v6 = vadd.f32 %v5724_v48, %v5691_v5  ;;  %v5712_v63 = vrot.slane %v9776_v7, %v9735_v43  ;;  %v10021_v8 = vld [vmem:[#allocation93_spill] sm:$0xff]  ;;  %v5688_v46 = vmul.f32 %v5663_v29, %v5639_v49  ;;  %v10027_v16 = vld [vmem:[#allocation86_spill] sm:$0xff] }
0x255a   :  { %v5742_v61 = vmax.f32 %v5734_v62, 0.0  ;;  %v5744_v30 = vmax.f32 %v5736_v59, 0.0  ;;  %v5741_v28 = vmax.f32 %v5733_v47, 0.0  ;;  %v5743_v41 = vmax.f32 %v5735_v35, 0.0  ;;  %v10023_v25 = vld [vmem:[#allocation85_spill] sm:$0xff] }
0x255b   :  { %v5746_v22 = vmax.f32 %v5738_v37, 0.0  ;;  %v5748_v14 = vmax.f32 %v5740_v6, 0.0  ;;  %v5690_v24 = vmul.f32 %v5671_v15, %v5641_v27  ;;  %v5720_v55 = vrot.slane %v9776_v7, %v9738_v19  ;;  %v6490_v7 = vld [vmem:[%s8499_s20] ss:$0 sm:$0xff]  ;;  %s8217_s20 = scalar_lea.vmem %s6237_s5, 32 }
0x255c   :  { %6012 = vmatprep.mubr.f32.mxu0 %v5742_v61  ;;  %6082 = vmatprep.mubr.f32.mxu1 %v5744_v30  ;;  %v5737_v13 = vadd.f32 %v5712_v63, %v5688_v46  ;;  %p8218_p0 = scmp.ne.s32.totalorder %s6237_s5, %s8217_s20  ;;  %p8223_p2 = scmp.lt.s32.totalorder %s8217_s20, %s8217_s20 }
0x255d   :  { %6013 = vmatmul.mubr.f32.vlgmr.msra.gmra.mrb[58].mxu0 %v5741_v28  ;;  %6083 = vmatmul.mubr.f32.vlgmr.msra.gmra.mrb[52].mxu1 %v5743_v41  ;;  %v5739_v43 = vadd.f32 %v5720_v55, %v5690_v24 }
0x255e   :  { %7789 = vmatpush3.bf16.msra.mxu0 %v9998_v58  ;;  %7821 = vmatpush3.bf16.msra.mxu1 %v9999_v11  ;;  %v5745_v9 = vmax.f32 %v5737_v13, 0.0  ;;  %p8224_p3 = por %p8223_p2, %p8222_p1 }
0x255f   :  { %6152 = vmatprep.mubr.f32.mxu0 %v5746_v22  ;;  %6222 = vmatprep.mubr.f32.mxu1 %v5748_v14  ;;  %v5747_v50 = vmax.f32 %v5739_v43, 0.0 }
0x2560   :  { %7791 = vmatprep.subr.bf16.mxu0 %v10000_v18  ;;  %7823 = vmatprep.subr.bf16.mxu1 %v10001_v3  ;;  %p8225_p4 = pnand %p8224_p3, %p8218_p0 }
0x2562   :  { %7793 = vmatpush3.bf16.msra.mxu0 %v10002_v60  ;;  %7825 = vmatpush3.bf16.msra.mxu1 %v10003_v56 }
0x2563   :  { %7795 = vmatprep.subr.bf16.mxu0 %v10004_v57  ;;  %7827 = vmatprep.subr.bf16.mxu1 %v10005_v44 }
0x2566   :  { %7797 = vmatpush3.bf16.msra.mxu0 %v10006_v21  ;;  %7829 = vmatpush3.bf16.msra.mxu1 %v10007_v36 }
0x2567   :  { %7799 = vmatprep.subr.bf16.mxu0 %v10008_v2  ;;  %7831 = vmatprep.subr.bf16.mxu1 %v10009_v40 }
0x256a   :  { %7801 = vmatpush3.bf16.msra.mxu0 %v10010_v51  ;;  %7833 = vmatpush3.bf16.msra.mxu1 %v10011_v12 }
0x256b   :  { %7803 = vmatprep.subr.bf16.mxu0 %v10012_v26  ;;  %7835 = vmatprep.subr.bf16.mxu1 %v10013_v45 }
0x256e   :  { %7805 = vmatpush3.bf16.msra.mxu0 %v10014_v52  ;;  %7837 = vmatpush3.bf16.msra.mxu1 %v10015_v32 }
0x256f   :  { %7807 = vmatprep.subr.bf16.mxu0 %v10016_v20  ;;  %7839 = vmatprep.subr.bf16.mxu1 %v10017_v38 }
0x2572   :  { %7809 = vmatpush3.bf16.msra.mxu0 %v10018_v53  ;;  %7841 = vmatpush3.bf16.msra.mxu1 %v10019_v17 }
0x2573   :  { %7811 = vmatprep.subr.bf16.mxu0 %v10020_v54  ;;  %7843 = vmatprep.subr.bf16.mxu1 %v10021_v8 }
0x2576   :  { %7813 = vmatpush3.bf16.msra.mxu0 %v10022_v39  ;;  %7845 = vmatpush3.bf16.msra.mxu1 %v10023_v25 }
0x2577   :  { %7815 = vmatprep.subr.bf16.mxu0 %v10024_v23  ;;  %7847 = vmatprep.subr.bf16.mxu1 %v10025_v33 }
0x257a   :  { %7817 = vmatpush3.bf16.msra.mxu0 %v10026_v0  ;;  %7849 = vmatpush3.bf16.msra.mxu1 %v10027_v16 }
0x257d   :  { %6153 = vmatmul.mubr.f32.vlgmr.msra.gmra.mrb[60].mxu0 %v5745_v9  ;;  %6223 = vmatmul.mubr.f32.vlgmr.msra.gmra.mrb[54].mxu1 %v5747_v50 }
0x2630   :  { %v6861_v31 = vpop.f32.mrb[58].mxu0  ;;  %v6896_v19 = vpop.f32.mrb[52].mxu1 }
0x2631   :  { %v6862_v48 = vpop.f32.mrb[59].mxu0  ;;  %v6897_v42 = vpop.f32.mrb[53].mxu1 }
0x2632   :  { %v6863_v1 = vadd.f32 %v6862_v48, %v6861_v31  ;;  %v6898_v10 = vadd.f32 %v6897_v42, %v6896_v19 }
0x2634   :  { %v6015_v4 = vadd.f32 %v6863_v1, %v6490_v7 }
0x2636   :  { %v6085_v34 = vadd.f32 %v6898_v10, %v6015_v4 }
0x2650   :  { %v6931_v5 = vpop.f32.mrb[60].mxu0  ;;  %v6966_v62 = vpop.f32.mrb[54].mxu1 }
0x2651   :  { %v6932_v59 = vpop.f32.mrb[61].mxu0  ;;  %v6967_v47 = vpop.f32.mrb[55].mxu1 }
0x2652   :  { %v6933_v35 = vadd.f32 %v6932_v59, %v6931_v5  ;;  %v6968_v37 = vadd.f32 %v6967_v47, %v6966_v62 }
0x2654   :  { %v6155_v6 = vadd.f32 %v6933_v35, %v6085_v34 }
0x2656   :  { %v6225_v61 = vadd.f32 %v6968_v37, %v6155_v6 }
0x2658   :  { %6229 = vst.msk [vmem:[#allocation6] sm:$0x3] %vm6228_vm7, %v6225_v61 }
0x2659   :  { %8228 = shalt.err (!%p8225_p4)
}
0x265a   :  { %s8229_s9 = scalar_lea.hbm %s8504_s27, 32 }
0x265b   :  { %p8230_p5 = scmp.ne.s32.totalorder %s8504_s27, %s8229_s9  ;;  %p8233_p6 = scmp.lt.u32.totalorder %s8229_s9, %s8504_s27 }
0x265d   :  { %p8235_p7 = pnand %p8233_p6, %p8230_p5 }
0x265f   :  { %8238 = shalt.err (!%p8235_p7)
}
0x2660   :  { %6239 = dma.vmem_to_hbm [thread:$0]  %s6237_s5, 32, %s8504_s27, [#allocation7]  }
0x2661   :  { %8243 = dma.done.wait [#allocation7], 32  }
0x2662   :  { %8244 = vsyncadd [#allocation7], 4294967264 }
0x2663   :  { %6243 = vsyncpa [#allocation7], 1 }
0x2664   :  { %6244 = vsyncmov [#allocation4] }
0x2667   :  { %s6245_s13 = vpop.sfrf %6244 }
0x2668   :  { %p6491_p8 = scmp.ne.s32.totalorder %s6245_s13, 0 }
0x266a   :  { %6249 = shalt.err (%p6491_p8)  }
0x266b   :  { %6251 = vsyncmov [#allocation4 + $0x1] }
0x266e   :  { %s6252_s17 = vpop.sfrf %6251 }
0x266f   :  { %p6492_p9 = scmp.ne.s32.totalorder %s6252_s17, 0 }
0x2671   :  { %6256 = shalt.err (%p6492_p9)  }

</bundles_post_ra>
